<compile_context>
chip_gen: v7x
topology: tpu7x:2x2x1
jax: 0.10.0
libtpu: 0.0.40
codegen_flags: <defaults>
</compile_context>

<pallas_src>
import functools

import numpy as np
import jax
import jax.numpy as jnp
from jax.experimental import pallas as pl
from jax.experimental.pallas import tpu as pltpu


def _make_conv3d_kernel(shifts, cin, pad_lane, lane_len):
    """`shifts` is a static tuple of flat-lane offsets, one per conv tap,
    in (kd, kh, kw) row-major order."""

    def kernel(x_ref, w_ref, b_ref, m_ref, o_ref, col_ref):
        # x_ref:   (1, Cin, EXT)   f32, zero halos already present (wrapper pad)
        # w_ref:   (Cout, KC)      bf16, contraction-minor weights
        # b_ref:   (Cout, 1)       f32
        # m_ref:   (Ktaps, L)      f32 boundary-validity masks (batch-tiled)
        # o_ref:   (1, Cout, L)    lane-dense output block
        # col_ref: (KC, L)         bf16 VMEM scratch, im2col matrix

        # im2col: per tap, one statically-offset ref slice (vld handles the lane
        # offset), one masked multiply on the VPU (f32), one bf16 store.
        # TODO(synk): pair taps into 8-row stores (sublane concat) if the vst
        # slot ever binds; at this geometry the per-tap stores are sublane-masked
        # but not the bottleneck.
        for t, s in enumerate(shifts):
            start = pad_lane + s                                  # static int
            slab = x_ref[0, :, start:start + lane_len]            # (Cin, L) f32
            masked = slab * m_ref[t:t + 1, :]                     # bcast over Cin
            col_ref[t * cin:(t + 1) * cin, :] = masked.astype(col_ref.dtype)

        # Single MXU matmul: bf16 operands, f32 accumulation.
        acc = jax.lax.dot_general(
            w_ref[...], col_ref[...],
            (((1,), (0,)), ((), ())),
            preferred_element_type=jnp.float32)                   # (Cout, L)
        o_ref[0] = (acc + b_ref[...]).astype(o_ref.dtype)         # lane-dense store

    return kernel


@functools.partial(jax.jit, static_argnames=("kernel_size", "batch_tile"))
def basic_conv3d(x_ncdhw, weight_oidhw, bias, *, kernel_size, batch_tile=None):
    """Forward of BasicConv3D(in_ch, out_ch, kernel_size) with defaults
    (bias='auto' -> True, bn=False, act=False):
        ConstantPad3d(kernel_size // 2, 0.0)   [if kernel_size >= 2]
        Conv3d(in_ch, out_ch, kernel_size, padding=0, bias=True)
    """
    N, Cin, D, H, W = x_ncdhw.shape
    Cout = weight_oidhw.shape[0]
    K = kernel_size
    p = K // 2 if K >= 2 else 0
    DHW = D * H * W
    KT = K * K * K
    KC = KT * Cin

    if batch_tile is None:
        # ceil(N/2): keeps >= 2 parallel grid steps whenever N >= 2 (v7x has 2
        # TensorCores).  On single-TC v5e/v6e, pass batch_tile=N to fully fuse.
        batch_tile = max(1, (N + 1) // 2)
    Nt = batch_tile
    G = -(-N // Nt)                      # number of grid steps
    Npad = G * Nt
    L = Nt * DHW                         # fused lane width per grid step

    # ---- trace-time constants (static shapes) -------------------------------
    pos = np.arange(DHW)
    dop, hop, wop = pos // (H * W), (pos // W) % H, pos % W
    shifts = []
    masks = np.zeros((KT, DHW), np.float32)
    t = 0
    for kd in range(K):
        for kh in range(K):
            for kw in range(K):
                dd, dh, dw = kd - p, kh - p, kw - p
                shifts.append(dd * H * W + dh * W + dw)
                masks[t] = (((dop + dd >= 0) & (dop + dd < D)) &
                            ((hop + dh >= 0) & (hop + dh < H)) &
                            ((wop + dw >= 0) & (wop + dw < W)))
                t += 1
    # Tile the per-element mask across the fused batch-lane axis (the masks also
    # zero shifted reads that would bleed across batch-element boundaries).
    masks = jnp.asarray(np.tile(masks, (1, Nt)))                  # (KT, L) f32

    max_shift = p * (H * W + W + 1)
    pad_lane = ((max_shift + 127) // 128) * 128 if max_shift else 0
    EXT = pad_lane + L + pad_lane

    # ---- lane-dense operand prep (layout plumbing only) ---------------------
    xf = x_ncdhw.reshape(N, Cin, DHW).astype(jnp.float32)
    if Npad != N:
        xf = jnp.pad(xf, ((0, Npad - N), (0, 0), (0, 0)))
    # Fuse the batch tile into the lane axis: (G, Cin, Nt*DHW).
    xf = xf.reshape(G, Nt, Cin, DHW).transpose(0, 2, 1, 3).reshape(G, Cin, L)
    # Zero lane halos: implements the d-boundary padding; h/w wrap is masked.
    xf = jnp.pad(xf, ((0, 0), (0, 0), (pad_lane, pad_lane)))      # (G, Cin, EXT)

    w2 = jnp.transpose(weight_oidhw, (0, 2, 3, 4, 1)).reshape(Cout, KC)
    w2 = w2.astype(jnp.bfloat16)                                  # bf16 MXU operand
    b2 = bias.reshape(Cout, 1).astype(jnp.float32)

    kernel = _make_conv3d_kernel(tuple(shifts), Cin, pad_lane, L)

    out = pl.pallas_call(
        kernel,
        out_shape=jax.ShapeDtypeStruct((G, Cout, L), jnp.float32),
        grid=(G,),
        in_specs=[
            pl.BlockSpec((1, Cin, EXT), lambda g: (g, 0, 0)),
            pl.BlockSpec((Cout, KC), lambda g: (0, 0)),   # constant -> fetched once
            pl.BlockSpec((Cout, 1), lambda g: (0, 0)),    # constant -> fetched once
            pl.BlockSpec((KT, L), lambda g: (0, 0)),      # constant -> fetched once
        ],
        out_specs=pl.BlockSpec((1, Cout, L), lambda g: (g, 0, 0)),
        scratch_shapes=[
            pltpu.VMEM((KC, L), jnp.bfloat16),            # im2col matrix
        ],
        compiler_params=pltpu.CompilerParams(
            dimension_semantics=("parallel",),
            vmem_limit_bytes=32 * 1024 * 1024),
    )(xf, w2, b2, masks)

    out = (out.reshape(G, Cout, Nt, DHW).transpose(0, 2, 1, 3)
              .reshape(Npad, Cout, D, H, W))
    return out[:N] if Npad != N else out


if __name__ == "__main__":
    # Small shapes consistent with the module: in_ch=4, out_ch=8, D=H=W=8, K=3.
    # N=4 exercises the batch-fused layout (default batch_tile=2 -> 2 parallel
    # grid steps of lane width 1024).
    N, Cin, Cout, D, H, W, K = 4, 4, 8, 8, 8, 8, 3

    key = jax.random.PRNGKey(0)
    kx, kw_, kb = jax.random.split(key, 3)
    x = jax.random.normal(kx, (N, Cin, D, H, W), jnp.float32)
    # PyTorch Conv3d-style init (weight shape (Cout, Cin, K, K, K)).
    fan_in = Cin * K * K * K
    bound = 1.0 / (fan_in ** 0.5)
    weight = jax.random.uniform(kw_, (Cout, Cin, K, K, K), jnp.float32,
                                minval=-bound, maxval=bound)
    bias = jax.random.uniform(kb, (Cout,), jnp.float32,
                              minval=-bound, maxval=bound)

    out = basic_conv3d(x, weight, bias, kernel_size=K)
    out = jax.block_until_ready(out)

    # Cross-check against XLA's conv (same semantics: pad K//2, stride 1, +bias).
    ref = jax.lax.conv_general_dilated(
        x, weight, window_strides=(1, 1, 1),
        padding=[(K // 2, K // 2)] * 3,
        dimension_numbers=("NCDHW", "OIDHW", "NCDHW"),
    ) + bias.reshape(1, Cout, 1, 1, 1)

    assert out.shape == ref.shape, (out.shape, ref.shape)
    # bf16 MXU operands with f32 accumulation -> slightly looser tolerance
    # than the all-f32 variant.
    assert jnp.allclose(out, ref, atol=1e-2, rtol=1e-2), \
        float(jnp.max(jnp.abs(out - ref)))
    print("KERNEL_OK")
</pallas_src>

<mosaic_0001>
module attributes {stable_mosaic.version = 11 : i64} {
  func.func @kernel(%arg0: i32, %arg1: memref<1x4x1280xf32, #tpu.memory_space<vmem>>, %arg2: memref<8x108xbf16, #tpu.memory_space<vmem>>, %arg3: memref<8x1xf32, #tpu.memory_space<vmem>>, %arg4: memref<27x1024xf32, #tpu.memory_space<vmem>>, %arg5: memref<1x8x1024xf32, #tpu.memory_space<vmem>>, %arg6: memref<108x1024xbf16, #tpu.memory_space<vmem>>) attributes {dimension_semantics = [#tpu.dimension_semantics<parallel>], iteration_bounds = array<i64: 2>, scalar_prefetch = 0 : i64, scratch_operands = 1 : i64, tpu.core_type = #tpu.core_type<tc>, window_params = [{transform_indices = @transform_0, window_bounds = array<i64: 1, 4, 1280>}, {pipeline_mode = #tpu.pipeline_mode<synchronous>, transform_indices = @transform_1, window_bounds = array<i64: 8, 108>}, {pipeline_mode = #tpu.pipeline_mode<synchronous>, transform_indices = @transform_2, window_bounds = array<i64: 8, 1>}, {pipeline_mode = #tpu.pipeline_mode<synchronous>, transform_indices = @transform_3, window_bounds = array<i64: 27, 1024>}, {transform_indices = @transform_4, window_bounds = array<i64: 1, 8, 1024>}]} {
    %c0 = arith.constant 0 : index
    %c0_0 = arith.constant 0 : index
    %c55 = arith.constant 55 : index
    %0 = vector.load %arg1[%c0, %c0_0, %c55] : memref<1x4x1280xf32, #tpu.memory_space<vmem>>, vector<1x4x1024xf32>
    %1 = vector.shape_cast %0 : vector<1x4x1024xf32> to vector<4x1024xf32>
    %c0_1 = arith.constant 0 : index
    %c0_2 = arith.constant 0 : index
    %2 = vector.load %arg4[%c0_1, %c0_2] : memref<27x1024xf32, #tpu.memory_space<vmem>>, vector<1x1024xf32>
    %3 = vector.broadcast %2 : vector<1x1024xf32> to vector<4x1024xf32>
    %4 = arith.mulf %1, %3 : vector<4x1024xf32>
    %5 = arith.truncf %4 : vector<4x1024xf32> to vector<4x1024xbf16>
    %c0_3 = arith.constant 0 : index
    %c0_4 = arith.constant 0 : index
    %6 = vector.load %arg6[%c0_3, %c0_4] : memref<108x1024xbf16, #tpu.memory_space<vmem>>, vector<4x1024xbf16>
    tpu.vector_store %arg6[%c0_3, %c0_4], %5 {strides = array<i32>} : memref<108x1024xbf16, #tpu.memory_space<vmem>>, vector<4x1024xbf16>,
    %c0_5 = arith.constant 0 : index
    %c0_6 = arith.constant 0 : index
    %c56 = arith.constant 56 : index
    %7 = vector.load %arg1[%c0_5, %c0_6, %c56] : memref<1x4x1280xf32, #tpu.memory_space<vmem>>, vector<1x4x1024xf32>
    %8 = vector.shape_cast %7 : vector<1x4x1024xf32> to vector<4x1024xf32>
    %c1 = arith.constant 1 : index
    %c0_7 = arith.constant 0 : index
    %9 = vector.load %arg4[%c1, %c0_7] : memref<27x1024xf32, #tpu.memory_space<vmem>>, vector<1x1024xf32>
    %10 = vector.broadcast %9 : vector<1x1024xf32> to vector<4x1024xf32>
    %11 = arith.mulf %8, %10 : vector<4x1024xf32>
    %12 = arith.truncf %11 : vector<4x1024xf32> to vector<4x1024xbf16>
    %c4 = arith.constant 4 : index
    %c0_8 = arith.constant 0 : index
    %13 = vector.load %arg6[%c4, %c0_8] : memref<108x1024xbf16, #tpu.memory_space<vmem>>, vector<4x1024xbf16>
    tpu.vector_store %arg6[%c4, %c0_8], %12 {strides = array<i32>} : memref<108x1024xbf16, #tpu.memory_space<vmem>>, vector<4x1024xbf16>,
    %c0_9 = arith.constant 0 : index
    %c0_10 = arith.constant 0 : index
    %c57 = arith.constant 57 : index
    %14 = vector.load %arg1[%c0_9, %c0_10, %c57] : memref<1x4x1280xf32, #tpu.memory_space<vmem>>, vector<1x4x1024xf32>
    %15 = vector.shape_cast %14 : vector<1x4x1024xf32> to vector<4x1024xf32>
    %c2 = arith.constant 2 : index
    %c0_11 = arith.constant 0 : index
    %16 = vector.load %arg4[%c2, %c0_11] : memref<27x1024xf32, #tpu.memory_space<vmem>>, vector<1x1024xf32>
    %17 = vector.broadcast %16 : vector<1x1024xf32> to vector<4x1024xf32>
    %18 = arith.mulf %15, %17 : vector<4x1024xf32>
    %19 = arith.truncf %18 : vector<4x1024xf32> to vector<4x1024xbf16>
    %c8 = arith.constant 8 : index
    %c0_12 = arith.constant 0 : index
    %20 = vector.load %arg6[%c8, %c0_12] : memref<108x1024xbf16, #tpu.memory_space<vmem>>, vector<4x1024xbf16>
    tpu.vector_store %arg6[%c8, %c0_12], %19 {strides = array<i32>} : memref<108x1024xbf16, #tpu.memory_space<vmem>>, vector<4x1024xbf16>,
    %c0_13 = arith.constant 0 : index
    %c0_14 = arith.constant 0 : index
    %c63 = arith.constant 63 : index
    %21 = vector.load %arg1[%c0_13, %c0_14, %c63] : memref<1x4x1280xf32, #tpu.memory_space<vmem>>, vector<1x4x1024xf32>
    %22 = vector.shape_cast %21 : vector<1x4x1024xf32> to vector<4x1024xf32>
    %c3 = arith.constant 3 : index
    %c0_15 = arith.constant 0 : index
    %23 = vector.load %arg4[%c3, %c0_15] : memref<27x1024xf32, #tpu.memory_space<vmem>>, vector<1x1024xf32>
    %24 = vector.broadcast %23 : vector<1x1024xf32> to vector<4x1024xf32>
    %25 = arith.mulf %22, %24 : vector<4x1024xf32>
    %26 = arith.truncf %25 : vector<4x1024xf32> to vector<4x1024xbf16>
    %c12 = arith.constant 12 : index
    %c0_16 = arith.constant 0 : index
    %27 = vector.load %arg6[%c12, %c0_16] : memref<108x1024xbf16, #tpu.memory_space<vmem>>, vector<4x1024xbf16>
    tpu.vector_store %arg6[%c12, %c0_16], %26 {strides = array<i32>} : memref<108x1024xbf16, #tpu.memory_space<vmem>>, vector<4x1024xbf16>,
    %c0_17 = arith.constant 0 : index
    %c0_18 = arith.constant 0 : index
    %c64 = arith.constant 64 : index
    %28 = vector.load %arg1[%c0_17, %c0_18, %c64] : memref<1x4x1280xf32, #tpu.memory_space<vmem>>, vector<1x4x1024xf32>
    %29 = vector.shape_cast %28 : vector<1x4x1024xf32> to vector<4x1024xf32>
    %c4_19 = arith.constant 4 : index
    %c0_20 = arith.constant 0 : index
    %30 = vector.load %arg4[%c4_19, %c0_20] : memref<27x1024xf32, #tpu.memory_space<vmem>>, vector<1x1024xf32>
    %31 = vector.broadcast %30 : vector<1x1024xf32> to vector<4x1024xf32>
    %32 = arith.mulf %29, %31 : vector<4x1024xf32>
    %33 = arith.truncf %32 : vector<4x1024xf32> to vector<4x1024xbf16>
    %c16 = arith.constant 16 : index
    %c0_21 = arith.constant 0 : index
    %34 = vector.load %arg6[%c16, %c0_21] : memref<108x1024xbf16, #tpu.memory_space<vmem>>, vector<4x1024xbf16>
    tpu.vector_store %arg6[%c16, %c0_21], %33 {strides = array<i32>} : memref<108x1024xbf16, #tpu.memory_space<vmem>>, vector<4x1024xbf16>,
    %c0_22 = arith.constant 0 : index
    %c0_23 = arith.constant 0 : index
    %c65 = arith.constant 65 : index
    %35 = vector.load %arg1[%c0_22, %c0_23, %c65] : memref<1x4x1280xf32, #tpu.memory_space<vmem>>, vector<1x4x1024xf32>
    %36 = vector.shape_cast %35 : vector<1x4x1024xf32> to vector<4x1024xf32>
    %c5 = arith.constant 5 : index
    %c0_24 = arith.constant 0 : index
    %37 = vector.load %arg4[%c5, %c0_24] : memref<27x1024xf32, #tpu.memory_space<vmem>>, vector<1x1024xf32>
    %38 = vector.broadcast %37 : vector<1x1024xf32> to vector<4x1024xf32>
    %39 = arith.mulf %36, %38 : vector<4x1024xf32>
    %40 = arith.truncf %39 : vector<4x1024xf32> to vector<4x1024xbf16>
    %c20 = arith.constant 20 : index
    %c0_25 = arith.constant 0 : index
    %41 = vector.load %arg6[%c20, %c0_25] : memref<108x1024xbf16, #tpu.memory_space<vmem>>, vector<4x1024xbf16>
    tpu.vector_store %arg6[%c20, %c0_25], %40 {strides = array<i32>} : memref<108x1024xbf16, #tpu.memory_space<vmem>>, vector<4x1024xbf16>,
    %c0_26 = arith.constant 0 : index
    %c0_27 = arith.constant 0 : index
    %c71 = arith.constant 71 : index
    %42 = vector.load %arg1[%c0_26, %c0_27, %c71] : memref<1x4x1280xf32, #tpu.memory_space<vmem>>, vector<1x4x1024xf32>
    %43 = vector.shape_cast %42 : vector<1x4x1024xf32> to vector<4x1024xf32>
    %c6 = arith.constant 6 : index
    %c0_28 = arith.constant 0 : index
    %44 = vector.load %arg4[%c6, %c0_28] : memref<27x1024xf32, #tpu.memory_space<vmem>>, vector<1x1024xf32>
    %45 = vector.broadcast %44 : vector<1x1024xf32> to vector<4x1024xf32>
    %46 = arith.mulf %43, %45 : vector<4x1024xf32>
    %47 = arith.truncf %46 : vector<4x1024xf32> to vector<4x1024xbf16>
    %c24 = arith.constant 24 : index
    %c0_29 = arith.constant 0 : index
    %48 = vector.load %arg6[%c24, %c0_29] : memref<108x1024xbf16, #tpu.memory_space<vmem>>, vector<4x1024xbf16>
    tpu.vector_store %arg6[%c24, %c0_29], %47 {strides = array<i32>} : memref<108x1024xbf16, #tpu.memory_space<vmem>>, vector<4x1024xbf16>,
    %c0_30 = arith.constant 0 : index
    %c0_31 = arith.constant 0 : index
    %c72 = arith.constant 72 : index
    %49 = vector.load %arg1[%c0_30, %c0_31, %c72] : memref<1x4x1280xf32, #tpu.memory_space<vmem>>, vector<1x4x1024xf32>
    %50 = vector.shape_cast %49 : vector<1x4x1024xf32> to vector<4x1024xf32>
    %c7 = arith.constant 7 : index
    %c0_32 = arith.constant 0 : index
    %51 = vector.load %arg4[%c7, %c0_32] : memref<27x1024xf32, #tpu.memory_space<vmem>>, vector<1x1024xf32>
    %52 = vector.broadcast %51 : vector<1x1024xf32> to vector<4x1024xf32>
    %53 = arith.mulf %50, %52 : vector<4x1024xf32>
    %54 = arith.truncf %53 : vector<4x1024xf32> to vector<4x1024xbf16>
    %c28 = arith.constant 28 : index
    %c0_33 = arith.constant 0 : index
    %55 = vector.load %arg6[%c28, %c0_33] : memref<108x1024xbf16, #tpu.memory_space<vmem>>, vector<4x1024xbf16>
    tpu.vector_store %arg6[%c28, %c0_33], %54 {strides = array<i32>} : memref<108x1024xbf16, #tpu.memory_space<vmem>>, vector<4x1024xbf16>,
    %c0_34 = arith.constant 0 : index
    %c0_35 = arith.constant 0 : index
    %c73 = arith.constant 73 : index
    %56 = vector.load %arg1[%c0_34, %c0_35, %c73] : memref<1x4x1280xf32, #tpu.memory_space<vmem>>, vector<1x4x1024xf32>
    %57 = vector.shape_cast %56 : vector<1x4x1024xf32> to vector<4x1024xf32>
    %c8_36 = arith.constant 8 : index
    %c0_37 = arith.constant 0 : index
    %58 = vector.load %arg4[%c8_36, %c0_37] : memref<27x1024xf32, #tpu.memory_space<vmem>>, vector<1x1024xf32>
    %59 = vector.broadcast %58 : vector<1x1024xf32> to vector<4x1024xf32>
    %60 = arith.mulf %57, %59 : vector<4x1024xf32>
    %61 = arith.truncf %60 : vector<4x1024xf32> to vector<4x1024xbf16>
    %c32 = arith.constant 32 : index
    %c0_38 = arith.constant 0 : index
    %62 = vector.load %arg6[%c32, %c0_38] : memref<108x1024xbf16, #tpu.memory_space<vmem>>, vector<4x1024xbf16>
    tpu.vector_store %arg6[%c32, %c0_38], %61 {strides = array<i32>} : memref<108x1024xbf16, #tpu.memory_space<vmem>>, vector<4x1024xbf16>,
    %c0_39 = arith.constant 0 : index
    %c0_40 = arith.constant 0 : index
    %c119 = arith.constant 119 : index
    %63 = vector.load %arg1[%c0_39, %c0_40, %c119] : memref<1x4x1280xf32, #tpu.memory_space<vmem>>, vector<1x4x1024xf32>
    %64 = vector.shape_cast %63 : vector<1x4x1024xf32> to vector<4x1024xf32>
    %c9 = arith.constant 9 : index
    %c0_41 = arith.constant 0 : index
    %65 = vector.load %arg4[%c9, %c0_41] : memref<27x1024xf32, #tpu.memory_space<vmem>>, vector<1x1024xf32>
    %66 = vector.broadcast %65 : vector<1x1024xf32> to vector<4x1024xf32>
    %67 = arith.mulf %64, %66 : vector<4x1024xf32>
    %68 = arith.truncf %67 : vector<4x1024xf32> to vector<4x1024xbf16>
    %c36 = arith.constant 36 : index
    %c0_42 = arith.constant 0 : index
    %69 = vector.load %arg6[%c36, %c0_42] : memref<108x1024xbf16, #tpu.memory_space<vmem>>, vector<4x1024xbf16>
    tpu.vector_store %arg6[%c36, %c0_42], %68 {strides = array<i32>} : memref<108x1024xbf16, #tpu.memory_space<vmem>>, vector<4x1024xbf16>,
    %c0_43 = arith.constant 0 : index
    %c0_44 = arith.constant 0 : index
    %c120 = arith.constant 120 : index
    %70 = vector.load %arg1[%c0_43, %c0_44, %c120] : memref<1x4x1280xf32, #tpu.memory_space<vmem>>, vector<1x4x1024xf32>
    %71 = vector.shape_cast %70 : vector<1x4x1024xf32> to vector<4x1024xf32>
    %c10 = arith.constant 10 : index
    %c0_45 = arith.constant 0 : index
    %72 = vector.load %arg4[%c10, %c0_45] : memref<27x1024xf32, #tpu.memory_space<vmem>>, vector<1x1024xf32>
    %73 = vector.broadcast %72 : vector<1x1024xf32> to vector<4x1024xf32>
    %74 = arith.mulf %71, %73 : vector<4x1024xf32>
    %75 = arith.truncf %74 : vector<4x1024xf32> to vector<4x1024xbf16>
    %c40 = arith.constant 40 : index
    %c0_46 = arith.constant 0 : index
    %76 = vector.load %arg6[%c40, %c0_46] : memref<108x1024xbf16, #tpu.memory_space<vmem>>, vector<4x1024xbf16>
    tpu.vector_store %arg6[%c40, %c0_46], %75 {strides = array<i32>} : memref<108x1024xbf16, #tpu.memory_space<vmem>>, vector<4x1024xbf16>,
    %c0_47 = arith.constant 0 : index
    %c0_48 = arith.constant 0 : index
    %c121 = arith.constant 121 : index
    %77 = vector.load %arg1[%c0_47, %c0_48, %c121] : memref<1x4x1280xf32, #tpu.memory_space<vmem>>, vector<1x4x1024xf32>
    %78 = vector.shape_cast %77 : vector<1x4x1024xf32> to vector<4x1024xf32>
    %c11 = arith.constant 11 : index
    %c0_49 = arith.constant 0 : index
    %79 = vector.load %arg4[%c11, %c0_49] : memref<27x1024xf32, #tpu.memory_space<vmem>>, vector<1x1024xf32>
    %80 = vector.broadcast %79 : vector<1x1024xf32> to vector<4x1024xf32>
    %81 = arith.mulf %78, %80 : vector<4x1024xf32>
    %82 = arith.truncf %81 : vector<4x1024xf32> to vector<4x1024xbf16>
    %c44 = arith.constant 44 : index
    %c0_50 = arith.constant 0 : index
    %83 = vector.load %arg6[%c44, %c0_50] : memref<108x1024xbf16, #tpu.memory_space<vmem>>, vector<4x1024xbf16>
    tpu.vector_store %arg6[%c44, %c0_50], %82 {strides = array<i32>} : memref<108x1024xbf16, #tpu.memory_space<vmem>>, vector<4x1024xbf16>,
    %c0_51 = arith.constant 0 : index
    %c0_52 = arith.constant 0 : index
    %c127 = arith.constant 127 : index
    %84 = vector.load %arg1[%c0_51, %c0_52, %c127] : memref<1x4x1280xf32, #tpu.memory_space<vmem>>, vector<1x4x1024xf32>
    %85 = vector.shape_cast %84 : vector<1x4x1024xf32> to vector<4x1024xf32>
    %c12_53 = arith.constant 12 : index
    %c0_54 = arith.constant 0 : index
    %86 = vector.load %arg4[%c12_53, %c0_54] : memref<27x1024xf32, #tpu.memory_space<vmem>>, vector<1x1024xf32>
    %87 = vector.broadcast %86 : vector<1x1024xf32> to vector<4x1024xf32>
    %88 = arith.mulf %85, %87 : vector<4x1024xf32>
    %89 = arith.truncf %88 : vector<4x1024xf32> to vector<4x1024xbf16>
    %c48 = arith.constant 48 : index
    %c0_55 = arith.constant 0 : index
    %90 = vector.load %arg6[%c48, %c0_55] : memref<108x1024xbf16, #tpu.memory_space<vmem>>, vector<4x1024xbf16>
    tpu.vector_store %arg6[%c48, %c0_55], %89 {strides = array<i32>} : memref<108x1024xbf16, #tpu.memory_space<vmem>>, vector<4x1024xbf16>,
    %c0_56 = arith.constant 0 : index
    %c0_57 = arith.constant 0 : index
    %c128 = arith.constant 128 : index
    %91 = vector.load %arg1[%c0_56, %c0_57, %c128] : memref<1x4x1280xf32, #tpu.memory_space<vmem>>, vector<1x4x1024xf32>
    %92 = vector.shape_cast %91 : vector<1x4x1024xf32> to vector<4x1024xf32>
    %c13 = arith.constant 13 : index
    %c0_58 = arith.constant 0 : index
    %93 = vector.load %arg4[%c13, %c0_58] : memref<27x1024xf32, #tpu.memory_space<vmem>>, vector<1x1024xf32>
    %94 = vector.broadcast %93 : vector<1x1024xf32> to vector<4x1024xf32>
    %95 = arith.mulf %92, %94 : vector<4x1024xf32>
    %96 = arith.truncf %95 : vector<4x1024xf32> to vector<4x1024xbf16>
    %c52 = arith.constant 52 : index
    %c0_59 = arith.constant 0 : index
    %97 = vector.load %arg6[%c52, %c0_59] : memref<108x1024xbf16, #tpu.memory_space<vmem>>, vector<4x1024xbf16>
    tpu.vector_store %arg6[%c52, %c0_59], %96 {strides = array<i32>} : memref<108x1024xbf16, #tpu.memory_space<vmem>>, vector<4x1024xbf16>,
    %c0_60 = arith.constant 0 : index
    %c0_61 = arith.constant 0 : index
    %c129 = arith.constant 129 : index
    %98 = vector.load %arg1[%c0_60, %c0_61, %c129] : memref<1x4x1280xf32, #tpu.memory_space<vmem>>, vector<1x4x1024xf32>
    %99 = vector.shape_cast %98 : vector<1x4x1024xf32> to vector<4x1024xf32>
    %c14 = arith.constant 14 : index
    %c0_62 = arith.constant 0 : index
    %100 = vector.load %arg4[%c14, %c0_62] : memref<27x1024xf32, #tpu.memory_space<vmem>>, vector<1x1024xf32>
    %101 = vector.broadcast %100 : vector<1x1024xf32> to vector<4x1024xf32>
    %102 = arith.mulf %99, %101 : vector<4x1024xf32>
    %103 = arith.truncf %102 : vector<4x1024xf32> to vector<4x1024xbf16>
    %c56_63 = arith.constant 56 : index
    %c0_64 = arith.constant 0 : index
    %104 = vector.load %arg6[%c56_63, %c0_64] : memref<108x1024xbf16, #tpu.memory_space<vmem>>, vector<4x1024xbf16>
    tpu.vector_store %arg6[%c56_63, %c0_64], %103 {strides = array<i32>} : memref<108x1024xbf16, #tpu.memory_space<vmem>>, vector<4x1024xbf16>,
    %c0_65 = arith.constant 0 : index
    %c0_66 = arith.constant 0 : index
    %c135 = arith.constant 135 : index
    %105 = vector.load %arg1[%c0_65, %c0_66, %c135] : memref<1x4x1280xf32, #tpu.memory_space<vmem>>, vector<1x4x1024xf32>
    %106 = vector.shape_cast %105 : vector<1x4x1024xf32> to vector<4x1024xf32>
    %c15 = arith.constant 15 : index
    %c0_67 = arith.constant 0 : index
    %107 = vector.load %arg4[%c15, %c0_67] : memref<27x1024xf32, #tpu.memory_space<vmem>>, vector<1x1024xf32>
    %108 = vector.broadcast %107 : vector<1x1024xf32> to vector<4x1024xf32>
    %109 = arith.mulf %106, %108 : vector<4x1024xf32>
    %110 = arith.truncf %109 : vector<4x1024xf32> to vector<4x1024xbf16>
    %c60 = arith.constant 60 : index
    %c0_68 = arith.constant 0 : index
    %111 = vector.load %arg6[%c60, %c0_68] : memref<108x1024xbf16, #tpu.memory_space<vmem>>, vector<4x1024xbf16>
    tpu.vector_store %arg6[%c60, %c0_68], %110 {strides = array<i32>} : memref<108x1024xbf16, #tpu.memory_space<vmem>>, vector<4x1024xbf16>,
    %c0_69 = arith.constant 0 : index
    %c0_70 = arith.constant 0 : index
    %c136 = arith.constant 136 : index
    %112 = vector.load %arg1[%c0_69, %c0_70, %c136] : memref<1x4x1280xf32, #tpu.memory_space<vmem>>, vector<1x4x1024xf32>
    %113 = vector.shape_cast %112 : vector<1x4x1024xf32> to vector<4x1024xf32>
    %c16_71 = arith.constant 16 : index
    %c0_72 = arith.constant 0 : index
    %114 = vector.load %arg4[%c16_71, %c0_72] : memref<27x1024xf32, #tpu.memory_space<vmem>>, vector<1x1024xf32>
    %115 = vector.broadcast %114 : vector<1x1024xf32> to vector<4x1024xf32>
    %116 = arith.mulf %113, %115 : vector<4x1024xf32>
    %117 = arith.truncf %116 : vector<4x1024xf32> to vector<4x1024xbf16>
    %c64_73 = arith.constant 64 : index
    %c0_74 = arith.constant 0 : index
    %118 = vector.load %arg6[%c64_73, %c0_74] : memref<108x1024xbf16, #tpu.memory_space<vmem>>, vector<4x1024xbf16>
    tpu.vector_store %arg6[%c64_73, %c0_74], %117 {strides = array<i32>} : memref<108x1024xbf16, #tpu.memory_space<vmem>>, vector<4x1024xbf16>,
    %c0_75 = arith.constant 0 : index
    %c0_76 = arith.constant 0 : index
    %c137 = arith.constant 137 : index
    %119 = vector.load %arg1[%c0_75, %c0_76, %c137] : memref<1x4x1280xf32, #tpu.memory_space<vmem>>, vector<1x4x1024xf32>
    %120 = vector.shape_cast %119 : vector<1x4x1024xf32> to vector<4x1024xf32>
    %c17 = arith.constant 17 : index
    %c0_77 = arith.constant 0 : index
    %121 = vector.load %arg4[%c17, %c0_77] : memref<27x1024xf32, #tpu.memory_space<vmem>>, vector<1x1024xf32>
    %122 = vector.broadcast %121 : vector<1x1024xf32> to vector<4x1024xf32>
    %123 = arith.mulf %120, %122 : vector<4x1024xf32>
    %124 = arith.truncf %123 : vector<4x1024xf32> to vector<4x1024xbf16>
    %c68 = arith.constant 68 : index
    %c0_78 = arith.constant 0 : index
    %125 = vector.load %arg6[%c68, %c0_78] : memref<108x1024xbf16, #tpu.memory_space<vmem>>, vector<4x1024xbf16>
    tpu.vector_store %arg6[%c68, %c0_78], %124 {strides = array<i32>} : memref<108x1024xbf16, #tpu.memory_space<vmem>>, vector<4x1024xbf16>,
    %c0_79 = arith.constant 0 : index
    %c0_80 = arith.constant 0 : index
    %c183 = arith.constant 183 : index
    %126 = vector.load %arg1[%c0_79, %c0_80, %c183] : memref<1x4x1280xf32, #tpu.memory_space<vmem>>, vector<1x4x1024xf32>
    %127 = vector.shape_cast %126 : vector<1x4x1024xf32> to vector<4x1024xf32>
    %c18 = arith.constant 18 : index
    %c0_81 = arith.constant 0 : index
    %128 = vector.load %arg4[%c18, %c0_81] : memref<27x1024xf32, #tpu.memory_space<vmem>>, vector<1x1024xf32>
    %129 = vector.broadcast %128 : vector<1x1024xf32> to vector<4x1024xf32>
    %130 = arith.mulf %127, %129 : vector<4x1024xf32>
    %131 = arith.truncf %130 : vector<4x1024xf32> to vector<4x1024xbf16>
    %c72_82 = arith.constant 72 : index
    %c0_83 = arith.constant 0 : index
    %132 = vector.load %arg6[%c72_82, %c0_83] : memref<108x1024xbf16, #tpu.memory_space<vmem>>, vector<4x1024xbf16>
    tpu.vector_store %arg6[%c72_82, %c0_83], %131 {strides = array<i32>} : memref<108x1024xbf16, #tpu.memory_space<vmem>>, vector<4x1024xbf16>,
    %c0_84 = arith.constant 0 : index
    %c0_85 = arith.constant 0 : index
    %c184 = arith.constant 184 : index
    %133 = vector.load %arg1[%c0_84, %c0_85, %c184] : memref<1x4x1280xf32, #tpu.memory_space<vmem>>, vector<1x4x1024xf32>
    %134 = vector.shape_cast %133 : vector<1x4x1024xf32> to vector<4x1024xf32>
    %c19 = arith.constant 19 : index
    %c0_86 = arith.constant 0 : index
    %135 = vector.load %arg4[%c19, %c0_86] : memref<27x1024xf32, #tpu.memory_space<vmem>>, vector<1x1024xf32>
    %136 = vector.broadcast %135 : vector<1x1024xf32> to vector<4x1024xf32>
    %137 = arith.mulf %134, %136 : vector<4x1024xf32>
    %138 = arith.truncf %137 : vector<4x1024xf32> to vector<4x1024xbf16>
    %c76 = arith.constant 76 : index
    %c0_87 = arith.constant 0 : index
    %139 = vector.load %arg6[%c76, %c0_87] : memref<108x1024xbf16, #tpu.memory_space<vmem>>, vector<4x1024xbf16>
    tpu.vector_store %arg6[%c76, %c0_87], %138 {strides = array<i32>} : memref<108x1024xbf16, #tpu.memory_space<vmem>>, vector<4x1024xbf16>,
    %c0_88 = arith.constant 0 : index
    %c0_89 = arith.constant 0 : index
    %c185 = arith.constant 185 : index
    %140 = vector.load %arg1[%c0_88, %c0_89, %c185] : memref<1x4x1280xf32, #tpu.memory_space<vmem>>, vector<1x4x1024xf32>
    %141 = vector.shape_cast %140 : vector<1x4x1024xf32> to vector<4x1024xf32>
    %c20_90 = arith.constant 20 : index
    %c0_91 = arith.constant 0 : index
    %142 = vector.load %arg4[%c20_90, %c0_91] : memref<27x1024xf32, #tpu.memory_space<vmem>>, vector<1x1024xf32>
    %143 = vector.broadcast %142 : vector<1x1024xf32> to vector<4x1024xf32>
    %144 = arith.mulf %141, %143 : vector<4x1024xf32>
    %145 = arith.truncf %144 : vector<4x1024xf32> to vector<4x1024xbf16>
    %c80 = arith.constant 80 : index
    %c0_92 = arith.constant 0 : index
    %146 = vector.load %arg6[%c80, %c0_92] : memref<108x1024xbf16, #tpu.memory_space<vmem>>, vector<4x1024xbf16>
    tpu.vector_store %arg6[%c80, %c0_92], %145 {strides = array<i32>} : memref<108x1024xbf16, #tpu.memory_space<vmem>>, vector<4x1024xbf16>,
    %c0_93 = arith.constant 0 : index
    %c0_94 = arith.constant 0 : index
    %c191 = arith.constant 191 : index
    %147 = vector.load %arg1[%c0_93, %c0_94, %c191] : memref<1x4x1280xf32, #tpu.memory_space<vmem>>, vector<1x4x1024xf32>
    %148 = vector.shape_cast %147 : vector<1x4x1024xf32> to vector<4x1024xf32>
    %c21 = arith.constant 21 : index
    %c0_95 = arith.constant 0 : index
    %149 = vector.load %arg4[%c21, %c0_95] : memref<27x1024xf32, #tpu.memory_space<vmem>>, vector<1x1024xf32>
    %150 = vector.broadcast %149 : vector<1x1024xf32> to vector<4x1024xf32>
    %151 = arith.mulf %148, %150 : vector<4x1024xf32>
    %152 = arith.truncf %151 : vector<4x1024xf32> to vector<4x1024xbf16>
    %c84 = arith.constant 84 : index
    %c0_96 = arith.constant 0 : index
    %153 = vector.load %arg6[%c84, %c0_96] : memref<108x1024xbf16, #tpu.memory_space<vmem>>, vector<4x1024xbf16>
    tpu.vector_store %arg6[%c84, %c0_96], %152 {strides = array<i32>} : memref<108x1024xbf16, #tpu.memory_space<vmem>>, vector<4x1024xbf16>,
    %c0_97 = arith.constant 0 : index
    %c0_98 = arith.constant 0 : index
    %c192 = arith.constant 192 : index
    %154 = vector.load %arg1[%c0_97, %c0_98, %c192] : memref<1x4x1280xf32, #tpu.memory_space<vmem>>, vector<1x4x1024xf32>
    %155 = vector.shape_cast %154 : vector<1x4x1024xf32> to vector<4x1024xf32>
    %c22 = arith.constant 22 : index
    %c0_99 = arith.constant 0 : index
    %156 = vector.load %arg4[%c22, %c0_99] : memref<27x1024xf32, #tpu.memory_space<vmem>>, vector<1x1024xf32>
    %157 = vector.broadcast %156 : vector<1x1024xf32> to vector<4x1024xf32>
    %158 = arith.mulf %155, %157 : vector<4x1024xf32>
    %159 = arith.truncf %158 : vector<4x1024xf32> to vector<4x1024xbf16>
    %c88 = arith.constant 88 : index
    %c0_100 = arith.constant 0 : index
    %160 = vector.load %arg6[%c88, %c0_100] : memref<108x1024xbf16, #tpu.memory_space<vmem>>, vector<4x1024xbf16>
    tpu.vector_store %arg6[%c88, %c0_100], %159 {strides = array<i32>} : memref<108x1024xbf16, #tpu.memory_space<vmem>>, vector<4x1024xbf16>,
    %c0_101 = arith.constant 0 : index
    %c0_102 = arith.constant 0 : index
    %c193 = arith.constant 193 : index
    %161 = vector.load %arg1[%c0_101, %c0_102, %c193] : memref<1x4x1280xf32, #tpu.memory_space<vmem>>, vector<1x4x1024xf32>
    %162 = vector.shape_cast %161 : vector<1x4x1024xf32> to vector<4x1024xf32>
    %c23 = arith.constant 23 : index
    %c0_103 = arith.constant 0 : index
    %163 = vector.load %arg4[%c23, %c0_103] : memref<27x1024xf32, #tpu.memory_space<vmem>>, vector<1x1024xf32>
    %164 = vector.broadcast %163 : vector<1x1024xf32> to vector<4x1024xf32>
    %165 = arith.mulf %162, %164 : vector<4x1024xf32>
    %166 = arith.truncf %165 : vector<4x1024xf32> to vector<4x1024xbf16>
    %c92 = arith.constant 92 : index
    %c0_104 = arith.constant 0 : index
    %167 = vector.load %arg6[%c92, %c0_104] : memref<108x1024xbf16, #tpu.memory_space<vmem>>, vector<4x1024xbf16>
    tpu.vector_store %arg6[%c92, %c0_104], %166 {strides = array<i32>} : memref<108x1024xbf16, #tpu.memory_space<vmem>>, vector<4x1024xbf16>,
    %c0_105 = arith.constant 0 : index
    %c0_106 = arith.constant 0 : index
    %c199 = arith.constant 199 : index
    %168 = vector.load %arg1[%c0_105, %c0_106, %c199] : memref<1x4x1280xf32, #tpu.memory_space<vmem>>, vector<1x4x1024xf32>
    %169 = vector.shape_cast %168 : vector<1x4x1024xf32> to vector<4x1024xf32>
    %c24_107 = arith.constant 24 : index
    %c0_108 = arith.constant 0 : index
    %170 = vector.load %arg4[%c24_107, %c0_108] : memref<27x1024xf32, #tpu.memory_space<vmem>>, vector<1x1024xf32>
    %171 = vector.broadcast %170 : vector<1x1024xf32> to vector<4x1024xf32>
    %172 = arith.mulf %169, %171 : vector<4x1024xf32>
    %173 = arith.truncf %172 : vector<4x1024xf32> to vector<4x1024xbf16>
    %c96 = arith.constant 96 : index
    %c0_109 = arith.constant 0 : index
    %174 = vector.load %arg6[%c96, %c0_109] : memref<108x1024xbf16, #tpu.memory_space<vmem>>, vector<4x1024xbf16>
    tpu.vector_store %arg6[%c96, %c0_109], %173 {strides = array<i32>} : memref<108x1024xbf16, #tpu.memory_space<vmem>>, vector<4x1024xbf16>,
    %c0_110 = arith.constant 0 : index
    %c0_111 = arith.constant 0 : index
    %c200 = arith.constant 200 : index
    %175 = vector.load %arg1[%c0_110, %c0_111, %c200] : memref<1x4x1280xf32, #tpu.memory_space<vmem>>, vector<1x4x1024xf32>
    %176 = vector.shape_cast %175 : vector<1x4x1024xf32> to vector<4x1024xf32>
    %c25 = arith.constant 25 : index
    %c0_112 = arith.constant 0 : index
    %177 = vector.load %arg4[%c25, %c0_112] : memref<27x1024xf32, #tpu.memory_space<vmem>>, vector<1x1024xf32>
    %178 = vector.broadcast %177 : vector<1x1024xf32> to vector<4x1024xf32>
    %179 = arith.mulf %176, %178 : vector<4x1024xf32>
    %180 = arith.truncf %179 : vector<4x1024xf32> to vector<4x1024xbf16>
    %c100 = arith.constant 100 : index
    %c0_113 = arith.constant 0 : index
    %181 = vector.load %arg6[%c100, %c0_113] : memref<108x1024xbf16, #tpu.memory_space<vmem>>, vector<4x1024xbf16>
    tpu.vector_store %arg6[%c100, %c0_113], %180 {strides = array<i32>} : memref<108x1024xbf16, #tpu.memory_space<vmem>>, vector<4x1024xbf16>,
    %c0_114 = arith.constant 0 : index
    %c0_115 = arith.constant 0 : index
    %c201 = arith.constant 201 : index
    %182 = vector.load %arg1[%c0_114, %c0_115, %c201] : memref<1x4x1280xf32, #tpu.memory_space<vmem>>, vector<1x4x1024xf32>
    %183 = vector.shape_cast %182 : vector<1x4x1024xf32> to vector<4x1024xf32>
    %c26 = arith.constant 26 : index
    %c0_116 = arith.constant 0 : index
    %184 = vector.load %arg4[%c26, %c0_116] : memref<27x1024xf32, #tpu.memory_space<vmem>>, vector<1x1024xf32>
    %185 = vector.broadcast %184 : vector<1x1024xf32> to vector<4x1024xf32>
    %186 = arith.mulf %183, %185 : vector<4x1024xf32>
    %187 = arith.truncf %186 : vector<4x1024xf32> to vector<4x1024xbf16>
    %c104 = arith.constant 104 : index
    %c0_117 = arith.constant 0 : index
    %188 = vector.load %arg6[%c104, %c0_117] : memref<108x1024xbf16, #tpu.memory_space<vmem>>, vector<4x1024xbf16>
    tpu.vector_store %arg6[%c104, %c0_117], %187 {strides = array<i32>} : memref<108x1024xbf16, #tpu.memory_space<vmem>>, vector<4x1024xbf16>,
    %c0_118 = arith.constant 0 : index
    %c0_119 = arith.constant 0 : index
    %189 = vector.load %arg2[%c0_118, %c0_119] : memref<8x108xbf16, #tpu.memory_space<vmem>>, vector<8x108xbf16>
    %c0_120 = arith.constant 0 : index
    %c0_121 = arith.constant 0 : index
    %190 = vector.load %arg6[%c0_120, %c0_121] : memref<108x1024xbf16, #tpu.memory_space<vmem>>, vector<108x1024xbf16>
    %cst = arith.constant dense<0.000000e+00> : vector<8x1024xf32>
    %191 = tpu.matmul %189, %190, %cst {dimension_numbers = #tpu.dot_dimension_numbers<[1], [0], [0], [1], [0, 0, 1, 1], [], []>} : vector<8x108xbf16>, vector<108x1024xbf16>, vector<8x1024xf32> -> vector<8x1024xf32>
    %c0_122 = arith.constant 0 : index
    %c0_123 = arith.constant 0 : index
    %192 = vector.load %arg3[%c0_122, %c0_123] : memref<8x1xf32, #tpu.memory_space<vmem>>, vector<8x1xf32>
    %193 = vector.broadcast %192 : vector<8x1xf32> to vector<8x1024xf32>
    %194 = arith.addf %191, %193 : vector<8x1024xf32>
    %c0_124 = arith.constant 0 : index
    %c0_125 = arith.constant 0 : index
    %c0_126 = arith.constant 0 : index
    %195 = vector.load %arg5[%c0_124, %c0_125, %c0_126] : memref<1x8x1024xf32, #tpu.memory_space<vmem>>, vector<1x8x1024xf32>
    %196 = vector.shape_cast %195 : vector<1x8x1024xf32> to vector<8x1024xf32>
    %197 = vector.shape_cast %194 : vector<8x1024xf32> to vector<1x8x1024xf32>
    tpu.vector_store %arg5[%c0_124, %c0_125, %c0_126], %197 {strides = array<i32>} : memref<1x8x1024xf32, #tpu.memory_space<vmem>>, vector<1x8x1024xf32>,
    return
  }
  func.func @transform_0(%arg0: i32) -> (i32, i32, i32) {
    %c0_i32 = arith.constant 0 : i32
    %c0_i32_0 = arith.constant 0 : i32
    %c0_i32_1 = arith.constant 0 : i32
    return %arg0, %c0_i32, %c0_i32_0 : i32, i32, i32
  }
  func.func @transform_1(%arg0: i32) -> (i32, i32) {
    %c0_i32 = arith.constant 0 : i32
    %c0_i32_0 = arith.constant 0 : i32
    %c0_i32_1 = arith.constant 0 : i32
    return %c0_i32, %c0_i32_0 : i32, i32
  }
  func.func @transform_2(%arg0: i32) -> (i32, i32) {
    %c0_i32 = arith.constant 0 : i32
    %c0_i32_0 = arith.constant 0 : i32
    %c0_i32_1 = arith.constant 0 : i32
    return %c0_i32, %c0_i32_0 : i32, i32
  }
  func.func @transform_3(%arg0: i32) -> (i32, i32) {
    %c0_i32 = arith.constant 0 : i32
    %c0_i32_0 = arith.constant 0 : i32
    %c0_i32_1 = arith.constant 0 : i32
    return %c0_i32, %c0_i32_0 : i32, i32
  }
  func.func @transform_4(%arg0: i32) -> (i32, i32, i32) {
    %c0_i32 = arith.constant 0 : i32
    %c0_i32_0 = arith.constant 0 : i32
    %c0_i32_1 = arith.constant 0 : i32
    return %arg0, %c0_i32, %c0_i32_0 : i32, i32, i32
  }
}

</mosaic_0001>

<bundles_post_ra>
// kernel: basic_conv3d.1
= control target key start
LH: loop header
LB: loop body
LE: loop exit
PB: predicated region body
PF: predicated region fallthrough
CT: control target
= control target key end

     0   :  { %s5367_s15 = smov 0   ;;  %s7689_s0 = inlined_call_operand.vmem [shape: f32[2,4,1280], index: 0, kind: input, shape index: {}]   ;;  %s7690_s1 = inlined_call_operand.vmem [shape: bf16[8,108], index: 1, kind: input, shape index: {}]   ;;  %s7691_s2 = inlined_call_operand.vmem [shape: f32[8,1], index: 2, kind: input, shape index: {}]   ;;  %s7692_s3 = inlined_call_operand.vmem [shape: f32[27,1024], index: 3, kind: input, shape index: {}]   ;;  %s7693_s4 = inlined_call_operand.vmem [shape: f32[2,8,1024], index: 4, kind: output, shape index: {}]  }
   0x1 LB: > { %s4890_s16 = sadd.s32 4294967295, %s5322_s15   ;;  %p4894_p0 = scmp.ge.s32.totalorder %s5322_s15, 1  ;;  %s5322_s15 = sphi %s5367_s15, %s14_s15  }
   0x2   : > { %p162_p1 = scmp.lt.s32.totalorder %s5322_s15, 3 }
   0x4   : > { %p163_p2 = pnand %p4894_p0, %p162_p1 }
   0x6   : > { %166 = sbr.rel (%p163_p2) target bundleno = 865 (0x361), region = 36 }
   0xd   : > { %v204_v0 = vld [vmem:[%s7692_s3] ss:$8 sm:$0xf]  ;;  %v208_v2 = vlaneseq  ;;  %v4903_v3 = vld [vmem:[%s7692_s3 + $0x1] ss:$8 sm:$0xf] }
   0xe   : > { %v205_v1 = vld [vmem:[%s7692_s3] ss:$8 sm:$0xf0]  ;;  %v4904_v6 = vld [vmem:[%s7692_s3 + $0x1] ss:$8 sm:$0xf0] }
   0xf   : > { %v206_v4 = vor.u32 %v205_v1, %v204_v0  ;;  %v209_v5 = vshrl.u32 %v208_v2, 7  ;;  %v360_v7 = vor.u32 %v4904_v6, %v4903_v3  ;;  %s5324_s25 = smov 55   ;;  %v4910_v32 = vld [vmem:[%s7692_s3 + $0x2] ss:$8 sm:$0xf]  ;;  %s5325_s30 = smov 56  }
  0x10   : > { %v4911_v33 = vld [vmem:[%s7692_s3 + $0x2] ss:$8 sm:$0xf0]  ;;  %v4917_v47 = vld [vmem:[%s7692_s3 + $0x3] ss:$8 sm:$0xf] }
  0x11   : > { %v5387_v8 = vsub.s32 4, %v209_v5  ;;  %v5389_v9 = vsub.s32 5, %v209_v5  ;;  %v5391_v10 = vsub.s32 0, %v209_v5  ;;  %v5393_v11 = vsub.s32 1, %v209_v5  ;;  %s5326_s9 = smov 57   ;;  %s5327_s20 = smov 63  }
  0x12   : > { %v5395_v12 = vsub.s32 6, %v209_v5  ;;  %v5397_v13 = vsub.s32 7, %v209_v5  ;;  %v5399_v14 = vsub.s32 2, %v209_v5  ;;  %v5401_v15 = vsub.s32 3, %v209_v5  ;;  %s5328_s26 = smov 65   ;;  %s5329_s6 = smov 72  }
  0x13   : > { %7759 = vst [vmem:[#allocation3_spill] sm:$0xff] %v5387_v8  ;;  %7760 = vst [vmem:[#allocation4_spill] sm:$0xff] %v5389_v9  ;;  %v227_v16 = vrot.slane %v206_v4, %v5387_v8  ;;  %v231_v17 = vrot.slane %v206_v4, %v5389_v9  ;;  %v211_v18 = vrot.slane %v206_v4, %v5391_v10  ;;  %v4918_v48 = vld [vmem:[%s7692_s3 + $0x3] ss:$8 sm:$0xf0]  ;;  %s5330_s12 = smov 64  }
  0x14   : > { %7761 = vst [vmem:[#allocation5_spill] sm:$0xff] %v5393_v11  ;;  %7762 = vst [vmem:[#allocation6_spill] sm:$0xff] %v5395_v12  ;;  %v215_v19 = vrot.slane %v206_v4, %v5393_v11  ;;  %v235_v20 = vrot.slane %v206_v4, %v5395_v12  ;;  %v239_v21 = vrot.slane %v206_v4, %v5397_v13  ;;  %v4931_v62 = vld [vmem:[%s7692_s3 + $0x5] ss:$8 sm:$0xf]  ;;  %s5331_s19 = smov 71  }
  0x15   : > { %7763 = vst [vmem:[#allocation7_spill] sm:$0xff] %v5397_v13  ;;  %v219_v22 = vrot.slane %v206_v4, %v5399_v14  ;;  %v223_v23 = vrot.slane %v206_v4, %v5401_v15  ;;  %v242_v24 = vcombine.low %v227_v16, %v231_v17  ;;  %v365_v27 = vrot.slane %v360_v7, %v5391_v10  ;;  %v4932_v63 = vld [vmem:[%s7692_s3 + $0x5] ss:$8 sm:$0xf0]  ;;  %s5332_s27 = smov 119   ;;  %s5333_s8 = smov 121  }
  0x16   : > { %v240_v25 = vcombine.low %v211_v18, %v215_v19  ;;  %v243_v26 = vcombine.low %v235_v20, %v239_v21  ;;  %v369_v28 = vrot.slane %v360_v7, %v5393_v11  ;;  %v373_v30 = vrot.slane %v360_v7, %v5399_v14  ;;  %v4945_v18 = vld [vmem:[%s7692_s3 + $0x7] ss:$8 sm:$0xf]  ;;  %s5334_s17 = smov 73   ;;  %s5335_s24 = smov 120  }
  0x17   : > { %248 = vrot.lane.b32.xlu1 %v242_v24, %s5324_s25  ;;  %v241_v29 = vcombine.low %v219_v22, %v223_v23  ;;  %v377_v31 = vrot.slane %v360_v7, %v5401_v15  ;;  %v381_v35 = vrot.slane %v360_v7, %v5387_v8  ;;  %v385_v36 = vrot.slane %v360_v7, %v5389_v9  ;;  %v4946_v19 = vld [vmem:[%s7692_s3 + $0x7] ss:$8 sm:$0xf0]  ;;  %s5336_s10 = smov 7   ;;  %s5337_s21 = smov 127  }
  0x18   : > { %244 = vrot.lane.b32.xlu0 %v240_v25, %s5324_s25  ;;  %v394_v34 = vcombine.low %v365_v27, %v369_v28  ;;  %v517_v37 = vor.u32 %v4911_v33, %v4910_v32  ;;  %v389_v39 = vrot.slane %v360_v7, %v5395_v12  ;;  %v393_v40 = vrot.slane %v360_v7, %v5397_v13  ;;  %s5338_s5 = smov 1   ;;  %s5339_s7 = smov 9  }
  0x19   : > { %v395_v38 = vcombine.low %v373_v30, %v377_v31  ;;  %v396_v41 = vcombine.low %v381_v35, %v385_v36  ;;  %v669_v52 = vor.u32 %v4918_v48, %v4917_v47  ;;  %v5461_v3 = vor.u32 %v4932_v63, %v4931_v62  ;;  %v4924_v30 = vld [vmem:[%s7692_s3 + $0x4] ss:$8 sm:$0xf]  ;;  %p188_p3 = scmp.lt.s32.totalorder %s4890_s16, 1  ;;  %s5340_s13 = smov 8  }
  0x1a   : > { %v530_v42 = vrot.slane %v517_v37, %v5399_v14  ;;  %v534_v43 = vrot.slane %v517_v37, %v5401_v15  ;;  %v397_v44 = vcombine.low %v389_v39, %v393_v40  ;;  %v522_v45 = vrot.slane %v517_v37, %v5391_v10  ;;  %v4925_v31 = vld [vmem:[%s7692_s3 + $0x4] ss:$8 sm:$0xf0] }
  0x1b   : > { %250 = vrot.lane.b32.xlu1 %v243_v26, %s5324_s25  ;;  %v526_v46 = vrot.slane %v517_v37, %v5393_v11  ;;  %v546_v50 = vrot.slane %v517_v37, %v5395_v12  ;;  %v550_v51 = vrot.slane %v517_v37, %v5397_v13  ;;  %v538_v54 = vrot.slane %v517_v37, %v5387_v8  ;;  %s7893_s16 = smov (!%p188_p3, %s4890_s16), 1 }
  0x1c   : > { %246 = vrot.lane.b32.xlu0 %v241_v29, %s5324_s25  ;;  %v552_v49 = vcombine.low %v530_v42, %v534_v43  ;;  %v542_v55 = vrot.slane %v517_v37, %v5389_v9  ;;  %v674_v57 = vrot.slane %v669_v52, %v5391_v10  ;;  %v678_v58 = vrot.slane %v669_v52, %v5393_v11  ;;  %v4938_v42 = vld [vmem:[%s7692_s3 + $0x6] ss:$8 sm:$0xf]  ;;  %s5285_s11 = smul.u32 40, %s7893_s16 }
  0x1d   : > { %v551_v53 = vcombine.low %v522_v45, %v526_v46  ;;  %v554_v56 = vcombine.low %v546_v50, %v550_v51  ;;  %v682_v60 = vrot.slane %v669_v52, %v5399_v14  ;;  %v686_v61 = vrot.slane %v669_v52, %v5401_v15  ;;  %v4939_v43 = vld [vmem:[%s7692_s3 + $0x6] ss:$8 sm:$0xf0] }
  0x1e   : > { %v553_v59 = vcombine.low %v538_v54, %v542_v55  ;;  %v703_v0 = vcombine.low %v674_v57, %v678_v58  ;;  %v698_v1 = vrot.slane %v669_v52, %v5395_v12  ;;  %v702_v2 = vrot.slane %v669_v52, %v5397_v13  ;;  %v4959_v54 = vld [vmem:[%s7692_s3 + $0x41] ss:$8 sm:$0xf]  ;;  %s5767_s18 = scalar_lea.vmem %s7689_s0, %s5285_s11 }
  0x1f   : > { %398 = vrot.lane.b32.xlu1 %v394_v34, %s5325_s30  ;;  %v704_v4 = vcombine.low %v682_v60, %v686_v61  ;;  %v690_v5 = vrot.slane %v669_v52, %v5387_v8  ;;  %v694_v6 = vrot.slane %v669_v52, %v5389_v9  ;;  %v983_v16 = vrot.slane %v5461_v3, %v5391_v10  ;;  %v4960_v55 = vld [vmem:[%s7692_s3 + $0x41] ss:$8 sm:$0xf0] }
  0x20   : > { %400 = vrot.lane.b32.xlu0 %v395_v38, %s5325_s30  ;;  %v706_v7 = vcombine.low %v698_v1, %v702_v2  ;;  %v987_v17 = vrot.slane %v5461_v3, %v5393_v11  ;;  %v991_v21 = vrot.slane %v5461_v3, %v5399_v14  ;;  %v995_v22 = vrot.slane %v5461_v3, %v5401_v15  ;;  %v4973_v2 = vld [vmem:[%s7692_s3 + $0x43] ss:$8 sm:$0xf] }
  0x21   : > { %v705_v20 = vcombine.low %v690_v5, %v694_v6  ;;  %v5483_v23 = vor.u32 %v4946_v19, %v4945_v18  ;;  %v999_v25 = vrot.slane %v5461_v3, %v5387_v8  ;;  %v1003_v26 = vrot.slane %v5461_v3, %v5389_v9 }
  0x22   : > { %v1012_v24 = vcombine.low %v983_v16, %v987_v17  ;;  %v1013_v27 = vcombine.low %v991_v21, %v995_v22  ;;  %v5505_v35 = vor.u32 %v4925_v31, %v4924_v30  ;;  %v5529_v47 = vor.u32 %v4939_v43, %v4938_v42 }
  0x23   : > { %402 = vrot.lane.b32.xlu1 %v396_v41, %s5325_s30  ;;  %v1292_v28 = vrot.slane %v5483_v23, %v5391_v10  ;;  %v1296_v29 = vrot.slane %v5483_v23, %v5393_v11  ;;  %v1014_v32 = vcombine.low %v999_v25, %v1003_v26  ;;  %v1300_v33 = vrot.slane %v5483_v23, %v5399_v14  ;;  %v4953_v25 = vld [vmem:[%s7692_s3 + $0x40] ss:$8 sm:$0xf0] }
  0x24   : > { %404 = vrot.lane.b32.xlu0 %v397_v44, %s5325_s30  ;;  %v1304_v34 = vrot.slane %v5483_v23, %v5401_v15  ;;  %v1308_v37 = vrot.slane %v5483_v23, %v5387_v8  ;;  %v1312_v38 = vrot.slane %v5483_v23, %v5389_v9  ;;  %v831_v40 = vrot.slane %v5505_v35, %v5391_v10 }
  0x25   : > { %v1321_v36 = vcombine.low %v1292_v28, %v1296_v29  ;;  %v835_v41 = vrot.slane %v5505_v35, %v5393_v11  ;;  %v839_v45 = vrot.slane %v5505_v35, %v5399_v14  ;;  %v843_v46 = vrot.slane %v5505_v35, %v5401_v15 }
  0x26   : > { %v1322_v39 = vcombine.low %v1300_v33, %v1304_v34  ;;  %v1323_v44 = vcombine.low %v1308_v37, %v1312_v38  ;;  %v851_v50 = vrot.slane %v5505_v35, %v5389_v9  ;;  %v1140_v52 = vrot.slane %v5529_v47, %v5391_v10  ;;  %v4966_v37 = vld [vmem:[%s7692_s3 + $0x42] ss:$8 sm:$0xf] }
  0x27   : > { %557 = vrot.lane.b32.xlu1 %v552_v49, %s5326_s9  ;;  %v860_v48 = vcombine.low %v831_v40, %v835_v41  ;;  %v847_v49 = vrot.slane %v5505_v35, %v5387_v8  ;;  %v861_v51 = vcombine.low %v839_v45, %v843_v46  ;;  %v1148_v57 = vrot.slane %v5529_v47, %v5399_v14  ;;  %v4967_v38 = vld [vmem:[%s7692_s3 + $0x42] ss:$8 sm:$0xf0] }
  0x28   : > { %555 = vrot.lane.b32.xlu0 %v551_v53, %s5326_s9  ;;  %v1144_v53 = vrot.slane %v5529_v47, %v5393_v11  ;;  %v1152_v58 = vrot.slane %v5529_v47, %v5401_v15  ;;  %v1156_v61 = vrot.slane %v5529_v47, %v5387_v8  ;;  %v1160_v62 = vrot.slane %v5529_v47, %v5389_v9 }
  0x29   : > { %v5621_v42 = vor.u32 %v4967_v38, %v4966_v37  ;;  %v5015_v37 = vld [vmem:[%s7692_s3 + $0x81] ss:$8 sm:$0xf0]  ;;  %vm258_vm0 = vcmask 1043456   ;;  %vm256_vm1 = vcmask 449536   ;;  %vm567_vm2 = vcmask 465920  }
  0x2a   : > { %v1169_v60 = vcombine.low %v1140_v52, %v1144_v53  ;;  %v1170_v63 = vcombine.low %v1148_v57, %v1152_v58  ;;  %v1171_v5 = vcombine.low %v1156_v61, %v1160_v62  ;;  %vm410_vm3 = vcmask 457728  }
  0x2b   : > { %561 = vrot.lane.b32.xlu1 %v554_v56, %s5326_s9  ;;  %v862_v56 = vcombine.low %v847_v49, %v851_v50  ;;  %v1762_v49 = vrot.slane %v5621_v42, %v5393_v11  ;;  %v5000_v50 = vld [vmem:[%s7692_s3 + $0x47] ss:$8 sm:$0xf]  ;;  %v1766_v53 = vrot.slane %v5621_v42, %v5399_v14  ;;  %v1774_v57 = vrot.slane %v5621_v42, %v5387_v8 }
  0x2c   : > { %559 = vrot.lane.b32.xlu0 %v553_v59, %s5326_s9  ;;  %v5551_v59 = vor.u32 %v4960_v55, %v4959_v54  ;;  %v1770_v54 = vrot.slane %v5621_v42, %v5401_v15  ;;  %v1778_v58 = vrot.slane %v5621_v42, %v5389_v9  ;;  %vm719_vm4 = vcmask 515072  }
  0x2d   : > { %vm802_vm5 = vcmask 531456   ;;  %vm493_vm6 = vcmask 588800   ;;  %vm876_vm7 = vcmask 523264   ;;  %vm336_vm8 = vcmask 596992  }
  0x2e   : > { %v1605_v1 = vrot.slane %v5551_v59, %v5393_v11  ;;  %v1609_v6 = vrot.slane %v5551_v59, %v5399_v14  ;;  %v1617_v18 = vrot.slane %v5551_v59, %v5387_v8  ;;  %v1621_v19 = vrot.slane %v5551_v59, %v5389_v9 }
  0x2f   : > { %707 = vrot.lane.b32.xlu1 %v703_v0, %s5327_s20  ;;  %v1601_v0 = vrot.slane %v5551_v59, %v5391_v10  ;;  %vm7750_vm9 = vcmask 580608   ;;  %vm1646_vm10 = vcmask 973824   ;;  %vm1955_vm11 = vcmask 990208  }
  0x30   : > { %709 = vrot.lane.b32.xlu0 %v704_v4, %s5327_s20  ;;  %v4974_v4 = vld [vmem:[%s7692_s3 + $0x43] ss:$8 sm:$0xf0]  ;;  %v1632_v26 = vcombine.low %v1617_v18, %v1621_v19  ;;  %vm1803_vm12 = vcmask 982016   ;;  %vm7753_vm13 = vcmask 56320   ;;  %vm7724_vm14 = vcmask 1039360  }
  0x31   : > { %v5575_v16 = vor.u32 %v4974_v4, %v4973_v2  ;;  %v1630_v17 = vcombine.low %v1601_v0, %v1605_v1  ;;  %v4981_v0 = vld [vmem:[%s7692_s3 + $0x44] ss:$8 sm:$0xf0]  ;;  %v1789_v1 = vcombine.low %v1774_v57, %v1778_v58  ;;  %vm7726_vm15 = vcmask 7168  }
  0x33   : > { %711 = vrot.lane.b32.xlu1 %v705_v20, %s5327_s20  ;;  %v1910_v21 = vrot.slane %v5575_v16, %v5391_v10  ;;  %v1914_v22 = vrot.slane %v5575_v16, %v5393_v11  ;;  %v1922_v28 = vrot.slane %v5575_v16, %v5401_v15  ;;  %v1926_v31 = vrot.slane %v5575_v16, %v5387_v8 }
  0x34   : > { %713 = vrot.lane.b32.xlu0 %v706_v7, %s5327_s20  ;;  %v1613_v7 = vrot.slane %v5551_v59, %v5401_v15 }
  0x35   : > { %v1939_v30 = vcombine.low %v1910_v21, %v1914_v22  ;;  %v4993_v21 = vld [vmem:[%s7692_s3 + $0x46] ss:$8 sm:$0xf] }
  0x36   : > { %v1631_v20 = vcombine.low %v1609_v6, %v1613_v7  ;;  %v4994_v22 = vld [vmem:[%s7692_s3 + $0x46] ss:$8 sm:$0xf0] }
  0x37   : > { %1018 = vrot.lane.b32.xlu1 %v1013_v27, %s5328_s26  ;;  %v1918_v27 = vrot.slane %v5575_v16, %v5399_v14 }
  0x38   : > { %1016 = vrot.lane.b32.xlu0 %v1012_v24, %s5328_s26  ;;  %v4952_v24 = vld [vmem:[%s7692_s3 + $0x40] ss:$8 sm:$0xf] }
  0x39   : > { %v5597_v29 = vor.u32 %v4953_v25, %v4952_v24  ;;  %v1940_v33 = vcombine.low %v1918_v27, %v1922_v28  ;;  %v5689_v27 = vor.u32 %v4994_v22, %v4993_v21 }
  0x3b   : > { %1325 = vrot.lane.b32.xlu1 %v1321_v36, %s5329_s6  ;;  %v1449_v34 = vrot.slane %v5597_v29, %v5391_v10  ;;  %v1453_v36 = vrot.slane %v5597_v29, %v5393_v11  ;;  %v1457_v40 = vrot.slane %v5597_v29, %v5399_v14  ;;  %v1461_v41 = vrot.slane %v5597_v29, %v5401_v15 }
  0x3c   : > { %1020 = vrot.lane.b32.xlu0 %v1014_v32, %s5328_s26  ;;  %v1930_v32 = vrot.slane %v5575_v16, %v5389_v9  ;;  %v1469_v45 = vrot.slane %v5597_v29, %v5389_v9 }
  0x3d   : > { %v1478_v43 = vcombine.low %v1449_v34, %v1453_v36  ;;  %v1479_v46 = vcombine.low %v1457_v40, %v1461_v41  ;;  %v2328_v34 = vrot.slane %v5689_v27, %v5393_v11  ;;  %v5014_v36 = vld [vmem:[%s7692_s3 + $0x81] ss:$8 sm:$0xf]  ;;  %v2336_v40 = vrot.slane %v5689_v27, %v5401_v15 }
  0x3e   : > { %v5713_v41 = vor.u32 %v5015_v37, %v5014_v36  ;;  %v356_v36 = vld [vmem:[%s5767_s18 + $0x20] sm:$0xf]  ;;  %v5782_v37 = vld [vmem:[%s5767_s18 + $0x8] sm:$0xff] }
  0x3f   : > { %1329 = vrot.lane.b32.xlu1 %v1323_v44, %s5329_s6  ;;  %v1465_v44 = vrot.slane %v5597_v29, %v5387_v8 }
  0x40   : > { %1327 = vrot.lane.b32.xlu0 %v1322_v39, %s5329_s6  ;;  %v1941_v39 = vcombine.low %v1926_v31, %v1930_v32  ;;  %v2801_v58 = vrot.slane %v5713_v41, %v5387_v8 }
  0x41   : > { %v1480_v52 = vcombine.low %v1465_v44, %v1469_v45  ;;  %v2340_v44 = vrot.slane %v5689_v27, %v5387_v8  ;;  %v2344_v45 = vrot.slane %v5689_v27, %v5389_v9 }
  0x43   : > { %866 = vrot.lane.b32.xlu1 %v861_v51, %s5330_s12  ;;  %v5001_v51 = vld [vmem:[%s7692_s3 + $0x47] ss:$8 sm:$0xf0] }
  0x44   : > { %864 = vrot.lane.b32.xlu0 %v860_v48, %s5330_s12  ;;  %v1758_v48 = vrot.slane %v5621_v42, %v5391_v10  ;;  %v5643_v55 = vor.u32 %v5001_v51, %v5000_v50  ;;  %v5028_v50 = vld [vmem:[%s7692_s3 + $0x83] ss:$8 sm:$0xf] }
  0x45   : > { %v5029_v51 = vld [vmem:[%s7692_s3 + $0x83] ss:$8 sm:$0xf0] }
  0x46   : > { %v2476_v61 = vrot.slane %v5643_v55, %v5391_v10  ;;  %v2480_v62 = vrot.slane %v5643_v55, %v5393_v11  ;;  %v2484_v2 = vrot.slane %v5643_v55, %v5399_v14  ;;  %v2488_v4 = vrot.slane %v5643_v55, %v5401_v15 }
  0x47   : > { %1173 = vrot.lane.b32.xlu1 %v1169_v60, %s5331_s19  ;;  %v1788_v60 = vcombine.low %v1766_v53, %v1770_v54  ;;  %v2492_v7 = vrot.slane %v5643_v55, %v5387_v8  ;;  %v2793_v53 = vrot.slane %v5713_v41, %v5399_v14  ;;  %v2797_v54 = vrot.slane %v5713_v41, %v5401_v15 }
  0x48   : > { %868 = vrot.lane.b32.xlu0 %v862_v56, %s5330_s12  ;;  %v1787_v56 = vcombine.low %v1758_v48, %v1762_v49  ;;  %v2505_v6 = vcombine.low %v2476_v61, %v2480_v62  ;;  %v2506_v18 = vcombine.low %v2484_v2, %v2488_v4  ;;  %v2785_v48 = vrot.slane %v5713_v41, %v5391_v10 }
  0x49   : > { %v2789_v49 = vrot.slane %v5713_v41, %v5393_v11  ;;  %v2815_v61 = vcombine.low %v2793_v53, %v2797_v54 }
  0x4b   : > { %1177 = vrot.lane.b32.xlu1 %v1171_v5, %s5331_s19  ;;  %v2814_v57 = vcombine.low %v2785_v48, %v2789_v49 }
  0x4c   : > { %1175 = vrot.lane.b32.xlu0 %v1170_v63, %s5331_s19  ;;  %v4980_v63 = vld [vmem:[%s7692_s3 + $0x44] ss:$8 sm:$0xf] }
  0x4d   : > { %v5667_v5 = vor.u32 %v4981_v0, %v4980_v63 }
  0x4f   : > { %1636 = vrot.lane.b32.xlu1 %v1631_v20, %s5332_s27  ;;  %v2067_v19 = vrot.slane %v5667_v5, %v5391_v10  ;;  %v2071_v20 = vrot.slane %v5667_v5, %v5393_v11  ;;  %v2075_v25 = vrot.slane %v5667_v5, %v5399_v14  ;;  %v2087_v31 = vrot.slane %v5667_v5, %v5389_v9 }
  0x50   : > { %1634 = vrot.lane.b32.xlu0 %v1630_v17, %s5332_s27  ;;  %v2496_v17 = vrot.slane %v5643_v55, %v5389_v9 }
  0x51   : > { %v2096_v28 = vcombine.low %v2067_v19, %v2071_v20  ;;  %v203_v20 = vld [vmem:[%s5767_s18 + $0x20] sm:$0xf] }
  0x52   : > { %v2507_v24 = vcombine.low %v2492_v7, %v2496_v17 }
  0x53   : > { %1943 = vrot.lane.b32.xlu1 %v1939_v30, %s5333_s8  ;;  %v2083_v30 = vrot.slane %v5667_v5, %v5387_v8 }
  0x54   : > { %1638 = vrot.lane.b32.xlu0 %v1632_v26, %s5332_s27  ;;  %v2079_v26 = vrot.slane %v5667_v5, %v5401_v15 }
  0x55   : > { %v2098_v38 = vcombine.low %v2083_v30, %v2087_v31 }
  0x56   : > { %v2097_v32 = vcombine.low %v2075_v25, %v2079_v26 }
  0x57   : > { %1947 = vrot.lane.b32.xlu1 %v1941_v39, %s5333_s8  ;;  %v2332_v39 = vrot.slane %v5689_v27, %v5399_v14 }
  0x58   : > { %1945 = vrot.lane.b32.xlu0 %v1940_v33, %s5333_s8  ;;  %v2324_v33 = vrot.slane %v5689_v27, %v5391_v10 }
  0x5b   : > { %1484 = vrot.lane.b32.xlu1 %v1479_v46, %s5334_s17  ;;  %v2354_v46 = vcombine.low %v2332_v39, %v2336_v40 }
  0x5c   : > { %1482 = vrot.lane.b32.xlu0 %v1478_v43, %s5334_s17  ;;  %v2353_v43 = vcombine.low %v2324_v33, %v2328_v34 }
  0x5f   : > { %1791 = vrot.lane.b32.xlu1 %v1787_v56, %s5335_s24  ;;  %v5735_v56 = vor.u32 %v5029_v51, %v5028_v50  ;;  %v5795_v50 = vld [vmem:[%s5767_s18 + $0x18] sm:$0xff] }
  0x60   : > { %1486 = vrot.lane.b32.xlu0 %v1480_v52, %s5334_s17  ;;  %v2355_v52 = vcombine.low %v2340_v44, %v2344_v45 }
  0x61   : > { %v3092_v62 = vrot.slane %v5735_v56, %v5391_v10  ;;  %v3096_v63 = vrot.slane %v5735_v56, %v5393_v11  ;;  %v3104_v2 = vrot.slane %v5735_v56, %v5401_v15 }
  0x63   : > { %1795 = vrot.lane.b32.xlu1 %v1789_v1, %s5335_s24  ;;  %v3100_v1 = vrot.slane %v5735_v56, %v5399_v14  ;;  %v3121_v4 = vcombine.low %v3092_v62, %v3096_v63 }
  0x64   : > { %1793 = vrot.lane.b32.xlu0 %v1788_v60, %s5335_s24  ;;  %v2805_v60 = vrot.slane %v5713_v41, %v5389_v9 }
  0x66   : > { %v2816_v0 = vcombine.low %v2801_v58, %v2805_v60 }
  0x67   : > { %2511 = vrot.lane.b32.xlu1 %v2506_v18, %s5336_s10 }
  0x68   : > { %2509 = vrot.lane.b32.xlu0 %v2505_v6, %s5336_s10  ;;  %v3122_v6 = vcombine.low %v3100_v1, %v3104_v2 }
  0x6b   : > { %2100 = vrot.lane.b32.xlu1 %v2096_v28, %s5337_s21 }
  0x6c   : > { %2513 = vrot.lane.b32.xlu0 %v2507_v24, %s5336_s10 }
  0x6f   : > { %2104 = vrot.lane.b32.xlu1 %v2098_v38, %s5337_s21 }
  0x70   : > { %2102 = vrot.lane.b32.xlu0 %v2097_v32, %s5337_s21 }
  0x73   : > { %2359 = vrot.lane.b32.xlu1 %v2354_v46, %s5338_s5 }
  0x74   : > { %2357 = vrot.lane.b32.xlu0 %v2353_v43, %s5338_s5  ;;  %v5788_v43 = vld [vmem:[%s5767_s18] sm:$0xff] }
  0x77   : > { %2818 = vrot.lane.b32.xlu1 %v2814_v57, %s5339_s7 }
  0x78   : > { %2361 = vrot.lane.b32.xlu0 %v2355_v52, %s5338_s5 }
  0x7b   : > { %2822 = vrot.lane.b32.xlu1 %v2816_v0, %s5339_s7 }
  0x7c   : > { %2820 = vrot.lane.b32.xlu0 %v2815_v61, %s5339_s7 }
  0x7f   : > { %3127 = vrot.lane.b32.xlu1 %v3122_v6, %s5325_s30 }
  0x80   : > { %3125 = vrot.lane.b32.xlu0 %v3121_v4, %s5325_s30  ;;  %v513_v4 = vld [vmem:[%s5767_s18 + $0x20] sm:$0xf] }
  0x89   : > { %v249_v7 = vpop.permute.xlu1 %248 }
  0x8a   : > { %v245_v17 = vpop.permute.xlu0 %244  ;;  %v254_v32 = vrot.slane %v249_v7, 4 }
  0x8b   : > { %v252_v25 = vrot.slane %v245_v17, 4 }
  0x8d   : > { %v251_v18 = vpop.permute.xlu1 %250  ;;  %v257_v44 = vsel %vm256_vm1, %v252_v25, %v245_v17 }
  0x8e   : > { %v247_v19 = vpop.permute.xlu0 %246  ;;  %v255_v21 = vrot.slane %v251_v18, 4  ;;  %v270_v54 = vmul.f32 %v257_v44, %v5788_v43 }
  0x8f   : > { %v253_v22 = vrot.slane %v247_v19, 4 }
  0x90   : > { %v274_v24 = vmul.f32 %v255_v21, %v203_v20  ;;  %v263_v40 = vsel %vm258_vm0, %v254_v32, %v255_v21  ;;  %v279_v20 = vcombine.high %v270_v54, %v270_v54 }
  0x91   : > { %v5770_v26 = vpop.permute.xlu1 %398  ;;  %v259_v30 = vsel %vm258_vm0, %v252_v25, %v253_v22  ;;  %v264_v51 = vsel %vm256_vm1, %v263_v40, %v251_v18  ;;  %v261_v58 = vsel %vm258_vm0, %v253_v22, %v254_v32  ;;  %v5812_v25 = vld [vmem:[%s5767_s18 + $0x10] sm:$0xff] }
  0x92   : > { %v5772_v28 = vpop.permute.xlu0 %400  ;;  %v5155_v31 = vpack.c.bf16 %v274_v24, %v274_v24  ;;  %v260_v38 = vsel %vm256_vm1, %v259_v30, %v247_v19  ;;  %v406_v60 = vrot.slane %v5770_v26, 4  ;;  %v273_v62 = vmul.f32 %v264_v51, %v5795_v50 }
  0x93   : > { %v271_v46 = vmul.f32 %v260_v38, %v5782_v37  ;;  %v262_v21 = vsel %vm256_vm1, %v261_v58, %v249_v7  ;;  %v407_v24 = vrot.slane %v5772_v28, 4 }
  0x94   : > { %327 = vrot.lane.b32.xlu0 %v5155_v31, %s5334_s17  ;;  %v411_v22 = vsel %vm410_vm3, %v406_v60, %v5770_v26  ;;  %v282_v38 = vcombine.high %v273_v62, %v273_v62 }
  0x95   : > { %v5776_v33 = vpop.permute.xlu1 %402  ;;  %v280_v2 = vcombine.high %v271_v46, %v271_v46 }
  0x96   : > { %v5778_v34 = vpop.permute.xlu0 %404  ;;  %v408_v51 = vrot.slane %v5776_v33, 4 }
  0x97   : > { %v409_v39 = vrot.slane %v5778_v34, 4 }
  0x99   : > { %v427_v45 = vmul.f32 %v409_v39, %v356_v36  ;;  %v558_v48 = vpop.permute.xlu1 %557  ;;  %v5152_v36 = vpack.c.bf16 %v280_v2, %v271_v46  ;;  %v423_v46 = vmul.f32 %v411_v22, %v5788_v43 }
  0x9a   : > { %v556_v49 = vpop.permute.xlu0 %555  ;;  %v564_v52 = vrot.slane %v558_v48, 4 }
  0x9b   : > { %v563_v53 = vrot.slane %v556_v49, 4  ;;  %v5160_v57 = vpack.c.bf16 %v427_v45, %v427_v45 }
  0x9d   : > { %v569_v61 = vsel %vm258_vm0, %v563_v53, %v564_v52  ;;  %v562_v63 = vpop.permute.xlu1 %561  ;;  %v476_v1 = vrot.slane %v5160_v57, 6  ;;  %v568_v6 = vsel %vm567_vm2, %v563_v53, %v556_v49  ;;  %v272_v53 = vmul.f32 %v5812_v25, %v262_v21 }
  0x9e   : > { %v560_v0 = vpop.permute.xlu0 %559  ;;  %v566_v17 = vrot.slane %v562_v63, 4  ;;  %v570_v19 = vsel %vm567_vm2, %v569_v61, %v558_v48  ;;  %v580_v32 = vmul.f32 %v568_v6, %v5788_v43  ;;  %v412_v57 = vsel %vm258_vm0, %v406_v60, %v407_v24 }
  0x9f   : > { %v565_v18 = vrot.slane %v560_v0, 4  ;;  %485 = vrot.lane.b32.xlu1 %v476_v1, %s5329_s6  ;;  %v581_v45 = vmul.f32 %v570_v19, %v5782_v37  ;;  %v414_v21 = vsel %vm258_vm0, %v407_v24, %v408_v51 }
  0xa0   : > { %v584_v31 = vmul.f32 %v566_v17, %v513_v4  ;;  %v589_v19 = vcombine.high %v580_v32, %v580_v32  ;;  %v415_v24 = vsel %vm410_vm3, %v414_v21, %v5776_v33 }
  0xa1   : > { %v573_v30 = vsel %vm258_vm0, %v565_v18, %v566_v17  ;;  %v708_v40 = vpop.permute.xlu1 %707  ;;  %v571_v58 = vsel %vm258_vm0, %v564_v52, %v565_v18  ;;  %v590_v2 = vcombine.high %v581_v45, %v581_v45  ;;  %v5151_v52 = vpack.c.bf16 %v279_v20, %v270_v54 }
  0xa2   : > { %v5816_v44 = vpop.permute.xlu0 %709  ;;  %v5165_v7 = vpack.c.bf16 %v584_v31, %v584_v31  ;;  %v715_v48 = vrot.slane %v708_v40, 4  ;;  %v574_v49 = vsel %vm567_vm2, %v573_v30, %v562_v63  ;;  %v5154_v63 = vpack.c.bf16 %v282_v38, %v273_v62 }
  0xa3   : > { %v7694_v26 = vrot.slane %v5816_v44, 4  ;;  %321 = vrot.lane.b32.xlu1 %v5152_v36, %s5334_s17  ;;  %v583_v4 = vmul.f32 %v574_v49, %v5795_v50  ;;  %v413_v62 = vsel %vm410_vm3, %v412_v57, %v5772_v28  ;;  %v572_v22 = vsel %vm567_vm2, %v571_v58, %v560_v0 }
  0xa4   : > { %637 = vrot.lane.b32.xlu0 %v5165_v7, %s5331_s19  ;;  %v720_v60 = vsel %vm719_vm4, %v715_v48, %v708_v40  ;;  %v416_v30 = vsel %vm258_vm0, %v408_v51, %v409_v39  ;;  %v281_v54 = vcombine.high %v272_v53, %v272_v53  ;;  %v5162_v31 = vpack.c.bf16 %v590_v2, %v581_v45 }
  0xa5   : > { %v721_v61 = vsel %vm258_vm0, %v715_v48, %v7694_v26  ;;  %v5836_v17 = vpop.permute.xlu1 %711  ;;  %v732_v20 = vmul.f32 %v720_v60, %v5788_v43  ;;  %v592_v36 = vcombine.high %v583_v4, %v583_v4  ;;  %v432_v38 = vcombine.high %v423_v46, %v423_v46 }
  0xa6   : > { %v722_v1 = vsel %vm719_vm4, %v721_v61, %v5816_v44  ;;  %v5834_v6 = vpop.permute.xlu0 %713  ;;  %7765 = vst [vmem:[#allocation9_spill] sm:$0xff] %v5836_v17  ;;  %v424_v0 = vmul.f32 %v413_v62, %v5782_v37  ;;  %v582_v7 = vmul.f32 %v572_v22, %v5812_v25  ;;  %v5161_v39 = vpack.c.bf16 %v589_v19, %v580_v32 }
  0xa7   : > { %7764 = vst [vmem:[#allocation8_spill] sm:$0xff] %v5834_v6  ;;  %v5840_v18 = vmul.f32 %v722_v1, %v5782_v37  ;;  %325 = vrot.lane.b32.xlu1 %v5154_v63, %s5334_s17  ;;  %v417_v48 = vsel %vm410_vm3, %v416_v30, %v5778_v34  ;;  %v425_v45 = vmul.f32 %v415_v24, %v5812_v25  ;;  %v5007_v34 = vld [vmem:[%s7692_s3 + $0x80] ss:$8 sm:$0xf] }
  0xa8   : > { %319 = vrot.lane.b32.xlu0 %v5151_v52, %s5334_s17  ;;  %v5164_v49 = vpack.c.bf16 %v592_v36, %v583_v4  ;;  %v5156_v51 = vpack.c.bf16 %v432_v38, %v423_v46  ;;  %v741_v57 = vcombine.high %v732_v20, %v732_v20  ;;  %v426_v33 = vmul.f32 %v417_v48, %v5795_v50  ;;  %v5008_v46 = vld [vmem:[%s7692_s3 + $0x80] ss:$8 sm:$0xf0]  ;;  %v5022_v48 = vld [vmem:[%s7692_s3 + $0x82] ss:$8 sm:$0xf0] }
  0xa9   : > { %v5854_v28 = vpop.permute.xlu1 %1018  ;;  %v5153_v63 = vpack.c.bf16 %v281_v54, %v272_v53  ;;  %v591_v32 = vcombine.high %v582_v7, %v582_v7  ;;  %v433_v1 = vcombine.high %v424_v0, %v424_v0  ;;  %v434_v60 = vcombine.high %v425_v45, %v425_v45 }
  0xaa   : > { %v5852_v40 = vpop.permute.xlu0 %1016  ;;  %v472_v2 = vrot.slane %v5156_v51, 6  ;;  %v5166_v4 = vpack.c.bf16 %v741_v57, %v732_v20  ;;  %v435_v62 = vcombine.high %v426_v33, %v426_v33  ;;  %v5883_v21 = vor.u32 %v5008_v46, %v5007_v34 }
  0xab   : > { %631 = vrot.lane.b32.xlu1 %v5162_v31, %s5331_s19  ;;  %v5163_v53 = vpack.c.bf16 %v591_v32, %v582_v7  ;;  %v5157_v19 = vpack.c.bf16 %v433_v1, %v424_v0  ;;  %v5158_v30 = vpack.c.bf16 %v434_v60, %v425_v45  ;;  %v3108_v24 = vrot.slane %v5735_v56, %v5387_v8  ;;  %v5043_v60 = vld [vmem:[%s7692_s3 + $0x85] ss:$8 sm:$0xf0] }
  0xac   : > { %629 = vrot.lane.b32.xlu0 %v5161_v39, %s5331_s19  ;;  %v781_v22 = vrot.slane %v5166_v4, 6  ;;  %v5159_v36 = vpack.c.bf16 %v435_v62, %v426_v33  ;;  %v2633_v38 = vrot.slane %v5883_v21, %v5391_v10  ;;  %v2637_v0 = vrot.slane %v5883_v21, %v5393_v11  ;;  %v5021_v39 = vld [vmem:[%s7692_s3 + $0x82] ss:$8 sm:$0xf] }
  0xad   : > { %v5867_v61 = vpop.permute.xlu1 %1325  ;;  %v473_v20 = vrot.slane %v5157_v19, 6  ;;  %v3112_v7 = vrot.slane %v5735_v56, %v5389_v9  ;;  %v474_v45 = vrot.slane %v5158_v30, 6  ;;  %v2653_v32 = vrot.slane %v5883_v21, %v5389_v9  ;;  %v5042_v4 = vld [vmem:[%s7692_s3 + $0x85] ss:$8 sm:$0xf] }
  0xae   : > { %v5865_v58 = vpop.permute.xlu0 %1020  ;;  %v475_v57 = vrot.slane %v5159_v36, 6  ;;  %v2662_v33 = vcombine.low %v2633_v38, %v2637_v0  ;;  %v5915_v1 = vor.u32 %v5022_v48, %v5021_v39  ;;  %v2641_v46 = vrot.slane %v5883_v21, %v5399_v14 }
  0xaf   : > { %7766 = vst [vmem:[#allocation10_spill] sm:$0xff] %v5865_v58  ;;  %635 = vrot.lane.b32.xlu1 %v5164_v49, %s5331_s19  ;;  %v3123_v34 = vcombine.low %v3108_v24, %v3112_v7  ;;  %v5935_v30 = vor.u32 %v5043_v60, %v5042_v4 }
  0xb0   : > { %323 = vrot.lane.b32.xlu0 %v5153_v63, %s5334_s17  ;;  %v2649_v63 = vrot.slane %v5883_v21, %v5387_v8  ;;  %v2950_v62 = vrot.slane %v5915_v1, %v5399_v14  ;;  %v2942_v38 = vrot.slane %v5915_v1, %v5391_v10  ;;  %v2946_v0 = vrot.slane %v5915_v1, %v5393_v11 }
  0xb1   : > { %v5880_v50 = vpop.permute.xlu1 %1329  ;;  %v3397_v7 = vrot.slane %v5935_v30, %v5391_v10  ;;  %v3401_v39 = vrot.slane %v5935_v30, %v5393_v11  ;;  %v3417_v4 = vrot.slane %v5935_v30, %v5389_v9 }
  0xb2   : > { %v5878_v52 = vpop.permute.xlu0 %1327  ;;  %v2664_v19 = vcombine.low %v2649_v63, %v2653_v32  ;;  %v2971_v48 = vcombine.low %v2942_v38, %v2946_v0  ;;  %v5056_v63 = vld [vmem:[%s7692_s3 + $0x87] ss:$8 sm:$0xf]  ;;  %v5036_v38 = vld [vmem:[%s7692_s3 + $0x84] ss:$8 sm:$0xf0] }
  0xb3   : > { %477 = vrot.lane.b32.xlu1 %v472_v2, %s5329_s6  ;;  %v2645_v2 = vrot.slane %v5883_v21, %v5401_v15  ;;  %v5057_v32 = vld [vmem:[%s7692_s3 + $0x87] ss:$8 sm:$0xf0] }
  0xb4   : > { %633 = vrot.lane.b32.xlu0 %v5163_v53, %s5331_s19  ;;  %v5969_v60 = vor.u32 %v5057_v32, %v5056_v63 }
  0xb5   : > { %v5888_v31 = vpop.permute.xlu1 %866  ;;  %v2663_v36 = vcombine.low %v2641_v46, %v2645_v2  ;;  %v3426_v46 = vcombine.low %v3397_v7, %v3401_v39  ;;  %v3413_v2 = vrot.slane %v5935_v30, %v5387_v8 }
  0xb6   : > { %v5886_v54 = vpop.permute.xlu0 %864  ;;  %v3710_v7 = vrot.slane %v5969_v60, %v5399_v14  ;;  %v3714_v39 = vrot.slane %v5969_v60, %v5401_v15  ;;  %v3702_v63 = vrot.slane %v5969_v60, %v5391_v10  ;;  %v3706_v32 = vrot.slane %v5969_v60, %v5393_v11 }
  0xb7   : > { %786 = vrot.lane.b32.xlu1 %v781_v22, %s5328_s26  ;;  %v2954_v22 = vrot.slane %v5915_v1, %v5401_v15 }
  0xb8   : > { %479 = vrot.lane.b32.xlu0 %v473_v20, %s5329_s6 }
  0xb9   : > { %v5908_v51 = vpop.permute.xlu1 %1173  ;;  %v2972_v24 = vcombine.low %v2950_v62, %v2954_v22  ;;  %v3405_v62 = vrot.slane %v5935_v30, %v5399_v14  ;;  %v3409_v22 = vrot.slane %v5935_v30, %v5401_v15 }
  0xba   : > { %v5906_v49 = vpop.permute.xlu0 %868 }
  0xbb   : > { %481 = vrot.lane.b32.xlu1 %v474_v45, %s5329_s6  ;;  %v2958_v45 = vrot.slane %v5915_v1, %v5387_v8 }
  0xbc   : > { %483 = vrot.lane.b32.xlu0 %v475_v57, %s5329_s6  ;;  %v2962_v57 = vrot.slane %v5915_v1, %v5389_v9 }
  0xbd   : > { %v5937_v20 = vpop.permute.xlu1 %1177 }
  0xbe   : > { %v5928_v53 = vpop.permute.xlu0 %1175 }
  0xbf   : > { %2666 = vrot.lane.b32.xlu1 %v2662_v33, %s5340_s13 }
  0xc0   : > { %3129 = vrot.lane.b32.xlu0 %v3123_v34, %s5325_s30 }
  0xc1   : > { %v5962_v34 = vpop.permute.xlu1 %1636 }
  0xc2   : > { %v5954_v33 = vpop.permute.xlu0 %1634  ;;  %7768 = vst [vmem:[#allocation12_spill] sm:$0xff] %v5962_v34 }
  0xc3   : > { %2670 = vrot.lane.b32.xlu1 %v2664_v19, %s5340_s13  ;;  %7767 = vst [vmem:[#allocation11_spill] sm:$0xff] %v5954_v33  ;;  %v2973_v19 = vcombine.low %v2958_v45, %v2962_v57  ;;  %v3427_v57 = vcombine.low %v3405_v62, %v3409_v22  ;;  %v3722_v62 = vrot.slane %v5969_v60, %v5389_v9 }
  0xc4   : > { %2668 = vrot.lane.b32.xlu0 %v2663_v36, %s5340_s13  ;;  %v5035_v36 = vld [vmem:[%s7692_s3 + $0x84] ss:$8 sm:$0xf] }
  0xc5   : > { %v5991_v45 = vpop.permute.xlu1 %1943 }
  0xc6   : > { %v5982_v0 = vpop.permute.xlu0 %1638  ;;  %7770 = vst [vmem:[#allocation14_spill] sm:$0xff] %v5991_v45 }
  0xc7   : > { %2977 = vrot.lane.b32.xlu1 %v2972_v24, %s5324_s25  ;;  %7769 = vst [vmem:[#allocation13_spill] sm:$0xff] %v5982_v0  ;;  %v3428_v24 = vcombine.low %v3413_v2, %v3417_v4 }
  0xc8   : > { %2975 = vrot.lane.b32.xlu0 %v2971_v48, %s5324_s25  ;;  %v5989_v48 = vor.u32 %v5036_v38, %v5035_v36  ;;  %v3731_v36 = vcombine.low %v3702_v63, %v3706_v32  ;;  %v5049_v38 = vld [vmem:[%s7692_s3 + $0x86] ss:$8 sm:$0xf] }
  0xca   : > { %v3247_v2 = vrot.slane %v5989_v48, %v5391_v10  ;;  %v3251_v4 = vrot.slane %v5989_v48, %v5393_v11  ;;  %v6008_v22 = vpop.permute.xlu0 %1945  ;;  %v3267_v63 = vrot.slane %v5989_v48, %v5389_v9  ;;  %v3255_v6 = vrot.slane %v5989_v48, %v5399_v14 }
  0xcb   : > { %3430 = vrot.lane.b32.xlu1 %v3426_v46, %s5327_s20  ;;  %v3732_v46 = vcombine.low %v3710_v7, %v3714_v39  ;;  %7771 = vst [vmem:[#allocation15_spill] sm:$0xff] %v6008_v22  ;;  %v6016_v7 = vpop.permute.xlu1 %1947  ;;  %v3259_v45 = vrot.slane %v5989_v48, %v5401_v15 }
  0xcc   : > { %2979 = vrot.lane.b32.xlu0 %v2973_v19, %s5324_s25  ;;  %v3718_v19 = vrot.slane %v5969_v60, %v5387_v8  ;;  %7772 = vst [vmem:[#allocation16_spill] sm:$0xff] %v6016_v7  ;;  %v3276_v39 = vcombine.low %v3247_v2, %v3251_v4  ;;  %v5071_v2 = vld [vmem:[%s7692_s3 + $0xc1] ss:$8 sm:$0xf0] }
  0xcd   : > { %v3277_v7 = vcombine.low %v3255_v6, %v3259_v45 }
  0xce   : > { %v3733_v26 = vcombine.low %v3718_v19, %v3722_v62  ;;  %v6036_v4 = vpop.permute.xlu0 %1482 }
  0xcf   : > { %3434 = vrot.lane.b32.xlu1 %v3428_v24, %s5327_s20  ;;  %v5050_v24 = vld [vmem:[%s7692_s3 + $0x86] ss:$8 sm:$0xf0] }
  0xd0   : > { %3432 = vrot.lane.b32.xlu0 %v3427_v57, %s5327_s20  ;;  %v3263_v57 = vrot.slane %v5989_v48, %v5387_v8  ;;  %v6023_v32 = vor.u32 %v5050_v24, %v5049_v38  ;;  %v6045_v24 = vpop.permute.xlu1 %1484 }
  0xd1   : > { %7773 = vst [vmem:[#allocation17_spill] sm:$0xff] %v6045_v24 }
  0xd2   : > { %v3560_v19 = vrot.slane %v6023_v32, %v5399_v14  ;;  %v3564_v62 = vrot.slane %v6023_v32, %v5401_v15  ;;  %v3552_v22 = vrot.slane %v6023_v32, %v5391_v10  ;;  %v3568_v6 = vrot.slane %v6023_v32, %v5387_v8 }
  0xd3   : > { %3737 = vrot.lane.b32.xlu1 %v3732_v46, %s5328_s26  ;;  %v5070_v46 = vld [vmem:[%s7692_s3 + $0xc1] ss:$8 sm:$0xf]  ;;  %v3572_v45 = vrot.slane %v6023_v32, %v5389_v9 }
  0xd4   : > { %3735 = vrot.lane.b32.xlu0 %v3731_v36, %s5328_s26  ;;  %v3278_v36 = vcombine.low %v3263_v57, %v3267_v63  ;;  %v6043_v38 = vor.u32 %v5071_v2, %v5070_v46  ;;  %v3582_v57 = vcombine.low %v3560_v19, %v3564_v62  ;;  %v5064_v19 = vld [vmem:[%s7692_s3 + $0xc0] ss:$8 sm:$0xf0]  ;;  %v6070_v62 = vpop.permute.xlu1 %1791 }
  0xd5   : > { %7775 = vst [vmem:[#allocation19_spill] sm:$0xff] %v6070_v62  ;;  %v3583_v0 = vcombine.low %v3568_v6, %v3572_v45 }
  0xd6   : > { %v4007_v63 = vrot.slane %v6043_v38, %v5391_v10  ;;  %v4011_v46 = vrot.slane %v6043_v38, %v5393_v11  ;;  %v4015_v34 = vrot.slane %v6043_v38, %v5399_v14  ;;  %v4019_v62 = vrot.slane %v6043_v38, %v5401_v15 }
  0xd7   : > { %3280 = vrot.lane.b32.xlu1 %v3276_v39, %s5326_s9  ;;  %v3556_v39 = vrot.slane %v6023_v32, %v5393_v11 }
  0xd8   : > { %3739 = vrot.lane.b32.xlu0 %v3733_v26, %s5328_s26  ;;  %v6058_v26 = vpop.permute.xlu0 %1486  ;;  %v4037_v33 = vcombine.low %v4015_v34, %v4019_v62 }
  0xd9   : > { %v3581_v2 = vcombine.low %v3552_v22, %v3556_v39  ;;  %7774 = vst [vmem:[#allocation18_spill] sm:$0xff] %v6058_v26  ;;  %v4036_v22 = vcombine.low %v4007_v63, %v4011_v46  ;;  %v4027_v39 = vrot.slane %v6043_v38, %v5389_v9  ;;  %v5078_v63 = vld [vmem:[%s7692_s3 + $0xc2] ss:$8 sm:$0xf0] }
  0xdb   : > { %3284 = vrot.lane.b32.xlu1 %v3278_v36, %s5326_s9  ;;  %v5063_v36 = vld [vmem:[%s7692_s3 + $0xc0] ss:$8 sm:$0xf] }
  0xdc   : > { %3282 = vrot.lane.b32.xlu0 %v3277_v7, %s5326_s9  ;;  %v4023_v7 = vrot.slane %v6043_v38, %v5387_v8  ;;  %v6077_v26 = vor.u32 %v5064_v19, %v5063_v36  ;;  %v6090_v46 = vpop.permute.xlu0 %1793  ;;  %v6097_v36 = vpop.permute.xlu1 %1795 }
  0xdd   : > { %7776 = vst [vmem:[#allocation20_spill] sm:$0xff] %v6097_v36 }
  0xde   : > { %v3865_v6 = vrot.slane %v6077_v26, %v5399_v14  ;;  %v3869_v45 = vrot.slane %v6077_v26, %v5401_v15  ;;  %v3857_v24 = vrot.slane %v6077_v26, %v5391_v10  ;;  %v3877_v62 = vrot.slane %v6077_v26, %v5389_v9 }
  0xdf   : > { %3587 = vrot.lane.b32.xlu1 %v3582_v57, %s5330_s12  ;;  %v5077_v57 = vld [vmem:[%s7692_s3 + $0xc2] ss:$8 sm:$0xf] }
  0xe0   : > { %3585 = vrot.lane.b32.xlu0 %v3581_v2, %s5330_s12  ;;  %v4038_v2 = vcombine.low %v4023_v7, %v4027_v39  ;;  %v6099_v19 = vor.u32 %v5078_v63, %v5077_v57  ;;  %v3887_v7 = vcombine.low %v3865_v6, %v3869_v45  ;;  %v6112_v57 = vpop.permute.xlu0 %2509  ;;  %v6118_v63 = vpop.permute.xlu1 %2511 }
  0xe2   : > { %v4162_v39 = vrot.slane %v6099_v19, %v5391_v10  ;;  %v4166_v36 = vrot.slane %v6099_v19, %v5393_v11  ;;  %v4178_v6 = vrot.slane %v6099_v19, %v5387_v8  ;;  %v4170_v45 = vrot.slane %v6099_v19, %v5399_v14 }
  0xe3   : > { %4040 = vrot.lane.b32.xlu1 %v4036_v22, %s5329_s6  ;;  %v3861_v22 = vrot.slane %v6077_v26, %v5393_v11 }
  0xe4   : > { %3589 = vrot.lane.b32.xlu0 %v3583_v0, %s5330_s12  ;;  %v3873_v0 = vrot.slane %v6077_v26, %v5387_v8  ;;  %v6130_v11 = vpop.permute.xlu0 %2513 }
  0xe5   : > { %v3886_v34 = vcombine.low %v3857_v24, %v3861_v22  ;;  %v4174_v22 = vrot.slane %v6099_v19, %v5401_v15  ;;  %7777 = vst [vmem:[#allocation21_spill] sm:$0xff] %v6130_v11 }
  0xe6   : > { %v3888_v24 = vcombine.low %v3873_v0, %v3877_v62  ;;  %v1007_v62 = vrot.slane %v5461_v3, %v5395_v12 }
  0xe7   : > { %4044 = vrot.lane.b32.xlu1 %v4038_v2, %s5329_s6  ;;  %v4191_v2 = vcombine.low %v4162_v39, %v4166_v36  ;;  %v1316_v39 = vrot.slane %v5483_v23, %v5395_v12  ;;  %v4192_v0 = vcombine.low %v4170_v45, %v4174_v22 }
  0xe8   : > { %4042 = vrot.lane.b32.xlu0 %v4037_v33, %s5329_s6  ;;  %v4182_v33 = vrot.slane %v6099_v19, %v5389_v9  ;;  %v1011_v9 = vrot.slane %v5461_v3, %v5397_v13  ;;  %v6149_v8 = vpop.permute.xlu0 %2102  ;;  %v859_v3 = vrot.slane %v5505_v35, %v5397_v13 }
  0xea   : > { %v4193_v36 = vcombine.low %v4178_v6, %v4182_v33  ;;  %v1164_v6 = vrot.slane %v5529_v47, %v5395_v12  ;;  %v1168_v33 = vrot.slane %v5529_v47, %v5397_v13  ;;  %v1938_v47 = vrot.slane %v5575_v16, %v5397_v13 }
  0xeb   : > { %3892 = vrot.lane.b32.xlu1 %v3887_v7, %s5331_s19  ;;  %v6133_v7 = vpop.permute.xlu1 %2100 }
  0xec   : > { %3890 = vrot.lane.b32.xlu0 %v3886_v34, %s5331_s19  ;;  %v1320_v34 = vrot.slane %v5483_v23, %v5397_v13  ;;  %v1015_v23 = vcombine.low %v1007_v62, %v1011_v9  ;;  %v1172_v22 = vcombine.low %v1164_v6, %v1168_v33  ;;  %v1473_v33 = vrot.slane %v5597_v29, %v5395_v12 }
  0xef   : > { %4195 = vrot.lane.b32.xlu1 %v4191_v2, %s5334_s17  ;;  %v1324_v2 = vcombine.low %v1316_v39, %v1320_v34  ;;  %v6156_v45 = vpop.permute.xlu1 %2104  ;;  %v1625_v39 = vrot.slane %v5551_v59, %v5395_v12  ;;  %v6168_v34 = vpop.permute.xlu0 %2357 }
  0xf0   : > { %3894 = vrot.lane.b32.xlu0 %v3888_v24, %s5331_s19  ;;  %v855_v24 = vrot.slane %v5505_v35, %v5395_v12  ;;  %7778 = vst [vmem:[#allocation22_spill] sm:$0xff] %v6156_v45  ;;  %v1629_v35 = vrot.slane %v5551_v59, %v5397_v13  ;;  %v1477_v59 = vrot.slane %v5597_v29, %v5397_v13 }
  0xf1   : > { %v2504_v29 = vrot.slane %v5643_v55, %v5397_v13 }
  0xf2   : > { %v863_v9 = vcombine.low %v855_v24, %v859_v3  ;;  %v1633_v6 = vcombine.low %v1625_v39, %v1629_v35  ;;  %v2091_v24 = vrot.slane %v5667_v5, %v5395_v12  ;;  %v2095_v3 = vrot.slane %v5667_v5, %v5397_v13 }
  0xf3   : > { %4199 = vrot.lane.b32.xlu1 %v4193_v36, %s5334_s17  ;;  %v1934_v36 = vrot.slane %v5575_v16, %v5395_v12  ;;  %v1786_v16 = vrot.slane %v5621_v42, %v5397_v13  ;;  %v2809_v5 = vrot.slane %v5713_v41, %v5395_v12  ;;  %v2813_v35 = vrot.slane %v5713_v41, %v5397_v13 }
  0xf4   : > { %4197 = vrot.lane.b32.xlu0 %v4192_v0, %s5334_s17  ;;  %v6171_v0 = vpop.permute.xlu1 %2359  ;;  %v2099_v39 = vcombine.low %v2091_v24, %v2095_v3  ;;  %v2661_v24 = vrot.slane %v5883_v21, %v5397_v13  ;;  %v3120_v3 = vrot.slane %v5735_v56, %v5397_v13 }
  0xf5   : > { %v1942_v62 = vcombine.low %v1934_v36, %v1938_v47  ;;  %v2500_v36 = vrot.slane %v5643_v55, %v5395_v12  ;;  %v2352_v55 = vrot.slane %v5689_v27, %v5397_v13  ;;  %v2817_v41 = vcombine.low %v2809_v5, %v2813_v35 }
  0xf7   : > { %1331 = vrot.lane.b32.xlu1 %v1324_v2, %s5329_s6  ;;  %v1782_v2 = vrot.slane %v5621_v42, %v5395_v12  ;;  %v1481_v42 = vcombine.low %v1473_v33, %v1477_v59 }
  0xf8   : > { %1022 = vrot.lane.b32.xlu0 %v1015_v23, %s5328_s26  ;;  %v6194_v47 = vpop.permute.xlu1 %2818 }
  0xf9   : > { %v1790_v23 = vcombine.low %v1782_v2, %v1786_v16  ;;  %v2348_v2 = vrot.slane %v5689_v27, %v5395_v12  ;;  %v7780_v16 = vrot.slane %v5816_v44, 4  ;;  %v3116_v44 = vrot.slane %v5735_v56, %v5395_v12 }
  0xfb   : > { %1179 = vrot.lane.b32.xlu1 %v1172_v22, %s5331_s19  ;;  %v6187_v22 = vpop.permute.xlu0 %2361  ;;  %v2356_v27 = vcombine.low %v2348_v2, %v2352_v55  ;;  %v2966_v2 = vrot.slane %v5915_v1, %v5395_v12  ;;  %v2970_v55 = vrot.slane %v5915_v1, %v5397_v13  ;;  %v3726_v1 = vrot.slane %v5969_v60, %v5395_v12 }
  0xfc   : > { %870 = vrot.lane.b32.xlu0 %v863_v9, %s5330_s12  ;;  %7779 = vst [vmem:[#allocation23_spill] sm:$0xff] %v6187_v22  ;;  %v7709_v9 = vrot.slane %v5836_v17, 4  ;;  %v6214_v59 = vpop.permute.xlu1 %2822 }
  0xff   : > { %1949 = vrot.lane.b32.xlu1 %v1942_v62, %s5333_s8  ;;  %v2508_v62 = vcombine.low %v2500_v36, %v2504_v29  ;;  %v6212_v33 = vpop.permute.xlu0 %2820  ;;  %v1024_v36 = vrot.slane %v5852_v40, 4  ;;  %v3421_v29 = vrot.slane %v5935_v30, %v5395_v12 }
 0x100   : > { %1640 = vrot.lane.b32.xlu0 %v1633_v6, %s5332_s27  ;;  %v723_v6 = vsel %vm258_vm0, %v7780_v16, %v7709_v9  ;;  %v6245_v16 = vpop.permute.xlu1 %3127  ;;  %v1333_v9 = vrot.slane %v5867_v61, 4 }
 0x101   : > { %7781 = vst [vmem:[#allocation24_spill] sm:$0xff] %v6245_v16 }
 0x103   : > { %1797 = vrot.lane.b32.xlu1 %v1790_v23, %s5335_s24  ;;  %v2657_v23 = vrot.slane %v5883_v21, %v5395_v12  ;;  %v3425_v21 = vrot.slane %v5935_v30, %v5397_v13  ;;  %v6236_v56 = vpop.permute.xlu0 %3125  ;;  %v742_v30 = vcombine.high %v5840_v18, %v5840_v18 }
 0x104   : > { %1488 = vrot.lane.b32.xlu0 %v1481_v42, %s5334_s17  ;;  %v724_v42 = vsel %vm719_vm4, %v723_v6, %v5836_v17  ;;  %v1029_v6 = vsel %vm802_vm5, %v1024_v36, %v5852_v40  ;;  %v2974_v40 = vcombine.low %v2966_v2, %v2970_v55 }
 0x105   : > { %v2665_v5 = vcombine.low %v2657_v23, %v2661_v24  ;;  %v734_v35 = vmul.f32 %v724_v42, %v5812_v25  ;;  %v3271_v23 = vrot.slane %v5989_v48, %v5395_v12  ;;  %v6261_v42 = vpack.c.bf16 %v742_v30, %v5840_v18 }
 0x106   : > { %v873_v18 = vrot.slane %v5888_v31, 4 }
 0x107   : > { %2106 = vrot.lane.b32.xlu1 %v2099_v39, %s5337_s21  ;;  %v1025_v39 = vrot.slane %v5854_v28, 4  ;;  %v328_v2 = vpop.permute.xlu0 %327 }
 0x108   : > { %2515 = vrot.lane.b32.xlu0 %v2508_v62, %s5336_s10  ;;  %v3124_v62 = vcombine.low %v3116_v44, %v3120_v3  ;;  %v3730_v44 = vrot.slane %v5969_v60, %v5397_v13  ;;  %v743_v3 = vcombine.high %v734_v35, %v734_v35 }
 0x109   : > { %v1030_v24 = vsel %vm258_vm0, %v1024_v36, %v1025_v39  ;;  %v1041_v36 = vmul.f32 %v1029_v6, %v5788_v43 }
 0x10a   : > { %v1031_v60 = vsel %vm802_vm5, %v1030_v24, %v5854_v28  ;;  %v3734_v30 = vcombine.low %v3726_v1, %v3730_v44  ;;  %v6276_v6 = vpack.c.bf16 %v743_v3, %v734_v35  ;;  %v3580_v28 = vrot.slane %v6023_v32, %v5397_v13 }
 0x10b   : > { %2824 = vrot.lane.b32.xlu1 %v2817_v41, %s5339_s7  ;;  %v3429_v41 = vcombine.low %v3421_v29, %v3425_v21  ;;  %v4035_v21 = vrot.slane %v6043_v38, %v5397_v13  ;;  %v1050_v35 = vcombine.high %v1041_v36, %v1041_v36  ;;  %v1338_v24 = vsel %vm493_vm6, %v1333_v9, %v5867_v61 }
 0x10c   : > { %2363 = vrot.lane.b32.xlu0 %v2356_v27, %s5338_s5  ;;  %v3275_v27 = vrot.slane %v5989_v48, %v5397_v13  ;;  %v4031_v48 = vrot.slane %v6043_v38, %v5395_v12  ;;  %v3576_v38 = vrot.slane %v6023_v32, %v5395_v12  ;;  %v4186_v32 = vrot.slane %v6099_v19, %v5395_v12 }
 0x10d   : > { %v1334_v61 = vrot.slane %v5878_v52, 4  ;;  %v6331_v16 = vpack.c.bf16 %v1050_v35, %v1041_v36 }
 0x10e   : > { %v3279_v55 = vcombine.low %v3271_v23, %v3275_v27  ;;  %v7782_v23 = vrot.slane %v5865_v58, 4  ;;  %v4039_v3 = vcombine.low %v4031_v48, %v4035_v21  ;;  %v3584_v21 = vcombine.low %v3576_v38, %v3580_v28 }
 0x10f   : > { %2672 = vrot.lane.b32.xlu1 %v2665_v5, %s5340_s13  ;;  %v1042_v5 = vmul.f32 %v1031_v60, %v5782_v37  ;;  %v3881_v60 = vrot.slane %v6077_v26, %v5395_v12 }
 0x110   : > { %3131 = vrot.lane.b32.xlu0 %v3124_v62, %s5325_s30  ;;  %v872_v62 = vrot.slane %v5886_v54, 4  ;;  %v1032_v27 = vsel %vm258_vm0, %v1025_v39, %v7782_v23  ;;  %v3885_v39 = vrot.slane %v6077_v26, %v5397_v13  ;;  %v783_v23 = vrot.slane %v6276_v6, 6 }
 0x111   : > { %v6264_v29 = vpop.permute.xlu1 %485 }
 0x112   : > { %v878_v1 = vsel %vm258_vm0, %v872_v62, %v873_v18  ;;  %v877_v12 = vsel %vm876_vm7, %v872_v62, %v5886_v54  ;;  %v3889_v54 = vcombine.low %v3881_v60, %v3885_v39  ;;  %v6322_v62 = vld [vmem:[%s5767_s18 + $0x10] sm:$0xff]  ;;  %v1339_v60 = vsel %vm258_vm0, %v1333_v9, %v1334_v61 }
 0x113   : > { %3436 = vrot.lane.b32.xlu1 %v3429_v41, %s5327_s20  ;;  %v879_v26 = vsel %vm876_vm7, %v878_v1, %v5888_v31  ;;  %v889_v31 = vmul.f32 %v877_v12, %v5788_v43  ;;  %v7783_v1 = vrot.slane %v5906_v49, 4  ;;  %v1182_v39 = vrot.slane %v5928_v53, 4 }
 0x114   : > { %2981 = vrot.lane.b32.xlu0 %v2974_v40, %s5324_s25  ;;  %v4190_v40 = vrot.slane %v6099_v19, %v5397_v13  ;;  %v1033_v19 = vsel %vm802_vm5, %v1032_v27, %v5865_v58  ;;  %v333_v13 = vrot.slane %v328_v2, 4  ;;  %v890_v2 = vmul.f32 %v879_v26, %v5782_v37 }
 0x115   : > { %v6286_v41 = vpop.permute.xlu1 %321  ;;  %v880_v17 = vsel %vm258_vm0, %v873_v18, %v7783_v1  ;;  %v6341_v18 = vmul.f32 %v1338_v24, %v5788_v43  ;;  %v1043_v36 = vmul.f32 %v1033_v19, %v6322_v62  ;;  %v898_v24 = vcombine.high %v889_v31, %v889_v31 }
 0x116   : > { %v6292_v44 = vpop.permute.xlu0 %637  ;;  %v330_v28 = vrot.slane %v6286_v41, 4  ;;  %v4194_v58 = vcombine.low %v4186_v32, %v4190_v40  ;;  %v881_v35 = vsel %vm876_vm7, %v880_v17, %v5906_v49  ;;  %v7784_v26 = vrot.slane %v5880_v50, 4 }
 0x117   : > { %3286 = vrot.lane.b32.xlu1 %v3279_v55, %s5326_s9  ;;  %v1051_v55 = vcombine.high %v1042_v5, %v1042_v5  ;;  %v1340_v17 = vsel %vm493_vm6, %v1339_v60, %v5878_v52  ;;  %v1052_v60 = vcombine.high %v1043_v36, %v1043_v36 }
 0x118   : > { %3741 = vrot.lane.b32.xlu0 %v3734_v30, %s5328_s26 }
 0x119   : > { %v6314_v6 = vpop.permute.xlu1 %325 }
 0x11a   : > { %v332_v30 = vrot.slane %v6314_v6, 4  ;;  %v320_v38 = vpop.permute.xlu0 %319 }
 0x11b   : > { %4046 = vrot.lane.b32.xlu1 %v4039_v3, %s5329_s6  ;;  %v329_v27 = vrot.slane %v320_v38, 4  ;;  %v1181_v3 = vrot.slane %v5908_v51, 4 }
 0x11c   : > { %v342_v48 = vsel %vm258_vm0, %v332_v30, %v333_v13  ;;  %3591 = vrot.lane.b32.xlu0 %v3584_v21, %s5330_s12  ;;  %v6350_v21 = vpack.c.bf16 %v1051_v55, %v1042_v5  ;;  %v643_v55 = vrot.slane %v6292_v44, 4 }
 0x11d   : > { %v343_v32 = vsel %vm336_vm8, %v6314_v6, %v342_v48  ;;  %v335_v40 = vsel %vm258_vm0, %v329_v27, %v330_v28  ;;  %v6337_v12 = vpop.permute.xlu1 %631  ;;  %v1341_v6 = vsel %vm258_vm0, %v1334_v61, %v7784_v26  ;;  %v1186_v19 = vsel %vm7750_vm9, %v1181_v3, %v5908_v51 }
 0x11e   : > { %351 = vst [vmem:[#allocation2 + $0x18] sm:$0x33] %v343_v32  ;;  %v337_v13 = vsel %vm336_vm8, %v320_v38, %v335_v40  ;;  %v630_v37 = vpop.permute.xlu0 %629  ;;  %v640_v48 = vrot.slane %v6337_v12, 4  ;;  %v899_v38 = vcombine.high %v890_v2, %v890_v2  ;;  %v7719_v27 = vrot.slane %v5937_v20, 4 }
 0x11f   : > { %348 = vst [vmem:[#allocation2] sm:$0x33] %v337_v13  ;;  %4201 = vrot.lane.b32.xlu1 %v4194_v58, %s5334_s17  ;;  %v639_v9 = vrot.slane %v630_v37, 4  ;;  %v891_v40 = vmul.f32 %v881_v35, %v6322_v62  ;;  %v1187_v52 = vsel %vm258_vm0, %v1181_v3, %v1182_v39  ;;  %v5171_v13 = vpack.c.bf16 %v898_v24, %v889_v31 }
 0x120   : > { %3896 = vrot.lane.b32.xlu0 %v3889_v54, %s5331_s19  ;;  %v1342_v54 = vsel %vm493_vm6, %v1341_v6, %v5880_v50  ;;  %v1198_v44 = vmul.f32 %v1186_v19, %v5788_v43  ;;  %v7785_v35 = vrot.slane %v6261_v42, 6  ;;  %v1189_v26 = vsel %vm258_vm0, %v1182_v39, %v7719_v27 }
 0x121   : > { %v644_v58 = vsel %vm258_vm0, %v639_v9, %v640_v48  ;;  %v636_v5 = vpop.permute.xlu1 %635  ;;  %v5172_v9 = vpack.c.bf16 %v899_v38, %v890_v2  ;;  %v6381_v2 = vld [vmem:[%s5767_s18 + $0x8] sm:$0xff]  ;;  %v1188_v43 = vsel %vm7750_vm9, %v1187_v52, %v5928_v53  ;;  %v900_v39 = vcombine.high %v891_v40, %v891_v40 }
 0x122   : > { %v646_v1 = vsel %vm7750_vm9, %v630_v37, %v644_v58  ;;  %v642_v32 = vrot.slane %v636_v5, 4  ;;  %v324_v61 = vpop.permute.xlu0 %323  ;;  %v1090_v19 = vrot.slane %v6331_v16, 6  ;;  %v1091_v53 = vrot.slane %v6350_v21, 6 }
 0x123   : > { %657 = vst [vmem:[#allocation2 + $0x20] sm:$0x33] %v646_v1  ;;  %790 = vrot.lane.b32.xlu1 %v783_v23, %s5328_s26  ;;  %v331_v51 = vrot.slane %v324_v61, 4  ;;  %v6394_v58 = vmul.f32 %v1342_v54, %v5812_v25  ;;  %v1190_v16 = vsel %vm7750_vm9, %v1189_v26, %v5937_v20  ;;  %v1199_v21 = vmul.f32 %v1188_v43, %v6381_v2 }
 0x124   : > { %v651_v37 = vsel %vm258_vm0, %v642_v32, %v643_v55  ;;  %788 = vrot.lane.b32.xlu0 %v7785_v35, %s5328_s26  ;;  %v1207_v52 = vcombine.high %v1198_v44, %v1198_v44  ;;  %v2365_v27 = vrot.slane %v6168_v34, 4 }
 0x125   : > { %v652_v3 = vsel %vm7750_vm9, %v636_v5, %v651_v37  ;;  %v338_v23 = vsel %vm258_vm0, %v330_v28, %v331_v51  ;;  %v340_v6 = vsel %vm258_vm0, %v331_v51, %v332_v30  ;;  %v478_v31 = vpop.permute.xlu1 %477  ;;  %v1359_v28 = vcombine.high %v6341_v18, %v6341_v18 }
 0x126   : > { %660 = vst [vmem:[#allocation2 + $0x38] sm:$0x33] %v652_v3  ;;  %v339_v42 = vsel %vm336_vm8, %v6286_v41, %v338_v23  ;;  %v341_v24 = vsel %vm336_vm8, %v324_v61, %v340_v6  ;;  %v634_v38 = vpop.permute.xlu0 %633  ;;  %v5178_v41 = vpack.c.bf16 %v1052_v60, %v1043_v36  ;;  %v6398_v5 = vmul.f32 %v1340_v17, %v6381_v2 }
 0x127   : > { %349 = vst [vmem:[#allocation2 + $0x8] sm:$0x33] %v339_v42  ;;  %350 = vst [vmem:[#allocation2 + $0x10] sm:$0x33] %v341_v24  ;;  %940 = vrot.lane.b32.xlu1 %v5172_v9, %s5330_s12  ;;  %v641_v30 = vrot.slane %v634_v38, 4  ;;  %v5173_v17 = vpack.c.bf16 %v900_v39, %v891_v40  ;;  %v1490_v60 = vrot.slane %v6036_v4, 4  ;;  %v1361_v35 = vcombine.high %v6394_v58, %v6394_v58 }
 0x128   : > { %938 = vrot.lane.b32.xlu0 %v5171_v13, %s5330_s12  ;;  %v7786_v13 = vld [vmem:[#allocation17_spill] sm:$0xff]  ;;  %v487_v37 = vrot.slane %v478_v31, 4  ;;  %v1200_v3 = vmul.f32 %v1190_v16, %v5812_v25  ;;  %v1092_v6 = vrot.slane %v5178_v41, 6  ;;  %v1208_v43 = vcombine.high %v1199_v21, %v1199_v21 }
 0x129   : > { %v647_v55 = vsel %vm258_vm0, %v640_v48, %v641_v30  ;;  %v649_v1 = vsel %vm258_vm0, %v641_v30, %v642_v32  ;;  %v6404_v61 = vpop.permute.xlu1 %786  ;;  %v1491_v9 = vrot.slane %v7786_v13, 4  ;;  %v5186_v32 = vpack.c.bf16 %v1359_v28, %v6341_v18  ;;  %v7789_v30 = vld [vmem:[#allocation13_spill] sm:$0xff] }
 0x12a   : > { %v648_v54 = vsel %vm7750_vm9, %v6337_v12, %v647_v55  ;;  %v650_v36 = vsel %vm7750_vm9, %v634_v38, %v649_v1  ;;  %v480_v51 = vpop.permute.xlu0 %479  ;;  %v7787_v12 = vld [vmem:[#allocation11_spill] sm:$0xff]  ;;  %v1360_v42 = vcombine.high %v6398_v5, %v6398_v5  ;;  %v5181_v24 = vpack.c.bf16 %v1207_v52, %v1198_v44  ;;  %v7788_v38 = vld [vmem:[#allocation12_spill] sm:$0xff]  ;;  %v7790_v52 = vld [vmem:[#allocation18_spill] sm:$0xff] }
 0x12b   : > { %658 = vst [vmem:[#allocation2 + $0x28] sm:$0x33] %v648_v54  ;;  %659 = vst [vmem:[#allocation2 + $0x30] sm:$0x33] %v650_v36  ;;  %1095 = vrot.lane.b32.xlu1 %v1090_v19, %s5327_s20  ;;  %v488_v48 = vrot.slane %v480_v51, 4  ;;  %v1642_v26 = vrot.slane %v7787_v12, 4  ;;  %v1496_v25 = vsel %vm258_vm0, %v1490_v60, %v1491_v9  ;;  %v1209_v44 = vcombine.high %v1200_v3, %v1200_v3 }
 0x12c   : > { %942 = vrot.lane.b32.xlu0 %v5173_v17, %s5330_s12  ;;  %v1643_v18 = vrot.slane %v7788_v38, 4  ;;  %v7716_v55 = vrot.slane %v7789_v30, 4  ;;  %v491_v16 = vrot.slane %v6264_v29, 4  ;;  %v7715_v54 = vrot.slane %v7790_v52, 4 }
 0x12d   : > { %v492_v40 = vsel %vm258_vm0, %v487_v37, %v488_v48  ;;  %v482_v23 = vpop.permute.xlu1 %481  ;;  %v1647_v1 = vsel %vm1646_vm10, %v1642_v26, %v7787_v12  ;;  %v1497_v12 = vsel %vm336_vm8, %v1496_v25, %v7786_v13  ;;  %v5188_v13 = vpack.c.bf16 %v1361_v35, %v6394_v58 }
 0x12e   : > { %v494_v39 = vsel %vm493_vm6, %v478_v31, %v492_v40  ;;  %v489_v19 = vrot.slane %v482_v23, 4  ;;  %v484_v28 = vpop.permute.xlu0 %483  ;;  %v5182_v40 = vpack.c.bf16 %v1208_v43, %v1199_v21  ;;  %v1495_v21 = vsel %vm336_vm8, %v1490_v60, %v6036_v4  ;;  %v5314_v60 = vld [vmem:[%s5767_s18 + $0x8] sm:$0xff] }
 0x12f   : > { %505 = vst [vmem:[#allocation2] sm:$0xcc] %v494_v39  ;;  %1099 = vrot.lane.b32.xlu1 %v1092_v6, %s5327_s20  ;;  %v490_v41 = vrot.slane %v484_v28, 4  ;;  %v1648_v6 = vsel %vm258_vm0, %v1642_v26, %v1643_v18  ;;  %v1650_v39 = vsel %vm258_vm0, %v1643_v18, %v7716_v55  ;;  %v6453_v26 = vld [vmem:[%s5767_s18] sm:$0xff]  ;;  %v1498_v43 = vsel %vm258_vm0, %v1491_v9, %v7715_v54 }
 0x130   : > { %v495_v31 = vsel %vm258_vm0, %v488_v48, %v489_v19  ;;  %1097 = vrot.lane.b32.xlu0 %v1091_v53, %s5327_s20  ;;  %v1399_v18 = vrot.slane %v5186_v32, 6  ;;  %v1649_v4 = vsel %vm1646_vm10, %v1648_v6, %v7788_v38  ;;  %v5183_v25 = vpack.c.bf16 %v1209_v44, %v1200_v3  ;;  %v7794_v32 = vld [vmem:[#allocation16_spill] sm:$0xff] }
 0x131   : > { %v496_v36 = vsel %vm493_vm6, %v480_v51, %v495_v31  ;;  %v497_v17 = vsel %vm258_vm0, %v489_v19, %v490_v41  ;;  %v499_v29 = vsel %vm258_vm0, %v490_v41, %v491_v16  ;;  %v6436_v37 = vpop.permute.xlu1 %2666  ;;  %v1508_v19 = vmul.f32 %v5314_v60, %v1497_v12  ;;  %v7793_v41 = vld [vmem:[#allocation15_spill] sm:$0xff] }
 0x132   : > { %506 = vst [vmem:[#allocation2 + $0x8] sm:$0xcc] %v496_v36  ;;  %v498_v48 = vsel %vm493_vm6, %v482_v23, %v497_v17  ;;  %v500_v53 = vsel %vm493_vm6, %v484_v28, %v499_v29  ;;  %v6443_v51 = vpop.permute.xlu0 %3129  ;;  %v1659_v23 = vmul.f32 %v6453_v26, %v1647_v1  ;;  %v1651_v58 = vsel %vm1646_vm10, %v1650_v39, %v7789_v30  ;;  %v7795_v17 = vld [vmem:[#allocation14_spill] sm:$0xff] }
 0x133   : > { %7791 = vst [vmem:[#allocation17_spill] sm:$0xff] %v6443_v51  ;;  %507 = vst [vmem:[#allocation2 + $0x10] sm:$0xcc] %v498_v48  ;;  %1249 = vrot.lane.b32.xlu1 %v5182_v40, %s5326_s9  ;;  %v1507_v35 = vmul.f32 %v6453_v26, %v1495_v21  ;;  %v5187_v9 = vpack.c.bf16 %v1360_v42, %v6398_v5  ;;  %v7718_v1 = vrot.slane %v7794_v32, 4  ;;  %v1800_v31 = vrot.slane %v6090_v46, 4  ;;  %v7796_v5 = vld [vmem:[#allocation19_spill] sm:$0xff] }
 0x134   : > { %508 = vst [vmem:[#allocation2 + $0x18] sm:$0xcc] %v500_v53  ;;  %1247 = vrot.lane.b32.xlu0 %v5181_v24, %s5326_s9  ;;  %v1952_v24 = vrot.slane %v7793_v41, 4  ;;  %v1499_v38 = vsel %vm336_vm8, %v1498_v43, %v7790_v52  ;;  %v1401_v3 = vrot.slane %v5188_v13, 6  ;;  %v1668_v44 = vcombine.high %v1659_v23, %v1659_v23 }
 0x135   : > { %v6463_v28 = vpop.permute.xlu1 %2670  ;;  %v1660_v36 = vmul.f32 %v5314_v60, %v1649_v4  ;;  %v1951_v29 = vrot.slane %v7795_v17, 4  ;;  %v1517_v40 = vcombine.high %v1508_v19, %v1508_v19  ;;  %v1799_v42 = vrot.slane %v7796_v5, 4  ;;  %v7797_v60 = vld [vmem:[#allocation20_spill] sm:$0xff] }
 0x136   : > { %7792 = vst [vmem:[#allocation11_spill] sm:$0xff] %v6463_v28  ;;  %v6468_v16 = vpop.permute.xlu0 %2668  ;;  %v1661_v12 = vmul.f32 %v1651_v58, %v6322_v62  ;;  %v1516_v48 = vcombine.high %v1507_v35, %v1507_v35  ;;  %v1400_v39 = vrot.slane %v5187_v9, 6  ;;  %v1509_v21 = vmul.f32 %v1499_v38, %v6322_v62 }
 0x137   : > { %1404 = vrot.lane.b32.xlu1 %v1399_v18, %s5325_s30  ;;  %v1959_v13 = vsel %vm258_vm0, %v1952_v24, %v7718_v1  ;;  %v1805_v43 = vsel %vm258_vm0, %v1799_v42, %v1800_v31  ;;  %v5196_v18 = vpack.c.bf16 %v1668_v44, %v1659_v23  ;;  %v1669_v4 = vcombine.high %v1660_v36, %v1660_v36 }
 0x138   : > { %1251 = vrot.lane.b32.xlu0 %v5183_v25, %s5326_s9  ;;  %v7717_v25 = vrot.slane %v7797_v60, 4  ;;  %v1956_v58 = vsel %vm1955_vm11, %v1951_v29, %v7795_v17  ;;  %v1957_v62 = vsel %vm258_vm0, %v1951_v29, %v1952_v24  ;;  %v5192_v9 = vpack.c.bf16 %v1517_v40, %v1508_v19  ;;  %v6515_v29 = vld [vmem:[%s5767_s18 + $0x10] sm:$0xff] }
 0x139   : > { %v6480_v6 = vpop.permute.xlu1 %2977  ;;  %v1670_v54 = vcombine.high %v1661_v12, %v1661_v12  ;;  %v5191_v55 = vpack.c.bf16 %v1516_v48, %v1507_v35  ;;  %v1960_v23 = vsel %vm1955_vm11, %v1959_v13, %v7794_v32  ;;  %v1804_v17 = vsel %vm1803_vm12, %v1799_v42, %v7796_v5  ;;  %v6578_v32 = vld [vmem:[%s5767_s18 + $0xc] sm:$0xff] }
 0x13a   : > { %v6483_v53 = vpop.permute.xlu0 %2975  ;;  %v1708_v24 = vrot.slane %v5196_v18, 6  ;;  %v1968_v19 = vmul.f32 %v6453_v26, %v1956_v58  ;;  %v1807_v35 = vsel %vm258_vm0, %v1800_v31, %v7717_v25  ;;  %v1970_v40 = vmul.f32 %v6515_v29, %v1960_v23 }
 0x13b   : > { %1408 = vrot.lane.b32.xlu1 %v1401_v3, %s5325_s30  ;;  %v1806_v3 = vsel %vm1803_vm12, %v1805_v43, %v6090_v46  ;;  %v1958_v46 = vsel %vm1955_vm11, %v1957_v62, %v7793_v41  ;;  %v5198_v5 = vpack.c.bf16 %v1670_v54, %v1661_v12  ;;  %v5197_v13 = vpack.c.bf16 %v1669_v4, %v1660_v36 }
 0x13c   : > { %1406 = vrot.lane.b32.xlu0 %v1400_v39, %s5325_s30  ;;  %v1518_v39 = vcombine.high %v1509_v21, %v1509_v21  ;;  %v1817_v42 = vmul.f32 %v1806_v3, %v6381_v2  ;;  %v1816_v43 = vmul.f32 %v6453_v26, %v1804_v17  ;;  %v2109_v41 = vrot.slane %v6149_v8, 4 }
 0x13d   : > { %v6496_v38 = vpop.permute.xlu1 %3430  ;;  %v1977_v58 = vcombine.high %v1968_v19, %v1968_v19  ;;  %v1969_v54 = vmul.f32 %v1958_v46, %v6381_v2  ;;  %v1979_v12 = vcombine.high %v1970_v40, %v1970_v40  ;;  %v2108_v36 = vrot.slane %v6133_v7, 4 }
 0x13e   : > { %v6502_v44 = vpop.permute.xlu0 %2979  ;;  %v5193_v31 = vpack.c.bf16 %v1518_v39, %v1509_v21  ;;  %v1710_v26 = vrot.slane %v5198_v5, 6  ;;  %v1826_v62 = vcombine.high %v1817_v42, %v1817_v42  ;;  %v1709_v21 = vrot.slane %v5197_v13, 6 }
 0x13f   : > { %7798 = vst [vmem:[#allocation12_spill] sm:$0xff] %v6502_v44  ;;  %1558 = vrot.lane.b32.xlu1 %v5192_v9, %s5324_s25  ;;  %v1825_v9 = vcombine.high %v1816_v43, %v1816_v43  ;;  %v2517_v39 = vrot.slane %v6112_v57, 4  ;;  %v2518_v17 = vrot.slane %v6118_v63, 4  ;;  %v1978_v46 = vcombine.high %v1969_v54, %v1969_v54 }
 0x140   : > { %1556 = vrot.lane.b32.xlu0 %v5191_v55, %s5324_s25  ;;  %v1808_v55 = vsel %vm1803_vm12, %v1807_v35, %v7797_v60  ;;  %v7727_v35 = vrot.slane %v6156_v45, 4  ;;  %v5206_v5 = vpack.c.bf16 %v1977_v58, %v1968_v19  ;;  %v5208_v13 = vpack.c.bf16 %v1979_v12, %v1970_v40  ;;  %v2054_v40 = vld [vmem:[%s5767_s18] sm:$0xff] }
 0x141   : > { %v6518_v48 = vpop.permute.xlu1 %3434  ;;  %v1818_v23 = vmul.f32 %v6515_v29, %v1808_v55  ;;  %v5202_v55 = vpack.c.bf16 %v1826_v62, %v1817_v42  ;;  %v5201_v25 = vpack.c.bf16 %v1825_v9, %v1816_v43  ;;  %v2523_v19 = vsel %vm258_vm0, %v2517_v39, %v2518_v17  ;;  %v6563_v12 = vld [vmem:[%s5767_s18 + $0x4] sm:$0xff] }
 0x142   : > { %7799 = vst [vmem:[#allocation15_spill] sm:$0xff] %v6518_v48  ;;  %v6522_v18 = vpop.permute.xlu0 %3432  ;;  %v2113_v58 = vsel %vm7724_vm14, %v2108_v36, %v6133_v7  ;;  %v2366_v43 = vrot.slane %v6171_v0, 4  ;;  %v2522_v62 = vsel %vm7753_vm13, %v2517_v39, %v6112_v57  ;;  %v2116_v7 = vsel %vm258_vm0, %v2109_v41, %v7727_v35 }
 0x143   : > { %1713 = vrot.lane.b32.xlu1 %v1708_v24, %s5339_s7  ;;  %v2114_v24 = vsel %vm258_vm0, %v2108_v36, %v2109_v41  ;;  %v1827_v1 = vcombine.high %v1818_v23, %v1818_v23  ;;  %v5207_v36 = vpack.c.bf16 %v1978_v46, %v1969_v54  ;;  %v2524_v57 = vsel %vm7753_vm13, %v2523_v19, %v6118_v63 }
 0x144   : > { %1560 = vrot.lane.b32.xlu0 %v5193_v31, %s5324_s25  ;;  %v2125_v39 = vmul.f32 %v2113_v58, %v2054_v40  ;;  %v2534_v54 = vmul.f32 %v2522_v62, %v6563_v12  ;;  %v2117_v46 = vsel %vm7724_vm14, %v2116_v7, %v6156_v45  ;;  %v2019_v63 = vrot.slane %v5208_v13, 6 }
 0x145   : > { %v6531_v4 = vpop.permute.xlu1 %3737  ;;  %v5203_v30 = vpack.c.bf16 %v1827_v1, %v1818_v23  ;;  %v2018_v23 = vrot.slane %v5207_v36, 6  ;;  %v2535_v19 = vmul.f32 %v2524_v57, %v6578_v32  ;;  %v6617_v36 = vld [vmem:[%s5767_s18 + $0x14] sm:$0xff] }
 0x146   : > { %v6534_v3 = vpop.permute.xlu0 %3735  ;;  %v2134_v58 = vcombine.high %v2125_v39, %v2125_v39 }
 0x147   : > { %1717 = vrot.lane.b32.xlu1 %v1710_v26, %s5339_s7  ;;  %v2115_v26 = vsel %vm7724_vm14, %v2114_v24, %v6149_v8  ;;  %v4988_v8 = vld [vmem:[%s7692_s3 + $0x45] ss:$8 sm:$0xf0]  ;;  %v2017_v24 = vrot.slane %v5206_v5, 6  ;;  %v2371_v5 = vsel %vm258_vm0, %v2365_v27, %v2366_v43  ;;  %vm1881_vm14 = vcmask 64512  }
 0x148   : > { %1715 = vrot.lane.b32.xlu0 %v1709_v21, %s5339_s7  ;;  %v4987_v21 = vld [vmem:[%s7692_s3 + $0x45] ss:$8 sm:$0xf]  ;;  %v2126_v52 = vmul.f32 %v2115_v26, %v6381_v2  ;;  %v7803_v2 = vrot.slane %v6187_v22, 4 }
 0x149   : > { %v6542_v31 = vpop.permute.xlu1 %3280  ;;  %v6571_v9 = vor.u32 %v4988_v8, %v4987_v21  ;;  %v7804_v26 = vld [vmem:[#allocation5_spill] sm:$0xff] }
 0x14a   : > { %v6547_v60 = vpop.permute.xlu0 %3739  ;;  %v2373_v1 = vsel %vm258_vm0, %v2366_v43, %v7803_v2  ;;  %v2127_v43 = vmul.f32 %v6515_v29, %v2117_v46  ;;  %v2206_v29 = vld [vmem:[%s5767_s18 + $0x4] sm:$0xff] }
 0x14b   : > { %7800 = vst [vmem:[#allocation14_spill] sm:$0xff] %v6547_v60  ;;  %1867 = vrot.lane.b32.xlu1 %v5202_v55, %s5340_s13  ;;  %7801 = vst [vmem:[#allocation19_spill] sm:$0xff] %v6571_v9  ;;  %v7725_v55 = vrot.slane %v6130_v11, 4  ;;  %v2222_v21 = vrot.slane %v6571_v9, %v7804_v26  ;;  %v2374_v8 = vsel %vm7726_vm15, %v2373_v1, %v6187_v22 }
 0x14c   : > { %1865 = vrot.lane.b32.xlu0 %v5201_v25, %s5340_s13  ;;  %v2370_v25 = vsel %vm7726_vm15, %v2365_v27, %v6168_v34  ;;  %v2218_v34 = vrot.slane %v6571_v9, %v5391_v10  ;;  %v2372_v10 = vsel %vm7726_vm15, %v2371_v5, %v6171_v0  ;;  %v2226_v0 = vrot.slane %v6571_v9, %v5399_v14 }
 0x14d   : > { %v6574_v42 = vpop.permute.xlu1 %3284  ;;  %v2525_v27 = vsel %vm258_vm0, %v2518_v17, %v7725_v55  ;;  %v2382_v40 = vmul.f32 %v6563_v12, %v2370_v25  ;;  %v2543_v17 = vcombine.high %v2534_v54, %v2534_v54  ;;  %v2230_v57 = vrot.slane %v6571_v9, %v5401_v15  ;;  %v2207_v55 = vld [vmem:[%s5767_s18 + $0xc] sm:$0xff] }
 0x14e   : > { %7802 = vst [vmem:[#allocation25_spill] sm:$0xff] %v6574_v42  ;;  %v6584_v41 = vpop.permute.xlu0 %3282  ;;  %v2526_v7 = vsel %vm7753_vm13, %v2525_v27, %v6130_v11  ;;  %v2383_v46 = vmul.f32 %v6578_v32, %v2372_v10  ;;  %v2384_v1 = vmul.f32 %v6617_v36, %v2374_v8  ;;  %v5211_v26 = vpack.c.bf16 %v2134_v58, %v2125_v39 }
 0x14f   : > { %2022 = vrot.lane.b32.xlu1 %v2017_v24, %s5336_s10  ;;  %v2247_v24 = vcombine.low %v2218_v34, %v2222_v21  ;;  %v2391_v25 = vcombine.high %v2382_v40, %v2382_v40  ;;  %v2674_v34 = vrot.slane %v6436_v37, 4  ;;  %v2827_v14 = vrot.slane %v6212_v33, 4 }
 0x150   : > { %1869 = vrot.lane.b32.xlu0 %v5203_v30, %s5340_s13  ;;  %v2135_v30 = vcombine.high %v2126_v52, %v2126_v52  ;;  %v2675_v27 = vrot.slane %v6468_v16, 4  ;;  %vm1729_vm15 = vcmask 72704   ;;  %v2536_v39 = vmul.f32 %v6617_v36, %v2526_v7 }
 0x151   : > { %v6604_v13 = vpop.permute.xlu1 %3587  ;;  %v2255_v10 = vmul.f32 %v2247_v24, %v2206_v29  ;;  %v5220_v58 = vpack.c.bf16 %v2391_v25, %v2382_v40  ;;  %v2392_v8 = vcombine.high %v2383_v46, %v2383_v46  ;;  %v2393_v9 = vcombine.high %v2384_v1, %v2384_v1 }
 0x152   : > { %v6611_v62 = vpop.permute.xlu0 %3585  ;;  %v5212_v2 = vpack.c.bf16 %v2135_v30, %v2126_v52  ;;  %v2826_v52 = vrot.slane %v6194_v47, 4  ;;  %v2248_v30 = vcombine.low %v2226_v0, %v2230_v57  ;;  %v7733_v11 = vrot.slane %v6214_v59, 4 }
 0x153   : > { %2026 = vrot.lane.b32.xlu1 %v2019_v63, %s5336_s10  ;;  %v2544_v63 = vcombine.high %v2535_v19, %v2535_v19  ;;  %v2263_v15 = vcombine.high %v2255_v10, %v2255_v10  ;;  %v2679_v29 = vsel %vm1881_vm14, %v2674_v34, %v6436_v37  ;;  %v5225_v45 = vpack.c.bf16 %v2543_v17, %v2534_v54 }
 0x154   : > { %2024 = vrot.lane.b32.xlu0 %v2018_v23, %s5336_s10  ;;  %v2136_v23 = vcombine.high %v2127_v43, %v2127_v43  ;;  %v2832_v7 = vsel %vm258_vm0, %v2826_v52, %v2827_v14  ;;  %v7806_v40 = vrot.slane %v6463_v28, 4  ;;  %v2545_v57 = vcombine.high %v2536_v39, %v2536_v39 }
 0x155   : > { %v6626_v5 = vpop.permute.xlu1 %4040  ;;  %v5216_v37 = vpack.c.bf16 %v2263_v15, %v2255_v10  ;;  %v2691_v54 = vmul.f32 %v2679_v29, %v6563_v12  ;;  %v5222_v17 = vpack.c.bf16 %v2393_v9, %v2384_v1  ;;  %v7807_v29 = vld [vmem:[#allocation24_spill] sm:$0xff] }
 0x156   : > { %v6630_v21 = vpop.permute.xlu0 %3589  ;;  %v5213_v22 = vpack.c.bf16 %v2136_v23, %v2127_v43  ;;  %v2682_v0 = vsel %vm258_vm0, %v2675_v27, %v7806_v40  ;;  %v2680_v43 = vsel %vm258_vm0, %v2674_v34, %v2675_v27  ;;  %v5221_v23 = vpack.c.bf16 %v2392_v8, %v2383_v46  ;;  %v6669_v46 = vld [vmem:[%s5767_s18 + $0xc] sm:$0xff] }
 0x157   : > { %7805 = vst [vmem:[#allocation5_spill] sm:$0xff] %v6630_v21  ;;  %2176 = vrot.lane.b32.xlu1 %v5212_v2, %s5338_s5  ;;  %v2256_v2 = vmul.f32 %v2248_v30, %v2207_v55  ;;  %v2831_v55 = vsel %vm1729_vm15, %v2826_v52, %v6194_v47  ;;  %v2834_v34 = vsel %vm258_vm0, %v2827_v14, %v7733_v11  ;;  %v2299_v47 = vrot.slane %v5216_v37, 6 }
 0x158   : > { %2174 = vrot.lane.b32.xlu0 %v5211_v26, %s5338_s5  ;;  %v5226_v26 = vpack.c.bf16 %v2544_v63, %v2535_v19  ;;  %v2833_v63 = vsel %vm1729_vm15, %v2832_v7, %v6212_v33  ;;  %v2583_v27 = vrot.slane %v5225_v45, 6  ;;  %v2681_v10 = vsel %vm1881_vm14, %v2680_v43, %v6468_v16 }
 0x159   : > { %v6640_v35 = vpop.permute.xlu1 %4044  ;;  %v2264_v25 = vcombine.high %v2256_v2, %v2256_v2  ;;  %v2843_v33 = vmul.f32 %v2831_v55, %v6563_v12  ;;  %v5227_v1 = vpack.c.bf16 %v2545_v57, %v2536_v39  ;;  %2307 = vst [vmem:[#allocation2 + $0xc0] sm:$0xcc] %v2299_v47  ;;  %v2835_v52 = vsel %vm1729_vm15, %v2834_v34, %v6214_v59 }
 0x15a   : > { %v6645_v24 = vpop.permute.xlu0 %4042  ;;  %v2584_v9 = vrot.slane %v5226_v26, 6  ;;  %v2700_v30 = vcombine.high %v2691_v54, %v2691_v54  ;;  %v2844_v16 = vmul.f32 %v2833_v63, %v6669_v46  ;;  %v3133_v8 = vrot.slane %v6236_v56, 4 }
 0x15b   : > { %2431 = vrot.lane.b32.xlu1 %v5220_v58, %s5337_s21  ;;  %v5217_v14 = vpack.c.bf16 %v2264_v25, %v2256_v2  ;;  %v3134_v26 = vrot.slane %v7807_v29, 4  ;;  %v2692_v7 = vmul.f32 %v2681_v10, %v6578_v32  ;;  %v2983_v39 = vrot.slane %v6483_v53, 4 }
 0x15c   : > { %2178 = vrot.lane.b32.xlu0 %v5213_v22, %s5338_s5  ;;  %v2683_v22 = vsel %vm1881_vm14, %v2682_v0, %v6463_v28  ;;  %v7734_v2 = vrot.slane %v6502_v44, 4  ;;  %v2852_v43 = vcombine.high %v2843_v33, %v2843_v33  ;;  %v2984_v57 = vrot.slane %v6480_v6, 4 }
 0x15d   : > { %v6657_v19 = vpop.permute.xlu1 %3892  ;;  %v2693_v45 = vmul.f32 %v6617_v36, %v2683_v22  ;;  %v2300_v0 = vrot.slane %v5217_v14, 6  ;;  %v2585_v37 = vrot.slane %v5227_v1, 6  ;;  %v2845_v25 = vmul.f32 %v2835_v52, %v6617_v36 }
 0x15e   : > { %v6666_v15 = vpop.permute.xlu0 %3890  ;;  %v2853_v63 = vcombine.high %v2844_v16, %v2844_v16  ;;  %v3138_v34 = vsel %vm258_vm0, %v3133_v8, %v3134_v26  ;;  %v7735_v22 = vrot.slane %v6443_v51, 4  ;;  %v2701_v47 = vcombine.high %v2692_v7, %v2692_v7 }
 0x15f   : > { %2435 = vrot.lane.b32.xlu1 %v5222_v17, %s5337_s21  ;;  %v2702_v17 = vcombine.high %v2693_v45, %v2693_v45  ;;  %2308 = vst [vmem:[#allocation2 + $0xc8] sm:$0xcc] %v2300_v0  ;;  %v2987_v10 = vsel %vm256_vm1, %v2983_v39, %v6483_v53  ;;  %v3137_v1 = vsel %vm410_vm3, %v3133_v8, %v6236_v56 }
 0x160   : > { %2433 = vrot.lane.b32.xlu0 %v5221_v23, %s5337_s21  ;;  %v5230_v23 = vpack.c.bf16 %v2700_v30, %v2691_v54  ;;  %v5235_v54 = vpack.c.bf16 %v2852_v43, %v2843_v33  ;;  %v2988_v14 = vsel %vm258_vm0, %v2983_v39, %v2984_v57  ;;  %v3139_v52 = vsel %vm410_vm3, %v3138_v34, %v7807_v29 }
 0x161   : > { %v6678_v58 = vpop.permute.xlu1 %4195  ;;  %v2999_v53 = vmul.f32 %v2987_v10, %v6563_v12  ;;  %v5232_v0 = vpack.c.bf16 %v2702_v17, %v2693_v45  ;;  %v5236_v11 = vpack.c.bf16 %v2853_v63, %v2844_v16  ;;  %v3140_v33 = vsel %vm258_vm0, %v3134_v26, %v7735_v22 }
 0x162   : > { %v6686_v40 = vpop.permute.xlu0 %3894  ;;  %v5231_v43 = vpack.c.bf16 %v2701_v47, %v2692_v7  ;;  %v3149_v39 = vmul.f32 %v3137_v1, %v6563_v12  ;;  %v2989_v29 = vsel %vm256_vm1, %v2988_v14, %v6480_v6  ;;  %v3150_v45 = vmul.f32 %v3139_v52, %v6578_v32 }
 0x163   : > { %2590 = vrot.lane.b32.xlu1 %v2584_v9, %s5333_s8  ;;  %v3141_v16 = vsel %vm410_vm3, %v3140_v33, %v6443_v51  ;;  %v3008_v26 = vcombine.high %v2999_v53, %v2999_v53  ;;  %v3288_v63 = vrot.slane %v6542_v31, 4  ;;  %v3000_v34 = vmul.f32 %v2989_v29, %v6669_v46 }
 0x164   : > { %2588 = vrot.lane.b32.xlu0 %v2583_v27, %s5333_s8  ;;  %v2990_v27 = vsel %vm258_vm0, %v2984_v57, %v7734_v2  ;;  %v2854_v2 = vcombine.high %v2845_v25, %v2845_v25  ;;  %v3158_v47 = vcombine.high %v3149_v39, %v3149_v39  ;;  %v3439_v10 = vrot.slane %v6522_v18, 4 }
 0x165   : > { %v6693_v55 = vpop.permute.xlu1 %4199  ;;  %v2991_v56 = vsel %vm256_vm1, %v2990_v27, %v6502_v44  ;;  %v7736_v27 = vrot.slane %v6574_v42, 4  ;;  %v3289_v1 = vrot.slane %v6584_v41, 4  ;;  %v3159_v14 = vcombine.high %v3150_v45, %v3150_v45 }
 0x166   : > { %v6699_v9 = vpop.permute.xlu0 %4197  ;;  %v3001_v7 = vmul.f32 %v2991_v56, %v6617_v36  ;;  %v5237_v17 = vpack.c.bf16 %v2854_v2, %v2845_v25  ;;  %v5240_v2 = vpack.c.bf16 %v3008_v26, %v2999_v53  ;;  %v3438_v25 = vrot.slane %v6496_v38, 4 }
 0x167   : > { %2740 = vrot.lane.b32.xlu1 %v5230_v23, %s5335_s24  ;;  %v2892_v23 = vrot.slane %v5235_v54, 6  ;;  %v3292_v33 = vsel %vm567_vm2, %v3288_v63, %v6542_v31  ;;  %v3009_v56 = vcombine.high %v3000_v34, %v3000_v34  ;;  %v5245_v29 = vpack.c.bf16 %v3158_v47, %v3149_v39 }
 0x168   : > { %2592 = vrot.lane.b32.xlu0 %v2585_v37, %s5333_s8  ;;  %v2893_v37 = vrot.slane %v5236_v11, 6  ;;  %v3151_v11 = vmul.f32 %v3141_v16, %v6617_v36  ;;  %v3010_v54 = vcombine.high %v3001_v7, %v3001_v7  ;;  %v3295_v16 = vsel %vm258_vm0, %v3289_v1, %v7736_v27 }
 0x169   : > { %v6712_v30 = vpop.permute.xlu1 %1331  ;;  %v5246_v53 = vpack.c.bf16 %v3159_v14, %v3150_v45  ;;  %v3304_v39 = vmul.f32 %v3292_v33, %v6563_v12  ;;  %v3442_v22 = vsel %vm719_vm4, %v3438_v25, %v6496_v38  ;;  %v3296_v45 = vsel %vm567_vm2, %v3295_v16, %v6574_v42 }
 0x16a   : > { %v6719_v8 = vpop.permute.xlu0 %1022  ;;  %v3160_v26 = vcombine.high %v3151_v11, %v3151_v11  ;;  %v5242_v31 = vpack.c.bf16 %v3010_v54, %v3001_v7  ;;  %v3198_v7 = vrot.slane %v5245_v29, 6  ;;  %v3744_v29 = vrot.slane %v6531_v4, 4 }
 0x16b   : > { %2744 = vrot.lane.b32.xlu1 %v5232_v0, %s5335_s24  ;;  %v2894_v0 = vrot.slane %v5237_v17, 6  ;;  %v3293_v17 = vsel %vm258_vm0, %v3288_v63, %v3289_v1  ;;  %v5241_v63 = vpack.c.bf16 %v3009_v56, %v3000_v34  ;;  %v3199_v54 = vrot.slane %v5246_v53, 6 }
 0x16c   : > { %2742 = vrot.lane.b32.xlu0 %v5231_v43, %s5335_s24  ;;  %v3294_v1 = vsel %vm567_vm2, %v3293_v17, %v6584_v41  ;;  %v3313_v33 = vcombine.high %v3304_v39, %v3304_v39  ;;  %v3594_v17 = vrot.slane %v6604_v13, 4 }
 0x16d   : > { %v6730_v57 = vpop.permute.xlu1 %1179 }
 0x16e   : > { %v6733_v6 = vpop.permute.xlu0 %870 }
 0x16f   : > { %2899 = vrot.lane.b32.xlu1 %v2893_v37, %s5332_s27  ;;  %v3443_v37 = vsel %vm258_vm0, %v3438_v25, %v3439_v10  ;;  %v3454_v25 = vmul.f32 %v3442_v22, %v6563_v12 }
 0x170   : > { %2897 = vrot.lane.b32.xlu0 %v2892_v23, %s5332_s27  ;;  %v7737_v23 = vrot.slane %v6518_v48, 4 }
 0x171   : > { %v6743_v52 = vpop.permute.xlu1 %1949 }
 0x172   : > { %v6747_v43 = vpop.permute.xlu0 %1640  ;;  %v3445_v38 = vsel %vm258_vm0, %v3439_v10, %v7737_v23  ;;  %v3593_v10 = vrot.slane %v6611_v62, 4 }
 0x173   : > { %3048 = vrot.lane.b32.xlu1 %v5240_v2, %s5334_s17  ;;  %v3444_v2 = vsel %vm719_vm4, %v3443_v37, %v6522_v18  ;;  %v6776_v18 = vld [vmem:[%s5767_s18 + $0x14] sm:$0xff]  ;;  %v3305_v37 = vmul.f32 %v3294_v1, %v6578_v32  ;;  %v3446_v22 = vsel %vm719_vm4, %v3445_v38, %v6518_v48 }
 0x174   : > { %2901 = vrot.lane.b32.xlu0 %v2894_v0, %s5332_s27  ;;  %v5247_v0 = vpack.c.bf16 %v3160_v26, %v3151_v11  ;;  %v3455_v34 = vmul.f32 %v3444_v2, %v6578_v32  ;;  %v3306_v41 = vmul.f32 %v3296_v45, %v6776_v18  ;;  %v3743_v11 = vrot.slane %v6534_v3, 4 }
 0x175   : > { %v6758_v47 = vpop.permute.xlu1 %1797  ;;  %v5250_v45 = vpack.c.bf16 %v3313_v33, %v3304_v39  ;;  %v3314_v23 = vcombine.high %v3305_v37, %v3305_v37  ;;  %v3597_v38 = vsel %vm876_vm7, %v3593_v10, %v6611_v62  ;;  %v3598_v42 = vsel %vm258_vm0, %v3593_v10, %v3594_v17 }
 0x176   : > { %v6766_v14 = vpop.permute.xlu0 %1488  ;;  %v3200_v26 = vrot.slane %v5247_v0, 6  ;;  %v3464_v2 = vcombine.high %v3455_v34, %v3455_v34  ;;  %v3315_v1 = vcombine.high %v3306_v41, %v3306_v41  ;;  %v3748_v27 = vsel %vm258_vm0, %v3743_v11, %v3744_v29 }
 0x177   : > { %3052 = vrot.lane.b32.xlu1 %v5242_v31, %s5334_s17  ;;  %v3463_v31 = vcombine.high %v3454_v25, %v3454_v25  ;;  %v7808_v0 = vrot.slane %v6630_v21, 4  ;;  %v3747_v39 = vsel %vm802_vm5, %v3743_v11, %v6534_v3  ;;  %v3749_v48 = vsel %vm802_vm5, %v3748_v27, %v6531_v4 }
 0x178   : > { %3050 = vrot.lane.b32.xlu0 %v5241_v63, %s5334_s17  ;;  %v5256_v62 = vpack.c.bf16 %v3464_v2, %v3455_v34  ;;  %v3599_v10 = vsel %vm876_vm7, %v3598_v42, %v6604_v13  ;;  %v3759_v4 = vmul.f32 %v3747_v39, %v6563_v12  ;;  %v7810_v27 = vrot.slane %v6547_v60, 4 }
 0x179   : > { %v6780_v56 = vpop.permute.xlu1 %2106  ;;  %v5255_v51 = vpack.c.bf16 %v3463_v31, %v3454_v25  ;;  %v3898_v42 = vrot.slane %v6666_v15, 4  ;;  %v3610_v2 = vmul.f32 %v3599_v10, %v6669_v46  ;;  %v3899_v39 = vrot.slane %v6657_v19, 4 }
 0x17a   : > { %v6787_v16 = vpop.permute.xlu0 %2515  ;;  %v3750_v34 = vsel %vm258_vm0, %v3744_v29, %v7810_v27  ;;  %v3504_v25 = vrot.slane %v5256_v62, 6  ;;  %v4048_v62 = vrot.slane %v6626_v5, 4  ;;  %v3844_v27 = vld [vmem:[%s5767_s18 + $0x4] sm:$0xff] }
 0x17b   : > { %3205 = vrot.lane.b32.xlu1 %v3199_v54, %s5329_s6  ;;  %v3456_v54 = vmul.f32 %v3446_v22, %v6776_v18  ;;  %v3609_v22 = vmul.f32 %v3597_v38, %v6563_v12  ;;  %v3751_v29 = vsel %vm802_vm5, %v3750_v34, %v6547_v60  ;;  %v7813_v38 = vld [vmem:[#allocation8_spill] sm:$0xff]  ;;  %v3902_v34 = vsel %vm7750_vm9, %v3898_v42, %v6666_v15  ;;  %v7817_v60 = vld [vmem:[#allocation9_spill] sm:$0xff] }
 0x17c   : > { %3203 = vrot.lane.b32.xlu0 %v3198_v7, %s5329_s6  ;;  %v3600_v7 = vsel %vm258_vm0, %v3594_v17, %v7808_v0  ;;  %v5252_v0 = vpack.c.bf16 %v3315_v1, %v3306_v41  ;;  %v3503_v17 = vrot.slane %v5255_v51, 6  ;;  %v3768_v51 = vcombine.high %v3759_v4, %v3759_v4 }
 0x17d   : > { %v6795_v63 = vpop.permute.xlu1 %2824  ;;  %v3601_v3 = vsel %vm876_vm7, %v3600_v7, %v6630_v21  ;;  %v3465_v33 = vcombine.high %v3456_v54, %v3456_v54  ;;  %v3618_v41 = vcombine.high %v3609_v22, %v3609_v22  ;;  %v718_v7 = vrot.slane %v7813_v38, 4 }
 0x17e   : > { %v6800_v53 = vpop.permute.xlu0 %2363  ;;  %v3761_v10 = vmul.f32 %v3751_v29, %v6617_v36  ;;  %v3903_v15 = vsel %vm258_vm0, %v3898_v42, %v3899_v39 }
 0x17f   : > { %3353 = vrot.lane.b32.xlu1 %v5250_v45, %s5331_s19  ;;  %v5251_v45 = vpack.c.bf16 %v3314_v23, %v3305_v37  ;;  %v3760_v23 = vmul.f32 %v3749_v48, %v6669_v46  ;;  %v3611_v37 = vmul.f32 %v3601_v3, %v6617_v36  ;;  %v5257_v31 = vpack.c.bf16 %v3465_v33, %v3456_v54 }
 0x180   : > { %3207 = vrot.lane.b32.xlu0 %v3200_v26, %s5329_s6  ;;  %v4049_v48 = vrot.slane %v6645_v24, 4  ;;  %v5260_v33 = vpack.c.bf16 %v3618_v41, %v3609_v22  ;;  %v7816_v22 = vrot.slane %v6686_v40, 4 }
 0x181   : > { %v6815_v44 = vpop.permute.xlu1 %2672  ;;  %v3769_v54 = vcombine.high %v3760_v23, %v3760_v23  ;;  %v3505_v1 = vrot.slane %v5257_v31, 6 }
 0x182   : > { %v6819_v11 = vpop.permute.xlu0 %3131  ;;  %v4053_v21 = vsel %vm258_vm0, %v4048_v62, %v4049_v48  ;;  %v3905_v41 = vsel %vm258_vm0, %v3899_v39, %v7816_v22  ;;  %v6892_v39 = vld [vmem:[%s5767_s18 + $0x18] sm:$0xff] }
 0x183   : > { %7809 = vst [vmem:[#allocation24_spill] sm:$0xff] %v6819_v11  ;;  %3357 = vrot.lane.b32.xlu1 %v5252_v0, %s5331_s19  ;;  %v3620_v0 = vcombine.high %v3611_v37, %v3611_v37  ;;  %v5266_v31 = vpack.c.bf16 %v3769_v54, %v3760_v23  ;;  %v7819_v11 = vrot.slane %v6640_v35, 4  ;;  %v3906_v42 = vsel %vm7750_vm9, %v3905_v41, %v6686_v40 }
 0x184   : > { %3355 = vrot.lane.b32.xlu0 %v5251_v45, %s5331_s19  ;;  %v665_v45 = vld [vmem:[%s5767_s18 + $0x20] sm:$0xf] }
 0x185   : > { %v6831_v26 = vpop.permute.xlu1 %3436  ;;  %v4055_v22 = vsel %vm258_vm0, %v4049_v48, %v7819_v11 }
 0x186   : > { %7811 = vst [vmem:[#allocation26_spill] sm:$0xff] %v6831_v26  ;;  %v6834_v13 = vpop.permute.xlu0 %2981  ;;  %v5265_v26 = vpack.c.bf16 %v3768_v51, %v3759_v4  ;;  %v4054_v4 = vsel %vm493_vm6, %v4053_v21, %v6645_v24  ;;  %v4056_v21 = vsel %vm493_vm6, %v4055_v22, %v6640_v35  ;;  %v3809_v24 = vrot.slane %v5266_v31, 6 }
 0x187   : > { %7812 = vst [vmem:[#allocation27_spill] sm:$0xff] %v6834_v13  ;;  %3510 = vrot.lane.b32.xlu1 %v3504_v25, %s5328_s26  ;;  %v5262_v13 = vpack.c.bf16 %v3620_v0, %v3611_v37  ;;  %v3904_v37 = vsel %vm7750_vm9, %v3903_v15, %v6657_v19  ;;  %v4065_v51 = vmul.f32 %v4054_v4, %v6578_v32 }
 0x188   : > { %3508 = vrot.lane.b32.xlu0 %v3503_v17, %s5328_s26  ;;  %v3619_v17 = vcombine.high %v3610_v2, %v3610_v2  ;;  %v3916_v19 = vmul.f32 %v3906_v42, %v6617_v36  ;;  %v3915_v0 = vmul.f32 %v3904_v37, %v6669_v46  ;;  %v4066_v36 = vmul.f32 %v4056_v21, %v6776_v18 }
 0x189   : > { %v6847_v3 = vpop.permute.xlu1 %3286 }
 0x18a   : > { %7814 = vst [vmem:[#allocation8_spill] sm:$0xff] %v6847_v3  ;;  %v6853_v25 = vpop.permute.xlu0 %3741  ;;  %v7818_v3 = vrot.slane %v7817_v60, 4  ;;  %v3770_v60 = vcombine.high %v3761_v10, %v3761_v10  ;;  %v3925_v41 = vcombine.high %v3916_v19, %v3916_v19  ;;  %v3924_v22 = vcombine.high %v3915_v0, %v3915_v0 }
 0x18b   : > { %7815 = vst [vmem:[#allocation28_spill] sm:$0xff] %v6853_v25  ;;  %3658 = vrot.lane.b32.xlu1 %v5260_v33, %s5330_s12  ;;  %v4052_v25 = vsel %vm493_vm6, %v4048_v62, %v6626_v5  ;;  %v3914_v33 = vmul.f32 %v3902_v34, %v3844_v27  ;;  %v736_v5 = vmul.f32 %v718_v7, %v665_v45  ;;  %v4205_v45 = vrot.slane %v6693_v55, 4 }
 0x18c   : > { %v725_v29 = vsel %vm258_vm0, %v7818_v3, %v718_v7  ;;  %3512 = vrot.lane.b32.xlu0 %v3505_v1, %s5328_s26  ;;  %v5261_v1 = vpack.c.bf16 %v3619_v17, %v3610_v2  ;;  %v4064_v48 = vmul.f32 %v4052_v25, %v6563_v12  ;;  %v4203_v7 = vrot.slane %v6678_v58, 4 }
 0x18d   : > { %v6871_v28 = vpop.permute.xlu1 %4046  ;;  %v726_v11 = vsel %vm719_vm4, %v725_v29, %v7813_v38  ;;  %v3923_v2 = vcombine.high %v3914_v33, %v3914_v33  ;;  %v3808_v38 = vrot.slane %v5265_v26, 6  ;;  %v5267_v54 = vpack.c.bf16 %v3770_v60, %v3761_v10 }
 0x18e   : > { %v6877_v23 = vpop.permute.xlu0 %3591  ;;  %v4204_v12 = vrot.slane %v6699_v9, 4  ;;  %v5170_v3 = vpack.c.bf16 %v736_v5, %v736_v5  ;;  %v4073_v34 = vcombine.high %v4064_v48, %v4064_v48  ;;  %v735_v25 = vmul.f32 %v6892_v39, %v726_v11 }
 0x18f   : > { %3662 = vrot.lane.b32.xlu1 %v5262_v13, %s5330_s12  ;;  %v4074_v26 = vcombine.high %v4065_v51, %v4065_v51  ;;  %v5270_v10 = vpack.c.bf16 %v3923_v2, %v3914_v33  ;;  %v4207_v17 = vsel %vm336_vm8, %v4203_v7, %v6678_v58  ;;  %v3810_v46 = vrot.slane %v5267_v54, 6 }
 0x190   : > { %3660 = vrot.lane.b32.xlu0 %v5261_v1, %s5330_s12  ;;  %v4208_v15 = vsel %vm258_vm0, %v4203_v7, %v4204_v12  ;;  %v4210_v60 = vsel %vm258_vm0, %v4204_v12, %v4205_v45  ;;  %v6914_v4 = vrot.slane %v5170_v3, 6  ;;  %v4219_v33 = vmul.f32 %v4207_v17, %v3844_v27 }
 0x191   : > { %v6894_v13 = vpop.permute.xlu1 %4201  ;;  %v4075_v58 = vcombine.high %v4066_v36, %v4066_v36  ;;  %v744_v42 = vcombine.high %v735_v25, %v735_v25  ;;  %v5275_v1 = vpack.c.bf16 %v4073_v34, %v4064_v48  ;;  %v5276_v5 = vpack.c.bf16 %v4074_v26, %v4065_v51 }
 0x192   : > { %v6897_v62 = vpop.permute.xlu0 %3896  ;;  %v5272_v37 = vpack.c.bf16 %v3925_v41, %v3916_v19  ;;  %v4209_v11 = vsel %vm336_vm8, %v4208_v15, %v6699_v9  ;;  %v1336_v2 = vrot.slane %v6712_v30, 4  ;;  %v1027_v7 = vrot.slane %v6719_v8, 4 }
 0x193   : > { %3815 = vrot.lane.b32.xlu1 %v3809_v24, %s5327_s20  ;;  %v4211_v24 = vsel %vm336_vm8, %v4210_v60, %v6693_v55  ;;  %v5271_v27 = vpack.c.bf16 %v3924_v22, %v3915_v0  ;;  %v796_v54 = vrot.slane %v6404_v61, 4  ;;  %v875_v12 = vrot.slane %v6733_v6, 4  ;;  %v7821_v22 = vld [vmem:[#allocation10_spill] sm:$0xff] }
 0x194   : > { %3813 = vrot.lane.b32.xlu0 %v3808_v38, %s5327_s20  ;;  %v4228_v9 = vcombine.high %v4219_v33, %v4219_v33  ;;  %v4220_v19 = vmul.f32 %v4209_v11, %v6578_v32  ;;  %v5277_v3 = vpack.c.bf16 %v4075_v58, %v4066_v36  ;;  %v6929_v34 = vpack.c.bf16 %v744_v42, %v735_v25 }
 0x195   : > { %v6907_v29 = vpop.permute.xlu1 %790  ;;  %v4114_v26 = vrot.slane %v5276_v5, 6  ;;  %v4221_v41 = vmul.f32 %v4211_v24, %v6776_v18  ;;  %v7820_v15 = vrot.slane %v5880_v50, 4  ;;  %v7822_v60 = vrot.slane %v7821_v22, 4 }
 0x196   : > { %v789_v31 = vpop.permute.xlu0 %788  ;;  %v798_v48 = vrot.slane %v6907_v29, 4  ;;  %v7823_v18 = vrot.slane %v5906_v49, 4  ;;  %v4229_v11 = vcombine.high %v4220_v19, %v4220_v19  ;;  %v4115_v24 = vrot.slane %v5277_v3, 6 }
 0x197   : > { %3963 = vrot.lane.b32.xlu1 %v5270_v10, %s5326_s9  ;;  %v797_v51 = vrot.slane %v789_v31, 4  ;;  %v1343_v32 = vsel %vm258_vm0, %v7820_v15, %v1336_v2  ;;  %v1034_v36 = vsel %vm258_vm0, %v7822_v60, %v1027_v7 }
 0x198   : > { %3817 = vrot.lane.b32.xlu0 %v3810_v46, %s5327_s20  ;;  %v4113_v46 = vrot.slane %v5275_v1, 6  ;;  %v882_v42 = vsel %vm258_vm0, %v7823_v18, %v875_v12  ;;  %v1344_v49 = vsel %vm493_vm6, %v1343_v32, %v6712_v30 }
 0x199   : > { %v941_v21 = vpop.permute.xlu1 %940  ;;  %v801_v0 = vsel %vm258_vm0, %v796_v54, %v797_v51  ;;  %v804_v10 = vsel %vm258_vm0, %v797_v51, %v798_v48  ;;  %v974_v54 = vld [vmem:[%s5767_s18 + $0x20] sm:$0xf]  ;;  %v1353_v22 = vmul.f32 %v1344_v49, %v6892_v39 }
 0x19a   : > { %v939_v38 = vpop.permute.xlu0 %938  ;;  %v803_v25 = vsel %vm802_vm5, %v6404_v61, %v801_v0  ;;  %v805_v50 = vsel %vm802_vm5, %v789_v31, %v804_v10  ;;  %v949_v1 = vrot.slane %v941_v21, 4  ;;  %v1035_v31 = vsel %vm802_vm5, %v1034_v36, %v6719_v8 }
 0x19b   : > { %3967 = vrot.lane.b32.xlu1 %v5272_v37, %s5326_s9  ;;  %814 = vst [vmem:[#allocation2 + $0x20] sm:$0xcc] %v803_v25  ;;  %v948_v5 = vrot.slane %v939_v38, 4  ;;  %v5280_v37 = vpack.c.bf16 %v4228_v9, %v4219_v33  ;;  %815 = vst [vmem:[#allocation2 + $0x28] sm:$0xcc] %v805_v50  ;;  %v4230_v33 = vcombine.high %v4221_v41, %v4221_v41  ;;  %v1184_v9 = vrot.slane %v6730_v57, 4 }
 0x19c   : > { %3965 = vrot.lane.b32.xlu0 %v5271_v27, %s5326_s9  ;;  %v1283_v27 = vld [vmem:[%s5767_s18 + $0x20] sm:$0xf]  ;;  %v6978_v36 = vmul.f32 %v1027_v7, %v974_v54  ;;  %v5281_v25 = vpack.c.bf16 %v4229_v11, %v4220_v19  ;;  %v4301_v54 = vld [vmem:[#allocation2 + $0x8] sm:$0xff] }
 0x19d   : > { %v1096_v17 = vpop.permute.xlu1 %1095  ;;  %v953_v51 = vsel %vm258_vm0, %v948_v5, %v949_v1  ;;  %v6975_v60 = vmul.f32 %v1336_v2, %v1283_v27  ;;  %v5282_v50 = vpack.c.bf16 %v4230_v33, %v4221_v41  ;;  %v7824_v2 = vrot.slane %v5937_v20, 4  ;;  %v822_v7 = vld [vmem:[%s5767_s18 + $0x20] sm:$0xf] }
 0x19e   : > { %v6944_v58 = vpop.permute.xlu0 %942  ;;  %v955_v3 = vsel %vm876_vm7, %v939_v38, %v953_v51  ;;  %v1044_v38 = vmul.f32 %v6892_v39, %v1035_v31  ;;  %v4300_v11 = vld [vmem:[#allocation2] sm:$0xff]  ;;  %v1362_v33 = vcombine.high %v1353_v22, %v1353_v22 }
 0x19f   : > { %4120 = vrot.lane.b32.xlu1 %v4114_v26, %s5325_s30  ;;  %v950_v61 = vrot.slane %v6944_v58, 4  ;;  %v883_v26 = vsel %vm876_vm7, %v882_v42, %v6733_v6  ;;  %966 = vst [vmem:[#allocation2 + $0x40] sm:$0x33] %v955_v3  ;;  %v5190_v6 = vpack.c.bf16 %v6975_v60, %v6975_v60 }
 0x1a0   : > { %4118 = vrot.lane.b32.xlu0 %v4113_v46, %s5325_s30  ;;  %v1105_v46 = vrot.slane %v1096_v17, 4  ;;  %v892_v5 = vmul.f32 %v6892_v39, %v883_v26  ;;  %v1053_v26 = vcombine.high %v1044_v38, %v1044_v38 }
 0x1a1   : > { %v6962_v0 = vpop.permute.xlu1 %1099  ;;  %v956_v30 = vsel %vm258_vm0, %v949_v1, %v950_v61  ;;  %v1191_v1 = vsel %vm258_vm0, %v7824_v2, %v1184_v9 }
 0x1a2   : > { %v1098_v10 = vpop.permute.xlu0 %1097  ;;  %v957_v8 = vsel %vm876_vm7, %v941_v21, %v956_v30  ;;  %v1107_v15 = vrot.slane %v6962_v0, 4  ;;  %v4305_v31 = vld [vmem:[#allocation2 + $0x28] sm:$0xff]  ;;  %v1131_v30 = vld [vmem:[%s5767_s18 + $0x20] sm:$0xf] }
 0x1a3   : > { %4268 = vrot.lane.b32.xlu1 %v5280_v37, %s5324_s25  ;;  %v1106_v32 = vrot.slane %v1098_v10, 4  ;;  %967 = vst [vmem:[#allocation2 + $0x48] sm:$0x33] %v957_v8  ;;  %v5087_v3 = vcombine.high %v4301_v54, %v4305_v31  ;;  %v1954_v8 = vrot.slane %v6743_v52, 4 }
 0x1a4   : > { %4122 = vrot.lane.b32.xlu0 %v4115_v24, %s5325_s30  ;;  %v4304_v24 = vld [vmem:[#allocation2 + $0x20] sm:$0xff] }
 0x1a5   : > { %v1110_v21 = vsel %vm258_vm0, %v1105_v46, %v1106_v32  ;;  %v1113_v18 = vsel %vm258_vm0, %v1106_v32, %v1107_v15  ;;  %v1250_v42 = vpop.permute.xlu1 %1249  ;;  %v5085_v49 = vcombine.high %v4300_v11, %v4304_v24  ;;  %v5084_v20 = vcombine.low %v4300_v11, %v4304_v24  ;;  %4704 = vmatprep.subr.bf16.mxu1 %v5087_v3 }
 0x1a6   : > { %v1112_v37 = vsel %vm719_vm4, %v1096_v17, %v1110_v21  ;;  %v1114_v19 = vsel %vm719_vm4, %v1098_v10, %v1113_v18  ;;  %v1248_v27 = vpop.permute.xlu0 %1247  ;;  %v1258_v41 = vrot.slane %v1250_v42, 4  ;;  %v5086_v17 = vcombine.low %v4301_v54, %v4305_v31 }
 0x1a7   : > { %1123 = vst [vmem:[#allocation2 + $0x40] sm:$0xcc] %v1112_v37  ;;  %1124 = vst [vmem:[#allocation2 + $0x48] sm:$0xcc] %v1114_v19  ;;  %4272 = vrot.lane.b32.xlu1 %v5282_v50, %s5324_s25  ;;  %v1257_v51 = vrot.slane %v1248_v27, 4  ;;  %v1192_v10 = vsel %vm7750_vm9, %v1191_v1, %v6730_v57  ;;  %v893_v46 = vmul.f32 %v875_v12, %v822_v7  ;;  %4663 = vmatprep.subr.bf16.mxu0 %v5085_v49  ;;  %v7827_v57 = vld [vmem:[#allocation13_spill] sm:$0xff] }
 0x1a8   : > { %4270 = vrot.lane.b32.xlu0 %v5281_v25, %s5324_s25  ;;  %v901_v18 = vcombine.high %v892_v5, %v892_v5  ;;  %v1645_v50 = vrot.slane %v6747_v43, 4  ;;  %4664 = vmatpush1.bf16.msra.mxu0 %v5084_v20  ;;  %v784_v1 = vrot.slane %v6929_v34, 6  ;;  %v5180_v12 = vpack.c.bf16 %v6978_v36, %v6978_v36 }
 0x1a9   : > { %v1262_v32 = vsel %vm258_vm0, %v1257_v51, %v1258_v41  ;;  %v1405_v21 = vpop.permute.xlu1 %1404  ;;  %4705 = vmatpush1.bf16.msra.mxu1 %v5086_v17  ;;  %v7015_v37 = vpack.c.bf16 %v1362_v33, %v1353_v22  ;;  %v1201_v19 = vmul.f32 %v6892_v39, %v1192_v10  ;;  %v7020_v34 = vmul.f32 %v1184_v9, %v1131_v30  ;;  %v7829_v10 = vld [vmem:[#allocation18_spill] sm:$0xff] }
 0x1aa   : > { %v1264_v25 = vsel %vm567_vm2, %v1248_v27, %v1262_v32  ;;  %v7005_v2 = vpop.permute.xlu0 %1251  ;;  %v1493_v11 = vrot.slane %v6766_v14, 4  ;;  %v5179_v36 = vpack.c.bf16 %v1053_v26, %v1044_v38  ;;  %v5175_v24 = vpack.c.bf16 %v893_v46, %v893_v46  ;;  %v7825_v27 = vld [vmem:[#allocation16_spill] sm:$0xff]  ;;  %v1901_v26 = vld [vmem:[%s5767_s18 + $0x20] sm:$0xf] }
 0x1ab   : > { %1275 = vst [vmem:[#allocation2 + $0x60] sm:$0x33] %v1264_v25  ;;  %794 = vrot.lane.b32.xlu1 %v6914_v4, %s5328_s26  ;;  %v1259_v7 = vrot.slane %v7005_v2, 4  ;;  %v7826_v49 = vrot.slane %v7825_v27, 4  ;;  %v5174_v31 = vpack.c.bf16 %v901_v18, %v892_v5  ;;  %v7828_v9 = vrot.slane %v7827_v57, 4 }
 0x1ac   : > { %792 = vrot.lane.b32.xlu0 %v784_v1, %s5328_s26  ;;  %v1802_v51 = vrot.slane %v6758_v47, 4  ;;  %v1414_v3 = vrot.slane %v1405_v21, 4  ;;  %v1210_v30 = vcombine.high %v1201_v19, %v1201_v19  ;;  %v7830_v46 = vrot.slane %v7829_v10, 4  ;;  %v1592_v25 = vld [vmem:[%s5767_s18 + $0x20] sm:$0xf] }
 0x1ad   : > { %v1961_v4 = vsel %vm258_vm0, %v7826_v49, %v1954_v8  ;;  %v1265_v22 = vsel %vm258_vm0, %v1258_v41, %v1259_v7  ;;  %v7030_v54 = vpop.permute.xlu1 %1408  ;;  %v1652_v20 = vsel %vm258_vm0, %v7828_v9, %v1645_v50  ;;  %v1094_v18 = vrot.slane %v5180_v12, 6 }
 0x1ae   : > { %v1266_v38 = vsel %vm567_vm2, %v1250_v42, %v1265_v22  ;;  %v1407_v33 = vpop.permute.xlu0 %1406  ;;  %v1416_v17 = vrot.slane %v7030_v54, 4  ;;  %v1962_v5 = vsel %vm1955_vm11, %v1961_v4, %v6743_v52  ;;  %v1500_v32 = vsel %vm258_vm0, %v7830_v46, %v1493_v11 }
 0x1af   : > { %1276 = vst [vmem:[#allocation2 + $0x68] sm:$0x33] %v1266_v38  ;;  %946 = vrot.lane.b32.xlu1 %v5175_v24, %s5330_s12  ;;  %v1415_v41 = vrot.slane %v1407_v33, 4  ;;  %v5341_v42 = vmov 0   ;;  %v1653_v1 = vsel %vm1646_vm10, %v1652_v20, %v6747_v43  ;;  %v1093_v49 = vrot.slane %v5179_v36, 6 }
 0x1b0   : > { %944 = vrot.lane.b32.xlu0 %v5174_v31, %s5330_s12  ;;  %4695 = vmatprep.mubr.bf16.mxu0 %v5341_v42  ;;  %v7058_v4 = vmul.f32 %v1954_v8, %v1901_v26  ;;  %v7831_v31 = vld [vmem:[#allocation20_spill] sm:$0xff]  ;;  %v1501_v20 = vsel %vm336_vm8, %v1500_v32, %v6766_v14  ;;  %v1971_v36 = vmul.f32 %v1962_v5, %v6892_v39  ;;  %v1749_v32 = vld [vmem:[%s5767_s18 + $0x20] sm:$0xf]  ;;  %vm7835_vm9 = vcmask 1039360  }
 0x1b1   : > { %v1419_v24 = vsel %vm258_vm0, %v1414_v3, %v1415_v41  ;;  %v1422_v52 = vsel %vm258_vm0, %v1415_v41, %v1416_v17  ;;  %v1559_v27 = vpop.permute.xlu1 %1558  ;;  %4736 = vmatprep.mubr.bf16.mxu1 %v5341_v42  ;;  %5312 = vset.pattern.permute.xlu0 %v5341_v42  ;;  %v7832_v57 = vrot.slane %v7831_v31, 4  ;;  %v5185_v26 = vpack.c.bf16 %v7020_v34, %v7020_v34  ;;  %v1440_v3 = vld [vmem:[%s5767_s18 + $0x20] sm:$0xf] }
 0x1b2   : > { %v1421_v12 = vsel %vm410_vm3, %v1405_v21, %v1419_v24  ;;  %v1423_v22 = vsel %vm410_vm3, %v1407_v33, %v1422_v52  ;;  %v1557_v43 = vpop.permute.xlu0 %1556  ;;  %v1567_v38 = vrot.slane %v1559_v27, 4  ;;  %v1662_v21 = vmul.f32 %v1653_v1, %v6892_v39 }
 0x1b3   : > { %v1809_v9 = vsel %vm258_vm0, %v7832_v57, %v1802_v51  ;;  %1432 = vst [vmem:[#allocation2 + $0x60] sm:$0xcc] %v1421_v12  ;;  %1433 = vst [vmem:[#allocation2 + $0x68] sm:$0xcc] %v1423_v22  ;;  %1103 = vrot.lane.b32.xlu1 %v1094_v18, %s5327_s20  ;;  %v1566_v8 = vrot.slane %v1557_v43, 4  ;;  %v7070_v33 = vmul.f32 %v1645_v50, %v1592_v25  ;;  %v1402_v25 = vrot.slane %v7015_v37, 6 }
 0x1b4   : > { %1101 = vrot.lane.b32.xlu0 %v1093_v49, %s5327_s20  ;;  %v5184_v46 = vpack.c.bf16 %v1210_v30, %v1201_v19  ;;  %v1810_v18 = vsel %vm1803_vm12, %v1809_v9, %v6758_v47  ;;  %v1510_v5 = vmul.f32 %v1501_v20, %v6892_v39  ;;  %v1403_v34 = vrot.slane %v5190_v6, 6  ;;  %v4308_v22 = vld [vmem:[#allocation2 + $0x40] sm:$0xff] }
 0x1b5   : > { %v1571_v41 = vsel %vm258_vm0, %v1566_v8, %v1567_v38  ;;  %v1714_v10 = vpop.permute.xlu1 %1713  ;;  %v5210_v24 = vpack.c.bf16 %v7058_v4, %v7058_v4  ;;  %v1980_v19 = vcombine.high %v1971_v36, %v1971_v36  ;;  %v1671_v30 = vcombine.high %v1662_v21, %v1662_v21 }
 0x1b6   : > { %v1573_v1 = vsel %vm256_vm1, %v1557_v43, %v1571_v41  ;;  %v7082_v50 = vpop.permute.xlu0 %1560  ;;  %v5200_v52 = vpack.c.bf16 %v7070_v33, %v7070_v33  ;;  %v1511_v37 = vmul.f32 %v1493_v11, %v1440_v3  ;;  %v1819_v60 = vmul.f32 %v1810_v18, %v6892_v39  ;;  %v7833_v18 = vld [vmem:[#allocation22_spill] sm:$0xff] }
 0x1b7   : > { %1584 = vst [vmem:[#allocation2 + $0x80] sm:$0x33] %v1573_v1  ;;  %1255 = vrot.lane.b32.xlu1 %v5185_v26, %s5326_s9  ;;  %v1568_v47 = vrot.slane %v7082_v50, 4  ;;  %v7098_v6 = vmul.f32 %v1802_v51, %v1749_v32  ;;  %v2111_v49 = vrot.slane %v6780_v56, 4  ;;  %v1519_v43 = vcombine.high %v1510_v5, %v1510_v5  ;;  %v4309_v51 = vld [vmem:[#allocation2 + $0x48] sm:$0xff] }
 0x1b8   : > { %1253 = vrot.lane.b32.xlu0 %v5184_v46, %s5326_s9  ;;  %v1723_v31 = vrot.slane %v1714_v10, 4  ;;  %v7109_v3 = vpack.c.bf16 %v1980_v19, %v1971_v36  ;;  %v5199_v41 = vpack.c.bf16 %v1671_v30, %v1662_v21  ;;  %v5195_v46 = vpack.c.bf16 %v1511_v37, %v1511_v37  ;;  %v2058_v32 = vld [vmem:[%s5767_s18 + $0x20] sm:$0xf] }
 0x1b9   : > { %v1574_v4 = vsel %vm258_vm0, %v1567_v38, %v1568_v47  ;;  %v7104_v12 = vpop.permute.xlu1 %1717  ;;  %v7834_v1 = vrot.slane %v7833_v18, 4  ;;  %v5194_v21 = vpack.c.bf16 %v1519_v43, %v1510_v5  ;;  %v1828_v37 = vcombine.high %v1819_v60, %v1819_v60 }
 0x1ba   : > { %v1575_v14 = vsel %vm256_vm1, %v1559_v27, %v1574_v4  ;;  %v1725_v11 = vrot.slane %v7104_v12, 4  ;;  %v1716_v57 = vpop.permute.xlu0 %1715  ;;  %v4312_v9 = vld [vmem:[#allocation2 + $0x60] sm:$0xff]  ;;  %v4313_v20 = vld [vmem:[#allocation2 + $0x68] sm:$0xff]  ;;  %v7127_v5 = vmul.f32 %v2111_v49, %v2058_v32  ;;  %v2829_v18 = vrot.slane %v6795_v63, 4 }
 0x1bb   : > { %1585 = vst [vmem:[#allocation2 + $0x88] sm:$0x33] %v1575_v14  ;;  %1412 = vrot.lane.b32.xlu1 %v1403_v34, %s5325_s30  ;;  %v1724_v8 = vrot.slane %v1716_v57, 4  ;;  %v5093_v33 = vcombine.high %v4308_v22, %v4312_v9  ;;  %v5095_v38 = vcombine.high %v4309_v51, %v4313_v20  ;;  %v5092_v26 = vcombine.low %v4308_v22, %v4312_v9 }
 0x1bc   : > { %1410 = vrot.lane.b32.xlu0 %v1402_v25, %s5325_s30  ;;  %v5094_v27 = vcombine.low %v4309_v51, %v4313_v20  ;;  %v2118_v4 = vsel %vm258_vm0, %v7834_v1, %v2111_v49  ;;  %v2520_v14 = vrot.slane %v6787_v16, 4  ;;  %v2368_v9 = vrot.slane %v6800_v53, 4  ;;  %v7838_v1 = vld [vmem:[#allocation23_spill] sm:$0xff] }
 0x1bd   : > { %v1728_v34 = vsel %vm258_vm0, %v1723_v31, %v1724_v8  ;;  %v1731_v22 = vsel %vm258_vm0, %v1724_v8, %v1725_v11  ;;  %v1868_v36 = vpop.permute.xlu1 %1867  ;;  %4665 = vmatprep.subr.bf16.mxu0 %v5093_v33  ;;  %4706 = vmatprep.subr.bf16.mxu1 %v5095_v38  ;;  %v7125_v20 = vrot.slane %v5210_v24, 6  ;;  %v2119_v43 = vsel %vm7835_vm9, %v2118_v4, %v6780_v56  ;;  %v7836_v8 = vld [vmem:[#allocation21_spill] sm:$0xff] }
 0x1be   : > { %v1730_v25 = vsel %vm1729_vm15, %v1714_v10, %v1728_v34  ;;  %v1732_v19 = vsel %vm1729_vm15, %v1716_v57, %v1731_v22  ;;  %4666 = vmatpush1.bf16.msra.mxu0 %v5092_v26  ;;  %4707 = vmatpush1.bf16.msra.mxu1 %v5094_v27  ;;  %v1866_v30 = vpop.permute.xlu0 %1865  ;;  %v1876_v31 = vrot.slane %v1868_v36, 4  ;;  %v1712_v10 = vrot.slane %v5200_v52, 6  ;;  %v2467_v57 = vld [vmem:[%s5767_s18 + $0x24] sm:$0xf] }
 0x1bf   : > { %1741 = vst [vmem:[#allocation2 + $0x80] sm:$0xcc] %v1730_v25  ;;  %1742 = vst [vmem:[#allocation2 + $0x88] sm:$0xcc] %v1732_v19  ;;  %1564 = vrot.lane.b32.xlu1 %v5195_v46, %s5324_s25  ;;  %v1875_v51 = vrot.slane %v1866_v30, 4  ;;  %v7837_v33 = vrot.slane %v7836_v8, 4  ;;  %v5205_v49 = vpack.c.bf16 %v7098_v6, %v7098_v6  ;;  %v5204_v56 = vpack.c.bf16 %v1828_v37, %v1819_v60 }
 0x1c0   : > { %1562 = vrot.lane.b32.xlu0 %v5194_v21, %s5324_s25  ;;  %v2020_v46 = vrot.slane %v7109_v3, 6  ;;  %v1711_v24 = vrot.slane %v5199_v41, 6  ;;  %v7839_v4 = vrot.slane %v7838_v1, 4  ;;  %v2128_v6 = vmul.f32 %v2119_v43, %v6892_v39  ;;  %v7158_v25 = vld [vmem:[%s5767_s18 + $0x1c] sm:$0xff] }
 0x1c1   : > { %v2527_v38 = vsel %vm258_vm0, %v7837_v33, %v2520_v14  ;;  %v1880_v26 = vsel %vm258_vm0, %v1875_v51, %v1876_v31  ;;  %v2023_v27 = vpop.permute.xlu1 %2022  ;;  %v5215_v22 = vpack.c.bf16 %v7127_v5, %v7127_v5  ;;  %v2538_v21 = vmul.f32 %v2520_v14, %v2467_v57  ;;  %v7840_v37 = vld [vmem:[#allocation3_spill] sm:$0xff]  ;;  %v7843_v8 = vld [vmem:[#allocation6_spill] sm:$0xff] }
 0x1c2   : > { %v1882_v52 = vsel %vm1881_vm14, %v1866_v30, %v1880_v26  ;;  %v7141_v32 = vpop.permute.xlu0 %1869  ;;  %v2375_v34 = vsel %vm258_vm0, %v7839_v4, %v2368_v9  ;;  %v2528_v60 = vsel %vm7753_vm13, %v2527_v38, %v6787_v16  ;;  %v7841_v51 = vld [vmem:[#allocation19_spill] sm:$0xff]  ;;  %vm7844_vm9 = vcmask 7168  }
 0x1c3   : > { %1893 = vst [vmem:[#allocation2 + $0xa0] sm:$0x33] %v1882_v52  ;;  %1721 = vrot.lane.b32.xlu1 %v1712_v10, %s5339_s7  ;;  %v7751_v41 = vrot.slane %v7141_v32, 4  ;;  %v2234_v39 = vrot.slane %v7841_v51, %v7840_v37  ;;  %v7842_v10 = vld [vmem:[#allocation4_spill] sm:$0xff]  ;;  %v2242_v16 = vrot.slane %v7841_v51, %v7843_v8  ;;  %v2376_v14 = vsel %vm7844_vm9, %v2375_v34, %v6800_v53  ;;  %v7845_v38 = vld [vmem:[#allocation7_spill] sm:$0xff] }
 0x1c4   : > { %1719 = vrot.lane.b32.xlu0 %v1711_v24, %s5339_s7  ;;  %v2238_v43 = vrot.slane %v7841_v51, %v7842_v10  ;;  %v2677_v57 = vrot.slane %v6815_v44, 4  ;;  %v2246_v26 = vrot.slane %v7841_v51, %v7845_v38  ;;  %v2032_v24 = vrot.slane %v2023_v27, 4 }
 0x1c5   : > { %v1883_v19 = vsel %vm258_vm0, %v1876_v31, %v7751_v41  ;;  %v7163_v30 = vpop.permute.xlu1 %2026  ;;  %v2137_v37 = vcombine.high %v2128_v6, %v2128_v6  ;;  %v2537_v34 = vmul.f32 %v2528_v60, %v7158_v25  ;;  %v5229_v10 = vpack.c.bf16 %v2538_v21, %v2538_v21  ;;  %v2315_v21 = vld [vmem:[%s5767_s18 + $0x24] sm:$0xf] }
 0x1c6   : > { %v1884_v31 = vsel %vm1881_vm14, %v1868_v36, %v1883_v19  ;;  %v2025_v33 = vpop.permute.xlu0 %2024  ;;  %v2034_v52 = vrot.slane %v7163_v30, 4  ;;  %v2249_v4 = vcombine.low %v2234_v39, %v2238_v43  ;;  %v2208_v36 = vld [vmem:[%s5767_s18 + $0x14] sm:$0xff]  ;;  %v2209_v19 = vld [vmem:[%s5767_s18 + $0x1c] sm:$0xff]  ;;  %v2250_v8 = vcombine.low %v2242_v16, %v2246_v26 }
 0x1c7   : > { %1894 = vst [vmem:[#allocation2 + $0xa8] sm:$0x33] %v1884_v31  ;;  %1873 = vrot.lane.b32.xlu1 %v5205_v49, %s5340_s13  ;;  %v2033_v1 = vrot.slane %v2025_v33, 4  ;;  %v7846_v51 = vrot.slane %v6214_v59, 4 }
 0x1c8   : > { %1871 = vrot.lane.b32.xlu0 %v5204_v56, %s5340_s13  ;;  %v2257_v60 = vmul.f32 %v2249_v4, %v2208_v36  ;;  %v2385_v56 = vmul.f32 %v7158_v25, %v2376_v14  ;;  %v2258_v59 = vmul.f32 %v2250_v8, %v2209_v19  ;;  %v5214_v36 = vpack.c.bf16 %v2137_v37, %v2128_v6 }
 0x1c9   : > { %v2836_v31 = vsel %vm258_vm0, %v7846_v51, %v2829_v18  ;;  %v2037_v38 = vsel %vm258_vm0, %v2032_v24, %v2033_v1  ;;  %v2040_v49 = vsel %vm258_vm0, %v2033_v1, %v2034_v52  ;;  %v2177_v39 = vpop.permute.xlu1 %2176  ;;  %v7847_v51 = vld [vmem:[#allocation11_spill] sm:$0xff]  ;;  %v2386_v8 = vmul.f32 %v2368_v9, %v2315_v21 }
 0x1ca   : > { %v2039_v43 = vsel %vm7753_vm13, %v2023_v27, %v2037_v38  ;;  %v2041_v16 = vsel %vm7753_vm13, %v2025_v33, %v2040_v49  ;;  %v2175_v26 = vpop.permute.xlu0 %2174  ;;  %v7848_v24 = vrot.slane %v7847_v51, 4  ;;  %v2185_v1 = vrot.slane %v2177_v39, 4  ;;  %v2776_v38 = vld [vmem:[%s5767_s18 + $0x24] sm:$0xf]  ;;  %v7849_v49 = vld [vmem:[#allocation24_spill] sm:$0xff] }
 0x1cb   : > { %2050 = vst [vmem:[#allocation2 + $0xa0] sm:$0xcc] %v2039_v43  ;;  %2051 = vst [vmem:[#allocation2 + $0xa8] sm:$0xcc] %v2041_v16  ;;  %2030 = vrot.lane.b32.xlu1 %v7125_v20, %s5336_s10  ;;  %v2184_v4 = vrot.slane %v2175_v26, 4  ;;  %v2265_v14 = vcombine.high %v2257_v60, %v2257_v60  ;;  %v2546_v27 = vcombine.high %v2537_v34, %v2537_v34  ;;  %v3136_v43 = vrot.slane %v7849_v49, 4 }
 0x1cc   : > { %v2684_v41 = vsel %vm258_vm0, %v7848_v24, %v2677_v57  ;;  %v2837_v33 = vsel %vm1729_vm15, %v2836_v31, %v6795_v63  ;;  %2028 = vrot.lane.b32.xlu0 %v2020_v46, %s5336_s10  ;;  %v2266_v19 = vcombine.high %v2258_v59, %v2258_v59  ;;  %v2394_v6 = vcombine.high %v2385_v56, %v2385_v56 }
 0x1cd   : > { %v2189_v20 = vsel %vm258_vm0, %v2184_v4, %v2185_v1  ;;  %v2432_v16 = vpop.permute.xlu1 %2431  ;;  %v5218_v51 = vpack.c.bf16 %v2265_v14, %v2257_v60  ;;  %v2685_v37 = vsel %vm1881_vm14, %v2684_v41, %v6815_v44  ;;  %v2587_v46 = vrot.slane %v5229_v10, 6  ;;  %v7851_v14 = vld [vmem:[#allocation17_spill] sm:$0xff] }
 0x1ce   : > { %v2191_v31 = vsel %vm7844_vm9, %v2175_v26, %v2189_v20  ;;  %v7216_v24 = vpop.permute.xlu0 %2178  ;;  %v5219_v3 = vpack.c.bf16 %v2266_v19, %v2258_v59  ;;  %v7220_v53 = vmul.f32 %v2829_v18, %v2776_v38  ;;  %v5228_v60 = vpack.c.bf16 %v2546_v27, %v2537_v34  ;;  %v7850_v26 = vld [vmem:[#allocation27_spill] sm:$0xff] }
 0x1cf   : > { %2202 = vst [vmem:[#allocation2 + $0xc0] sm:$0x33] %v2191_v31  ;;  %2182 = vrot.lane.b32.xlu1 %v5215_v22, %s5338_s5  ;;  %v7752_v9 = vrot.slane %v7216_v24, 4  ;;  %v2301_v41 = vrot.slane %v5218_v51, 6  ;;  %v2846_v21 = vmul.f32 %v2837_v33, %v7158_v25  ;;  %v2986_v4 = vrot.slane %v7850_v26, 4  ;;  %v4316_v38 = vld [vmem:[#allocation2 + $0x80] sm:$0xff] }
 0x1d0   : > { %2180 = vrot.lane.b32.xlu0 %v5214_v36, %s5338_s5  ;;  %v2302_v10 = vrot.slane %v5219_v3, 6  ;;  %v5224_v63 = vpack.c.bf16 %v2386_v8, %v2386_v8  ;;  %v2624_v18 = vld [vmem:[%s5767_s18 + $0x24] sm:$0xf]  ;;  %v2694_v59 = vmul.f32 %v2685_v37, %v7158_v25  ;;  %v7852_v5 = vrot.slane %v7851_v14, 4  ;;  %v4317_v37 = vld [vmem:[#allocation2 + $0x88] sm:$0xff] }
 0x1d1   : > { %v2192_v34 = vsel %vm258_vm0, %v2185_v1, %v7752_v9  ;;  %v7240_v27 = vpop.permute.xlu1 %2435  ;;  %2309 = vst [vmem:[#allocation2 + $0xd0] sm:$0xcc] %v2301_v41  ;;  %v5223_v36 = vpack.c.bf16 %v2394_v6, %v2385_v56  ;;  %v2441_v33 = vrot.slane %v2432_v16, 4  ;;  %v2855_v9 = vcombine.high %v2846_v21, %v2846_v21 }
 0x1d2   : > { %v3142_v22 = vsel %vm258_vm0, %v7852_v5, %v3136_v43  ;;  %v2193_v19 = vsel %vm7844_vm9, %v2177_v39, %v2192_v34  ;;  %v7755_v8 = vrot.slane %v7240_v27, 4  ;;  %v2434_v20 = vpop.permute.xlu0 %2433  ;;  %v4320_v51 = vld [vmem:[#allocation2 + $0xa0] sm:$0xff]  ;;  %v4321_v31 = vld [vmem:[#allocation2 + $0xa8] sm:$0xff]  ;;  %2310 = vst [vmem:[#allocation2 + $0xd8] sm:$0xcc] %v2302_v10  ;;  %v2695_v56 = vmul.f32 %v2677_v57, %v2624_v18  ;;  %v7855_v57 = vld [vmem:[#allocation26_spill] sm:$0xff] }
 0x1d3   : > { %2203 = vst [vmem:[#allocation2 + $0xc8] sm:$0x33] %v2193_v19  ;;  %2439 = vrot.lane.b32.xlu1 %v5224_v63, %s5337_s21  ;;  %v2442_v3 = vrot.slane %v2434_v20, 4  ;;  %v5101_v1 = vcombine.high %v4316_v38, %v4320_v51  ;;  %v5103_v14 = vcombine.high %v4317_v37, %v4321_v31  ;;  %v5100_v5 = vcombine.low %v4316_v38, %v4320_v51  ;;  %v7853_v39 = vld [vmem:[#allocation12_spill] sm:$0xff] }
 0x1d4   : > { %v7854_v6 = vrot.slane %v7853_v39, 4  ;;  %2437 = vrot.lane.b32.xlu0 %v5223_v36, %s5337_s21  ;;  %v5102_v10 = vcombine.low %v4317_v37, %v4321_v31  ;;  %v2586_v34 = vrot.slane %v5228_v60, 6  ;;  %v2703_v19 = vcombine.high %v2694_v59, %v2694_v59  ;;  %v7858_v37 = vld [vmem:[#allocation8_spill] sm:$0xff] }
 0x1d5   : > { %v2446_v63 = vsel %vm258_vm0, %v2441_v33, %v2442_v3  ;;  %v2449_v38 = vsel %vm258_vm0, %v2442_v3, %v7755_v8  ;;  %v2591_v51 = vpop.permute.xlu1 %2590  ;;  %4667 = vmatprep.subr.bf16.mxu0 %v5101_v1  ;;  %4708 = vmatprep.subr.bf16.mxu1 %v5103_v14  ;;  %v3143_v44 = vsel %vm410_vm3, %v3142_v22, %v7849_v49  ;;  %v3441_v18 = vrot.slane %v7855_v57, 4  ;;  %v3083_v14 = vld [vmem:[%s5767_s18 + $0x24] sm:$0xf] }
 0x1d6   : > { %v2992_v41 = vsel %vm258_vm0, %v7854_v6, %v2986_v4  ;;  %vm7856_vm9 = vcmask 1039360   ;;  %4668 = vmatpush1.bf16.msra.mxu0 %v5100_v5  ;;  %4709 = vmatpush1.bf16.msra.mxu1 %v5102_v10  ;;  %v2589_v36 = vpop.permute.xlu0 %2588  ;;  %v3291_v31 = vrot.slane %v7858_v37, 4  ;;  %v2599_v3 = vrot.slane %v2591_v51, 4  ;;  %v2933_v6 = vld [vmem:[%s5767_s18 + $0x24] sm:$0xf] }
 0x1d7   : > { %v2448_v39 = vsel %vm7856_vm9, %v2432_v16, %v2446_v63  ;;  %vm7857_vm13 = vmmov %vm7856_vm9  ;;  %v2993_v33 = vsel %vm256_vm1, %v2992_v41, %v7850_v26  ;;  %2596 = vrot.lane.b32.xlu1 %v2587_v46, %s5333_s8  ;;  %v2598_v22 = vrot.slane %v2589_v36, 4  ;;  %v5239_v16 = vpack.c.bf16 %v7220_v53, %v7220_v53 }
 0x1d8   : > { %v2450_v60 = vsel %vm7857_vm13, %v2434_v20, %v2449_v38  ;;  %2459 = vst [vmem:[#allocation2 + $0xe0] sm:$0x33] %v2448_v39  ;;  %2594 = vrot.lane.b32.xlu0 %v2586_v34, %s5333_s8  ;;  %v5238_v20 = vpack.c.bf16 %v2855_v9, %v2846_v21  ;;  %v5234_v1 = vpack.c.bf16 %v2695_v56, %v2695_v56  ;;  %v7859_v38 = vld [vmem:[#allocation15_spill] sm:$0xff]  ;;  %v7861_v21 = vld [vmem:[#allocation25_spill] sm:$0xff]  ;;  %vm7870_vm13 = vcmask 580608  }
 0x1d9   : > { %2460 = vst [vmem:[#allocation2 + $0xe8] sm:$0x33] %v2450_v60  ;;  %v3152_v5 = vmul.f32 %v3143_v44, %v7158_v25  ;;  %v2603_v41 = vsel %vm258_vm0, %v2598_v22, %v2599_v3  ;;  %v2741_v10 = vpop.permute.xlu1 %2740  ;;  %v5233_v63 = vpack.c.bf16 %v2703_v19, %v2694_v59  ;;  %v7860_v46 = vrot.slane %v7859_v38, 4  ;;  %vm7871_vm9 = vmmov %vm7870_vm13 }
 0x1da   : > { %v3002_v53 = vmul.f32 %v2993_v33, %v7158_v25  ;;  %v2605_v34 = vsel %vm1955_vm11, %v2589_v36, %v2603_v41  ;;  %v7280_v9 = vpop.permute.xlu0 %2592  ;;  %v7862_v56 = vrot.slane %v7861_v21, 4  ;;  %v2896_v19 = vrot.slane %v5239_v16, 6 }
 0x1db   : > { %v3447_v39 = vsel %vm258_vm0, %v7860_v46, %v3441_v18  ;;  %2616 = vst [vmem:[#allocation2 + $0xe0] sm:$0xcc] %v2605_v34  ;;  %2748 = vrot.lane.b32.xlu1 %v5234_v1, %s5335_s24  ;;  %v7754_v59 = vrot.slane %v7280_v9, 4  ;;  %v3153_v60 = vmul.f32 %v3136_v43, %v3083_v14  ;;  %v3003_v36 = vmul.f32 %v2986_v4, %v2933_v6  ;;  %v7863_v43 = vld [vmem:[#allocation28_spill] sm:$0xff] }
 0x1dc   : > { %v3297_v44 = vsel %vm258_vm0, %v7862_v56, %v3291_v31  ;;  %2746 = vrot.lane.b32.xlu0 %v5233_v63, %s5335_s24  ;;  %v2895_v33 = vrot.slane %v5238_v20, 6  ;;  %v3161_v22 = vcombine.high %v3152_v5, %v3152_v5  ;;  %v3448_v41 = vsel %vm719_vm4, %v3447_v39, %v7855_v57  ;;  %v3388_v56 = vld [vmem:[%s5767_s18 + $0x24] sm:$0xf] }
 0x1dd   : > { %v2606_v1 = vsel %vm258_vm0, %v2599_v3, %v7754_v59  ;;  %v7299_v38 = vpop.permute.xlu1 %2744  ;;  %v3011_v16 = vcombine.high %v3002_v53, %v3002_v53  ;;  %v3298_v49 = vsel %vm567_vm2, %v3297_v44, %v7858_v37  ;;  %v3746_v26 = vrot.slane %v7863_v43, 4 }
 0x1de   : > { %v2607_v4 = vsel %vm1955_vm11, %v2591_v51, %v2606_v1  ;;  %v2743_v20 = vpop.permute.xlu0 %2742  ;;  %v2750_v14 = vrot.slane %v2741_v10, 4  ;;  %v7756_v6 = vrot.slane %v7299_v38, 4  ;;  %v5249_v63 = vpack.c.bf16 %v3153_v60, %v3153_v60  ;;  %v3238_v60 = vld [vmem:[%s5767_s18 + $0x24] sm:$0xf] }
 0x1df   : > { %2617 = vst [vmem:[#allocation2 + $0xe8] sm:$0xcc] %v2607_v4  ;;  %2905 = vrot.lane.b32.xlu1 %v2896_v19, %s5332_s27  ;;  %v2751_v3 = vrot.slane %v2743_v20, 4  ;;  %v3457_v46 = vmul.f32 %v3448_v41, %v7158_v25  ;;  %v5244_v39 = vpack.c.bf16 %v3003_v36, %v3003_v36  ;;  %v3596_v34 = vrot.slane %v6877_v23, 4  ;;  %v7864_v36 = vld [vmem:[#allocation14_spill] sm:$0xff] }
 0x1e0   : > { %2903 = vrot.lane.b32.xlu0 %v2895_v33, %s5332_s27  ;;  %v5248_v21 = vpack.c.bf16 %v3161_v22, %v3152_v5  ;;  %v3307_v51 = vmul.f32 %v3298_v49, %v7158_v25  ;;  %v5243_v4 = vpack.c.bf16 %v3011_v16, %v3002_v53  ;;  %v7865_v41 = vrot.slane %v7864_v36, 4  ;;  %v4324_v49 = vld [vmem:[#allocation2 + $0xc0] sm:$0xff] }
 0x1e1   : > { %v2755_v44 = vsel %vm258_vm0, %v2750_v14, %v2751_v3  ;;  %v2758_v1 = vsel %vm258_vm0, %v2751_v3, %v7756_v6  ;;  %v2900_v19 = vpop.permute.xlu1 %2899  ;;  %v3458_v36 = vmul.f32 %v3441_v18, %v3388_v56  ;;  %v3466_v6 = vcombine.high %v3457_v46, %v3457_v46 }
 0x1e2   : > { %v3752_v59 = vsel %vm258_vm0, %v7865_v41, %v3746_v26  ;;  %v2757_v5 = vsel %vm1803_vm12, %v2741_v10, %v2755_v44  ;;  %v2759_v33 = vsel %vm1803_vm12, %v2743_v20, %v2758_v1  ;;  %v2898_v22 = vpop.permute.xlu0 %2897  ;;  %v4328_v14 = vld [vmem:[#allocation2 + $0xe0] sm:$0xff]  ;;  %v2908_v8 = vrot.slane %v2900_v19, 4  ;;  %v7866_v10 = vld [vmem:[#allocation5_spill] sm:$0xff] }
 0x1e3   : > { %2768 = vst [vmem:[#allocation2 + $0x100] sm:$0x33] %v2757_v5  ;;  %2769 = vst [vmem:[#allocation2 + $0x108] sm:$0x33] %v2759_v33  ;;  %3056 = vrot.lane.b32.xlu1 %v5244_v39, %s5334_s17  ;;  %v2907_v53 = vrot.slane %v2898_v22, 4  ;;  %v5109_v16 = vcombine.high %v4324_v49, %v4328_v14  ;;  %v5108_v3 = vcombine.low %v4324_v49, %v4328_v14  ;;  %v7867_v44 = vrot.slane %v7866_v10, 4 }
 0x1e4   : > { %3054 = vrot.lane.b32.xlu0 %v5243_v4, %s5334_s17  ;;  %v3202_v1 = vrot.slane %v5249_v63, 6  ;;  %v3308_v41 = vmul.f32 %v3291_v31, %v3238_v60  ;;  %v4051_v39 = vrot.slane %v6871_v28, 4  ;;  %v3201_v57 = vrot.slane %v5248_v21, 6  ;;  %v4325_v63 = vld [vmem:[#allocation2 + $0xc8] sm:$0xff] }
 0x1e5   : > { %v3602_v20 = vsel %vm258_vm0, %v7867_v44, %v3596_v34  ;;  %v2912_v5 = vsel %vm258_vm0, %v2907_v53, %v2908_v8  ;;  %v3049_v33 = vpop.permute.xlu1 %3048  ;;  %4669 = vmatprep.subr.bf16.mxu0 %v5109_v16  ;;  %v3316_v18 = vcombine.high %v3307_v51, %v3307_v51  ;;  %v3753_v56 = vsel %vm802_vm5, %v3752_v59, %v7863_v43 }
 0x1e6   : > { %v2914_v49 = vsel %vm1646_vm10, %v2898_v22, %v2912_v5  ;;  %4670 = vmatpush1.bf16.msra.mxu0 %v5108_v3  ;;  %v7340_v4 = vpop.permute.xlu0 %2901  ;;  %v4329_v37 = vld [vmem:[#allocation2 + $0xe8] sm:$0xff]  ;;  %v3603_v31 = vsel %vm876_vm7, %v3602_v20, %v6877_v23  ;;  %v5258_v59 = vpack.c.bf16 %v3466_v6, %v3457_v46  ;;  %v5259_v53 = vpack.c.bf16 %v3458_v36, %v3458_v36  ;;  %v3693_v3 = vld [vmem:[%s5767_s18 + $0x24] sm:$0xf] }
 0x1e7   : > { %2925 = vst [vmem:[#allocation2 + $0x100] sm:$0xcc] %v2914_v49  ;;  %3211 = vrot.lane.b32.xlu1 %v3202_v1, %s5329_s6  ;;  %v2909_v21 = vrot.slane %v7340_v4, 4  ;;  %v5111_v60 = vcombine.high %v4325_v63, %v4329_v37  ;;  %v5110_v14 = vcombine.low %v4325_v63, %v4329_v37  ;;  %v3901_v22 = vrot.slane %v6897_v62, 4  ;;  %v3543_v36 = vld [vmem:[%s5767_s18 + $0x24] sm:$0xf] }
 0x1e8   : > { %3209 = vrot.lane.b32.xlu0 %v3201_v57, %s5329_s6  ;;  %v5254_v16 = vpack.c.bf16 %v3308_v41, %v3308_v41  ;;  %v3762_v10 = vmul.f32 %v3753_v56, %v7158_v25  ;;  %v5253_v1 = vpack.c.bf16 %v3316_v18, %v3307_v51  ;;  %v7868_v6 = vrot.slane %v6640_v35, 4 }
 0x1e9   : > { %v2915_v44 = vsel %vm258_vm0, %v2908_v8, %v2909_v21  ;;  %v7353_v20 = vpop.permute.xlu1 %3052  ;;  %4710 = vmatprep.subr.bf16.mxu1 %v5111_v60  ;;  %v3612_v41 = vmul.f32 %v3603_v31, %v7158_v25  ;;  %v3058_v56 = vrot.slane %v3049_v33, 4  ;;  %v3506_v18 = vrot.slane %v5258_v59, 6 }
 0x1ea   : > { %v4057_v46 = vsel %vm258_vm0, %v7868_v6, %v4051_v39  ;;  %v2916_v5 = vsel %vm1646_vm10, %v2900_v19, %v2915_v44  ;;  %4711 = vmatpush1.bf16.msra.mxu1 %v5110_v14  ;;  %v3051_v57 = vpop.permute.xlu0 %3050  ;;  %v3060_v8 = vrot.slane %v7353_v20, 4  ;;  %v3507_v49 = vrot.slane %v5259_v53, 6  ;;  %v3998_v6 = vld [vmem:[%s5767_s18 + $0x24] sm:$0xf] }
 0x1eb   : > { %2926 = vst [vmem:[#allocation2 + $0x108] sm:$0xcc] %v2916_v5  ;;  %3361 = vrot.lane.b32.xlu1 %v5254_v16, %s5331_s19  ;;  %v3059_v51 = vrot.slane %v3051_v57, 4  ;;  %v3763_v35 = vmul.f32 %v3746_v26, %v3693_v3  ;;  %v7869_v63 = vrot.slane %v6686_v40, 4  ;;  %v4058_v37 = vsel %vm493_vm6, %v4057_v46, %v6871_v28 }
 0x1ec   : > { %3359 = vrot.lane.b32.xlu0 %v5253_v1, %s5331_s19  ;;  %v3613_v31 = vmul.f32 %v3596_v34, %v3543_v36  ;;  %v3771_v14 = vcombine.high %v3762_v10, %v3762_v10  ;;  %v3621_v40 = vcombine.high %v3612_v41, %v3612_v41  ;;  %v4206_v44 = vrot.slane %v6894_v13, 4 }
 0x1ed   : > { %v3907_v19 = vsel %vm258_vm0, %v7869_v63, %v3901_v22  ;;  %v3063_v60 = vsel %vm258_vm0, %v3058_v56, %v3059_v51  ;;  %v3065_v43 = vsel %vm258_vm0, %v3059_v51, %v3060_v8  ;;  %v3206_v26 = vpop.permute.xlu1 %3205  ;;  %v5269_v1 = vpack.c.bf16 %v3763_v35, %v3763_v35  ;;  %v3848_v51 = vld [vmem:[%s5767_s18 + $0x24] sm:$0xf] }
 0x1ee   : > { %v3064_v59 = vsel %vm336_vm8, %v3049_v33, %v3063_v60  ;;  %v3066_v53 = vsel %vm336_vm8, %v3051_v57, %v3065_v43  ;;  %v3204_v16 = vpop.permute.xlu0 %3203  ;;  %v3908_v3 = vsel %vm7870_vm13, %v3907_v19, %v6897_v62  ;;  %v3214_v23 = vrot.slane %v3206_v26, 4  ;;  %vm7872_vm13 = vmmov %vm7871_vm9 }
 0x1ef   : > { %3075 = vst [vmem:[#allocation2 + $0x120] sm:$0x33] %v3064_v59  ;;  %3076 = vst [vmem:[#allocation2 + $0x128] sm:$0x33] %v3066_v53  ;;  %3516 = vrot.lane.b32.xlu1 %v3507_v49, %s5328_s26  ;;  %v3213_v34 = vrot.slane %v3204_v16, 4  ;;  %v4067_v33 = vmul.f32 %v4058_v37, %v7158_v25  ;;  %v5264_v46 = vpack.c.bf16 %v3613_v31, %v3613_v31 }
 0x1f0   : > { %3514 = vrot.lane.b32.xlu0 %v3506_v18, %s5328_s26  ;;  %v5268_v57 = vpack.c.bf16 %v3771_v14, %v3762_v10  ;;  %v5263_v56 = vpack.c.bf16 %v3621_v40, %v3612_v41  ;;  %v3917_v63 = vmul.f32 %v3908_v3, %v7158_v25  ;;  %v4068_v35 = vmul.f32 %v4051_v39, %v3998_v6  ;;  %s5150_s26 = sshll.u32 %s7893_s16, 6 }
 0x1f1   : > { %v3218_v36 = vsel %vm258_vm0, %v3213_v34, %v3214_v23  ;;  %v3354_v5 = vpop.permute.xlu1 %3353  ;;  %v4212_v10 = vsel %vm258_vm0, %v4205_v45, %v4206_v44  ;;  %v3812_v41 = vrot.slane %v5269_v1, 6  ;;  %v4076_v37 = vcombine.high %v4067_v33, %v4067_v33  ;;  %s7676_s19 = scalar_lea.vmem %s7693_s4, %s5150_s26 }
 0x1f2   : > { %v3219_v49 = vsel %vm493_vm6, %v3204_v16, %v3218_v36  ;;  %v7394_v19 = vpop.permute.xlu0 %3207  ;;  %v3918_v31 = vmul.f32 %v3901_v22, %v3848_v51  ;;  %v3811_v14 = vrot.slane %v5268_v57, 6  ;;  %v3926_v28 = vcombine.high %v3917_v63, %v3917_v63  ;;  %v4332_v57 = vld [vmem:[#allocation2 + $0x100] sm:$0xff] }
 0x1f3   : > { %3230 = vst [vmem:[#allocation2 + $0x120] sm:$0xcc] %v3219_v49  ;;  %3666 = vrot.lane.b32.xlu1 %v5264_v46, %s5330_s12  ;;  %v3215_v18 = vrot.slane %v7394_v19, 4  ;;  %v4213_v45 = vsel %vm336_vm8, %v4212_v10, %v6894_v13  ;;  %v3363_v40 = vrot.slane %v3354_v5, 4  ;;  %v5279_v59 = vpack.c.bf16 %v4068_v35, %v4068_v35  ;;  %v4153_v13 = vld [vmem:[%s5767_s18 + $0x24] sm:$0xf] }
 0x1f4   : > { %3664 = vrot.lane.b32.xlu0 %v5263_v56, %s5330_s12  ;;  %v5278_v53 = vpack.c.bf16 %v4076_v37, %v4067_v33  ;;  %v5274_v16 = vpack.c.bf16 %v3918_v31, %v3918_v31  ;;  %v4222_v34 = vmul.f32 %v4213_v45, %v7158_v25  ;;  %v5273_v1 = vpack.c.bf16 %v3926_v28, %v3917_v63 }
 0x1f5   : > { %v3220_v60 = vsel %vm258_vm0, %v3214_v23, %v3215_v18  ;;  %v7409_v43 = vpop.permute.xlu1 %3357  ;;  %v4117_v10 = vrot.slane %v5279_v59, 6  ;;  %v4223_v25 = vmul.f32 %v4206_v44, %v4153_v13 }
 0x1f6   : > { %v3221_v55 = vsel %vm493_vm6, %v3206_v26, %v3220_v60  ;;  %v3356_v39 = vpop.permute.xlu0 %3355  ;;  %v3365_v62 = vrot.slane %v7409_v43, 4  ;;  %v4231_v37 = vcombine.high %v4222_v34, %v4222_v34 }
 0x1f7   : > { %3231 = vst [vmem:[#allocation2 + $0x128] sm:$0xcc] %v3221_v55  ;;  %3821 = vrot.lane.b32.xlu1 %v3812_v41, %s5327_s20  ;;  %v3364_v22 = vrot.slane %v3356_v39, 4  ;;  %v4116_v41 = vrot.slane %v5278_v53, 6  ;;  %v5284_v45 = vpack.c.bf16 %v4223_v25, %v4223_v25 }
 0x1f8   : > { %3819 = vrot.lane.b32.xlu0 %v3811_v14, %s5327_s20  ;;  %v4333_v14 = vld [vmem:[#allocation2 + $0x108] sm:$0xff]  ;;  %v5283_v59 = vpack.c.bf16 %v4231_v37, %v4222_v34 }
 0x1f9   : > { %v3368_v3 = vsel %vm258_vm0, %v3363_v40, %v3364_v22  ;;  %v3370_v26 = vsel %vm258_vm0, %v3364_v22, %v3365_v62  ;;  %v3511_v23 = vpop.permute.xlu1 %3510 }
 0x1fa   : > { %v3369_v6 = vsel %vm7871_vm9, %v3354_v5, %v3368_v3  ;;  %v3371_v46 = vsel %vm7872_vm13, %v3356_v39, %v3370_v26  ;;  %v3509_v36 = vpop.permute.xlu0 %3508  ;;  %v4336_v56 = vld [vmem:[#allocation2 + $0x120] sm:$0xff]  ;;  %v3519_v33 = vrot.slane %v3511_v23, 4  ;;  %vm7758_vm9 = vcmask 1045504  }
 0x1fb   : > { %3380 = vst [vmem:[#allocation2 + $0x140] sm:$0x33] %v3369_v6  ;;  %3381 = vst [vmem:[#allocation2 + $0x148] sm:$0x33] %v3371_v46  ;;  %3971 = vrot.lane.b32.xlu1 %v5274_v16, %s5326_s9  ;;  %v3518_v51 = vrot.slane %v3509_v36, 4  ;;  %v5117_v49 = vcombine.high %v4332_v57, %v4336_v56  ;;  %v5116_v35 = vcombine.low %v4332_v57, %v4336_v56  ;;  %vm7757_vm13 = vcmask 883712  }
 0x1fc   : > { %3969 = vrot.lane.b32.xlu0 %v5273_v1, %s5326_s9 }
 0x1fd   : > { %v3523_v63 = vsel %vm258_vm0, %v3518_v51, %v3519_v33  ;;  %v3659_v5 = vpop.permute.xlu1 %3658  ;;  %4671 = vmatprep.subr.bf16.mxu0 %v5117_v49  ;;  %v4356_v49 = vld [vmem:[%s7691_s2] sm:$0xff] }
 0x1fe   : > { %v3524_v31 = vsel %vm802_vm5, %v3509_v36, %v3523_v63  ;;  %4672 = vmatpush1.bf16.msra.mxu0 %v5116_v35  ;;  %v7429_v60 = vpop.permute.xlu0 %3512  ;;  %v4337_v28 = vld [vmem:[#allocation2 + $0x128] sm:$0xff]  ;;  %v3668_v3 = vrot.slane %v3659_v5, 4 }
 0x1ff   : > { %3535 = vst [vmem:[#allocation2 + $0x140] sm:$0xcc] %v3524_v31  ;;  %4126 = vrot.lane.b32.xlu1 %v4117_v10, %s5325_s30  ;;  %v3520_v55 = vrot.slane %v7429_v60, 4  ;;  %v5119_v39 = vcombine.high %v4333_v14, %v4337_v28  ;;  %v5118_v44 = vcombine.low %v4333_v14, %v4337_v28 }
 0x200   : > { %4124 = vrot.lane.b32.xlu0 %v4116_v41, %s5325_s30 }
 0x201   : > { %v3525_v40 = vsel %vm258_vm0, %v3519_v33, %v3520_v55  ;;  %v7437_v22 = vpop.permute.xlu1 %3662  ;;  %4712 = vmatprep.subr.bf16.mxu1 %v5119_v39 }
 0x202   : > { %v3526_v53 = vsel %vm802_vm5, %v3511_v23, %v3525_v40  ;;  %4713 = vmatpush1.bf16.msra.mxu1 %v5118_v44  ;;  %v3661_v16 = vpop.permute.xlu0 %3660  ;;  %v3670_v26 = vrot.slane %v7437_v22, 4 }
 0x203   : > { %3536 = vst [vmem:[#allocation2 + $0x148] sm:$0xcc] %v3526_v53  ;;  %4276 = vrot.lane.b32.xlu1 %v5284_v45, %s5324_s25  ;;  %v3669_v13 = vrot.slane %v3661_v16, 4 }
 0x204   : > { %4274 = vrot.lane.b32.xlu0 %v5283_v59, %s5324_s25 }
 0x205   : > { %v3673_v1 = vsel %vm258_vm0, %v3668_v3, %v3669_v13  ;;  %v3675_v6 = vsel %vm258_vm0, %v3669_v13, %v3670_v26  ;;  %v3816_v34 = vpop.permute.xlu1 %3815 }
 0x206   : > { %v3674_v23 = vsel %vm876_vm7, %v3659_v5, %v3673_v1  ;;  %v3676_v46 = vsel %vm876_vm7, %v3661_v16, %v3675_v6  ;;  %v3814_v36 = vpop.permute.xlu0 %3813  ;;  %v3824_v57 = vrot.slane %v3816_v34, 4  ;;  %v4340_v16 = vld [vmem:[#allocation2 + $0x140] sm:$0xff] }
 0x207   : > { %3685 = vst [vmem:[#allocation2 + $0x160] sm:$0x33] %v3674_v23  ;;  %3686 = vst [vmem:[#allocation2 + $0x168] sm:$0x33] %v3676_v46  ;;  %v3823_v56 = vrot.slane %v3814_v36, 4 }
 0x208   : > { %4359 = vperm.xlu0 %5312, %v4356_v49  }
 0x209   : > { %v3828_v33 = vsel %vm258_vm0, %v3823_v56, %v3824_v57  ;;  %v3964_v51 = vpop.permute.xlu1 %3963 }
 0x20a   : > { %v3829_v35 = vsel %vm719_vm4, %v3814_v36, %v3828_v33  ;;  %v7454_v10 = vpop.permute.xlu0 %3817  ;;  %v3973_v31 = vrot.slane %v3964_v51, 4  ;;  %v4341_v56 = vld [vmem:[#allocation2 + $0x148] sm:$0xff] }
 0x20b   : > { %3840 = vst [vmem:[#allocation2 + $0x160] sm:$0xcc] %v3829_v35  ;;  %v3825_v25 = vrot.slane %v7454_v10, 4 }
 0x20d   : > { %v3830_v63 = vsel %vm258_vm0, %v3824_v57, %v3825_v25  ;;  %v7460_v5 = vpop.permute.xlu1 %3967 }
 0x20e   : > { %v3831_v41 = vsel %vm719_vm4, %v3816_v34, %v3830_v63  ;;  %v3966_v37 = vpop.permute.xlu0 %3965  ;;  %v3975_v14 = vrot.slane %v7460_v5, 4 }
 0x20f   : > { %3841 = vst [vmem:[#allocation2 + $0x168] sm:$0xcc] %v3831_v41  ;;  %v3974_v28 = vrot.slane %v3966_v37, 4 }
 0x211   : > { %v3978_v39 = vsel %vm258_vm0, %v3973_v31, %v3974_v28  ;;  %v3980_v44 = vsel %vm258_vm0, %v3974_v28, %v3975_v14  ;;  %v4121_v45 = vpop.permute.xlu1 %4120 }
 0x212   : > { %v3979_v40 = vsel %vm567_vm2, %v3964_v51, %v3978_v39  ;;  %v3981_v59 = vsel %vm567_vm2, %v3966_v37, %v3980_v44  ;;  %v4119_v53 = vpop.permute.xlu0 %4118  ;;  %v4344_v3 = vld [vmem:[#allocation2 + $0x160] sm:$0xff]  ;;  %v4129_v13 = vrot.slane %v4121_v45, 4 }
 0x213   : > { %3990 = vst [vmem:[#allocation2 + $0x180] sm:$0x33] %v3979_v40  ;;  %3991 = vst [vmem:[#allocation2 + $0x188] sm:$0x33] %v3981_v59  ;;  %v4128_v1 = vrot.slane %v4119_v53, 4  ;;  %v5125_v6 = vcombine.high %v4340_v16, %v4344_v3  ;;  %v5124_v34 = vcombine.low %v4340_v16, %v4344_v3 }
 0x215   : > { %v4133_v23 = vsel %vm258_vm0, %v4128_v1, %v4129_v13  ;;  %v4269_v46 = vpop.permute.xlu1 %4268  ;;  %4673 = vmatprep.subr.bf16.mxu0 %v5125_v6 }
 0x216   : > { %v4134_v36 = vsel %vm410_vm3, %v4119_v53, %v4133_v23  ;;  %4674 = vmatpush1.bf16.msra.mxu0 %v5124_v34  ;;  %v7472_v57 = vpop.permute.xlu0 %4122  ;;  %v4345_v33 = vld [vmem:[#allocation2 + $0x168] sm:$0xff]  ;;  %v4278_v28 = vrot.slane %v4269_v46, 4 }
 0x217   : > { %4145 = vst [vmem:[#allocation2 + $0x180] sm:$0xcc] %v4134_v36  ;;  %v4130_v51 = vrot.slane %v7472_v57, 4  ;;  %v5127_v49 = vcombine.high %v4341_v56, %v4345_v33  ;;  %v5126_v35 = vcombine.low %v4341_v56, %v4345_v33 }
 0x219   : > { %v4135_v63 = vsel %vm258_vm0, %v4129_v13, %v4130_v51  ;;  %v7478_v41 = vpop.permute.xlu1 %4272  ;;  %4714 = vmatprep.subr.bf16.mxu1 %v5127_v49 }
 0x21a   : > { %v4136_v37 = vsel %vm410_vm3, %v4121_v45, %v4135_v63  ;;  %4715 = vmatpush1.bf16.msra.mxu1 %v5126_v35  ;;  %v4271_v31 = vpop.permute.xlu0 %4270  ;;  %v4280_v39 = vrot.slane %v7478_v41, 4 }
 0x21b   : > { %4146 = vst [vmem:[#allocation2 + $0x188] sm:$0xcc] %v4136_v37  ;;  %v4279_v44 = vrot.slane %v4271_v31, 4 }
 0x21d   : > { %v4283_v40 = vsel %vm258_vm0, %v4278_v28, %v4279_v44  ;;  %v4285_v59 = vsel %vm258_vm0, %v4279_v44, %v4280_v39  ;;  %v795_v53 = vpop.permute.xlu1 %794 }
 0x21e   : > { %v4284_v16 = vsel %vm256_vm1, %v4269_v46, %v4283_v40  ;;  %v4286_v3 = vsel %vm256_vm1, %v4271_v31, %v4285_v59  ;;  %v793_v13 = vpop.permute.xlu0 %792  ;;  %v800_v45 = vrot.slane %v795_v53, 4  ;;  %v4348_v37 = vld [vmem:[#allocation2 + $0x180] sm:$0xff] }
 0x21f   : > { %4295 = vst [vmem:[#allocation2 + $0x1a0] sm:$0x33] %v4284_v16  ;;  %4296 = vst [vmem:[#allocation2 + $0x1a8] sm:$0x33] %v4286_v3  ;;  %v799_v1 = vrot.slane %v793_v13, 4 }
 0x221   : > { %v806_v6 = vsel %vm258_vm0, %v798_v48, %v799_v1  ;;  %v808_v34 = vsel %vm258_vm0, %v799_v1, %v800_v45  ;;  %v947_v23 = vpop.permute.xlu1 %946 }
 0x222   : > { %v807_v36 = vsel %vm802_vm5, %v6907_v29, %v806_v6  ;;  %v809_v56 = vsel %vm802_vm5, %v793_v13, %v808_v34  ;;  %v945_v46 = vpop.permute.xlu0 %944  ;;  %v952_v33 = vrot.slane %v947_v23, 4  ;;  %v4349_v59 = vld [vmem:[#allocation2 + $0x188] sm:$0xff]  ;;  %v4302_v23 = vld [vmem:[#allocation2 + $0x10] sm:$0xff] }
 0x223   : > { %816 = vst [vmem:[#allocation2 + $0x30] sm:$0xcc] %v807_v36  ;;  %817 = vst [vmem:[#allocation2 + $0x38] sm:$0xcc] %v809_v56  ;;  %v951_v49 = vrot.slane %v945_v46, 4  ;;  %v4303_v36 = vld [vmem:[#allocation2 + $0x18] sm:$0xff] }
 0x225   : > { %v958_v35 = vsel %vm258_vm0, %v950_v61, %v951_v49  ;;  %v960_v63 = vsel %vm258_vm0, %v951_v49, %v952_v33  ;;  %v1104_v48 = vpop.permute.xlu1 %1103 }
 0x226   : > { %v959_v31 = vsel %vm876_vm7, %v6944_v58, %v958_v35  ;;  %v961_v29 = vsel %vm876_vm7, %v945_v46, %v960_v63  ;;  %v1109_v28 = vrot.slane %v1104_v48, 4  ;;  %v1102_v44 = vpop.permute.xlu0 %1101  ;;  %v4352_v40 = vld [vmem:[#allocation2 + $0x1a0] sm:$0x33]  ;;  %v4353_v53 = vld [vmem:[#allocation2 + $0x1a8] sm:$0x33] }
 0x227   : > { %968 = vst [vmem:[#allocation2 + $0x50] sm:$0x33] %v959_v31  ;;  %969 = vst [vmem:[#allocation2 + $0x58] sm:$0x33] %v961_v29  ;;  %v1108_v16 = vrot.slane %v1102_v44, 4  ;;  %v5133_v3 = vcombine.high %v4348_v37, %v4352_v40  ;;  %v5135_v61 = vcombine.high %v4349_v59, %v4353_v53  ;;  %v5132_v13 = vcombine.low %v4348_v37, %v4352_v40 }
 0x228   : > { %v5134_v45 = vcombine.low %v4349_v59, %v4353_v53  ;;  %v7516_v48 = vld [vmem:[%s7690_s1] sm:$0xf] }
 0x229   : > { %v1115_v1 = vsel %vm258_vm0, %v1107_v15, %v1108_v16  ;;  %v1117_v58 = vsel %vm258_vm0, %v1108_v16, %v1109_v28  ;;  %v1256_v6 = vpop.permute.xlu1 %1255  ;;  %5140 = vmatprep.subr.msk.bf16.mxu0 %vm7758_vm9, %v5133_v3  ;;  %5142 = vmatprep.subr.msk.bf16.mxu1 %vm7758_vm9, %v5135_v61  ;;  %v4640_v34 = vsel %vm7758_vm9, %v5132_v13, 0 }
 0x22a   : > { %v1116_v56 = vsel %vm719_vm4, %v6962_v0, %v1115_v1  ;;  %v1118_v46 = vsel %vm719_vm4, %v1102_v44, %v1117_v58  ;;  %v1261_v33 = vrot.slane %v1256_v6, 4  ;;  %4676 = vmatpush1.bf16.msra.mxu0 %v4640_v34  ;;  %v4646_v15 = vsel %vm7758_vm9, %v5134_v45, 0  ;;  %v1254_v49 = vpop.permute.xlu0 %1253  ;;  %v4306_v35 = vld [vmem:[#allocation2 + $0x30] sm:$0xff]  ;;  %v4307_v63 = vld [vmem:[#allocation2 + $0x38] sm:$0xff] }
 0x22b   : > { %1125 = vst [vmem:[#allocation2 + $0x50] sm:$0xcc] %v1116_v56  ;;  %1126 = vst [vmem:[#allocation2 + $0x58] sm:$0xcc] %v1118_v46  ;;  %4717 = vmatpush1.bf16.msra.mxu1 %v4646_v15  ;;  %v1260_v37 = vrot.slane %v1254_v49, 4  ;;  %v5088_v31 = vcombine.low %v4302_v23, %v4306_v35  ;;  %v5089_v0 = vcombine.high %v4302_v23, %v4306_v35 }
 0x22c   : > { %v5090_v29 = vcombine.low %v4303_v36, %v4307_v63  ;;  %v5091_v28 = vcombine.high %v4303_v36, %v4307_v63 }
 0x22d   : > { %v1267_v44 = vsel %vm258_vm0, %v1259_v7, %v1260_v37  ;;  %v1269_v40 = vsel %vm258_vm0, %v1260_v37, %v1261_v33  ;;  %v1413_v59 = vpop.permute.xlu1 %1412  ;;  %4745 = vmatprep.subr.bf16.mxu0 %v5089_v0  ;;  %5141 = vmatmul.mubr.msk.bf16.vlgmr.msra.gmra.mrb[0].mxu0 %vm7757_vm13, %v7516_v48 }
 0x22e   : > { %v1268_v53 = vsel %vm567_vm2, %v7005_v2, %v1267_v44  ;;  %v1270_v16 = vsel %vm567_vm2, %v1254_v49, %v1269_v40  ;;  %4786 = vmatprep.subr.bf16.mxu1 %v5091_v28  ;;  %5143 = vmatmul.mubr.msk.bf16.vlgmr.msra.gmra.mrb[0].mxu1 %vm7757_vm13, %v7516_v48  ;;  %v1411_v3 = vpop.permute.xlu0 %1410  ;;  %v1418_v7 = vrot.slane %v1413_v59, 4 }
 0x22f   : > { %1277 = vst [vmem:[#allocation2 + $0x70] sm:$0x33] %v1268_v53  ;;  %1278 = vst [vmem:[#allocation2 + $0x78] sm:$0x33] %v1270_v16  ;;  %4746 = vmatpush1.bf16.msra.mxu0 %v5088_v31  ;;  %4787 = vmatpush1.bf16.msra.mxu1 %v5090_v29  ;;  %v1417_v61 = vrot.slane %v1411_v3, 4 }
 0x230   : > { %4777 = vmatprep.mubr.bf16.mxu0 %v5341_v42  ;;  %4818 = vmatprep.mubr.bf16.mxu1 %v5341_v42 }
 0x231   : > { %v1424_v2 = vsel %vm258_vm0, %v1416_v17, %v1417_v61  ;;  %v1426_v13 = vsel %vm258_vm0, %v1417_v61, %v1418_v7  ;;  %v1565_v45 = vpop.permute.xlu1 %1564 }
 0x232   : > { %v1425_v1 = vsel %vm410_vm3, %v7030_v54, %v1424_v2  ;;  %v1427_v58 = vsel %vm410_vm3, %v1411_v3, %v1426_v13  ;;  %v1563_v6 = vpop.permute.xlu0 %1562  ;;  %v1570_v34 = vrot.slane %v1565_v45, 4  ;;  %v4310_v63 = vld [vmem:[#allocation2 + $0x50] sm:$0xff]  ;;  %v4311_v28 = vld [vmem:[#allocation2 + $0x58] sm:$0xff]  ;;  %v7873_v3 = vrot.slane %v7141_v32, 4 }
 0x233   : > { %1434 = vst [vmem:[#allocation2 + $0x70] sm:$0xcc] %v1425_v1  ;;  %1435 = vst [vmem:[#allocation2 + $0x78] sm:$0xcc] %v1427_v58  ;;  %v1569_v23 = vrot.slane %v1563_v6, 4 }
 0x235   : > { %v1576_v42 = vsel %vm258_vm0, %v1568_v47, %v1569_v23  ;;  %v1578_v36 = vsel %vm258_vm0, %v1569_v23, %v1570_v34  ;;  %v1722_v17 = vpop.permute.xlu1 %1721 }
 0x236   : > { %v1577_v56 = vsel %vm256_vm1, %v7082_v50, %v1576_v42  ;;  %v1579_v46 = vsel %vm256_vm1, %v1563_v6, %v1578_v36  ;;  %v1720_v54 = vpop.permute.xlu0 %1719  ;;  %v1727_v33 = vrot.slane %v1722_v17, 4 }
 0x237   : > { %1586 = vst [vmem:[#allocation2 + $0x90] sm:$0x33] %v1577_v56  ;;  %1587 = vst [vmem:[#allocation2 + $0x98] sm:$0x33] %v1579_v46  ;;  %v1726_v15 = vrot.slane %v1720_v54, 4  ;;  %v7876_v46 = vrot.slane %v7216_v24, 4 }
 0x239   : > { %v1733_v49 = vsel %vm258_vm0, %v1725_v11, %v1726_v15  ;;  %v1735_v35 = vsel %vm258_vm0, %v1726_v15, %v1727_v33  ;;  %v1874_v47 = vpop.permute.xlu1 %1873 }
 0x23a   : > { %v1734_v37 = vsel %vm1729_vm15, %v7104_v12, %v1733_v49  ;;  %v1736_v50 = vsel %vm1729_vm15, %v1720_v54, %v1735_v35  ;;  %v1879_v31 = vrot.slane %v1874_v47, 4  ;;  %v1872_v0 = vpop.permute.xlu0 %1871  ;;  %v4314_v29 = vld [vmem:[#allocation2 + $0x70] sm:$0xff]  ;;  %v4315_v44 = vld [vmem:[#allocation2 + $0x78] sm:$0xff]  ;;  %vm7874_vm15 = vcmask 56320  }
 0x23b   : > { %1743 = vst [vmem:[#allocation2 + $0x90] sm:$0xcc] %v1734_v37  ;;  %1744 = vst [vmem:[#allocation2 + $0x98] sm:$0xcc] %v1736_v50  ;;  %v1878_v40 = vrot.slane %v1872_v0, 4  ;;  %v5096_v59 = vcombine.low %v4310_v63, %v4314_v29  ;;  %v5097_v53 = vcombine.high %v4310_v63, %v4314_v29  ;;  %v5098_v11 = vcombine.low %v4311_v28, %v4315_v44 }
 0x23c   : > { %v5099_v16 = vcombine.high %v4311_v28, %v4315_v44  ;;  %vm7875_vm13 = vmmov %vm7874_vm15  ;;  %v7879_v63 = vrot.slane %v7240_v27, 4 }
 0x23d   : > { %v1885_v7 = vsel %vm258_vm0, %v7873_v3, %v1878_v40  ;;  %v1887_v12 = vsel %vm258_vm0, %v1878_v40, %v1879_v31  ;;  %v2031_v61 = vpop.permute.xlu1 %2030  ;;  %4747 = vmatprep.subr.bf16.mxu0 %v5097_v53 }
 0x23e   : > { %v1886_v2 = vsel %vm1881_vm14, %v7141_v32, %v1885_v7  ;;  %v1888_v13 = vsel %vm1881_vm14, %v1872_v0, %v1887_v12  ;;  %4788 = vmatprep.subr.bf16.mxu1 %v5099_v16  ;;  %4748 = vmatpush1.bf16.msra.mxu0 %v5096_v59  ;;  %v2029_v45 = vpop.permute.xlu0 %2028  ;;  %v2036_v1 = vrot.slane %v2031_v61, 4  ;;  %vm7877_vm14 = vcmask 7168  }
 0x23f   : > { %1895 = vst [vmem:[#allocation2 + $0xb0] sm:$0x33] %v1886_v2  ;;  %1896 = vst [vmem:[#allocation2 + $0xb8] sm:$0x33] %v1888_v13  ;;  %4789 = vmatpush1.bf16.msra.mxu1 %v5098_v11  ;;  %v2035_v58 = vrot.slane %v2029_v45, 4  ;;  %v7882_v61 = vrot.slane %v7280_v9, 4 }
 0x240   : > { %vm7878_vm9 = vmmov %vm7877_vm14 }
 0x241   : > { %v2042_v6 = vsel %vm258_vm0, %v2034_v52, %v2035_v58  ;;  %v2044_v34 = vsel %vm258_vm0, %v2035_v58, %v2036_v1  ;;  %v2183_v23 = vpop.permute.xlu1 %2182 }
 0x242   : > { %v2043_v32 = vsel %vm7874_vm15, %v7163_v30, %v2042_v6  ;;  %v2045_v42 = vsel %vm7875_vm13, %v2029_v45, %v2044_v34  ;;  %v2181_v36 = vpop.permute.xlu0 %2180  ;;  %v2188_v17 = vrot.slane %v2183_v23, 4  ;;  %v4318_v0 = vld [vmem:[#allocation2 + $0x90] sm:$0xff]  ;;  %vm7880_vm13 = vcmask 1039360   ;;  %v4319_v59 = vld [vmem:[#allocation2 + $0x98] sm:$0xff] }
 0x243   : > { %2052 = vst [vmem:[#allocation2 + $0xb0] sm:$0xcc] %v2043_v32  ;;  %2053 = vst [vmem:[#allocation2 + $0xb8] sm:$0xcc] %v2045_v42  ;;  %v2187_v56 = vrot.slane %v2181_v36, 4  ;;  %v7883_v23 = vrot.slane %v7299_v38, 4 }
 0x244   : > { %vm7881_vm15 = vmmov %vm7880_vm13 }
 0x245   : > { %v2194_v54 = vsel %vm258_vm0, %v7876_v46, %v2187_v56  ;;  %v2196_v33 = vsel %vm258_vm0, %v2187_v56, %v2188_v17  ;;  %v2440_v52 = vpop.permute.xlu1 %2439 }
 0x246   : > { %v2195_v15 = vsel %vm7877_vm14, %v7216_v24, %v2194_v54  ;;  %v2197_v49 = vsel %vm7878_vm9, %v2181_v36, %v2196_v33  ;;  %v2438_v30 = vpop.permute.xlu0 %2437  ;;  %v2445_v35 = vrot.slane %v2440_v52, 4 }
 0x247   : > { %2204 = vst [vmem:[#allocation2 + $0xd0] sm:$0x33] %v2195_v15  ;;  %2205 = vst [vmem:[#allocation2 + $0xd8] sm:$0x33] %v2197_v49  ;;  %v2444_v47 = vrot.slane %v2438_v30, 4 }
 0x249   : > { %v2451_v37 = vsel %vm258_vm0, %v7879_v63, %v2444_v47  ;;  %v2453_v50 = vsel %vm258_vm0, %v2444_v47, %v2445_v35  ;;  %v2597_v31 = vpop.permute.xlu1 %2596 }
 0x24a   : > { %v2452_v29 = vsel %vm7880_vm13, %v7240_v27, %v2451_v37  ;;  %v2454_v24 = vsel %vm7881_vm15, %v2438_v30, %v2453_v50  ;;  %v2602_v28 = vrot.slane %v2597_v31, 4  ;;  %v2595_v44 = vpop.permute.xlu0 %2594  ;;  %v4322_v40 = vld [vmem:[#allocation2 + $0xb0] sm:$0xff]  ;;  %v4323_v53 = vld [vmem:[#allocation2 + $0xb8] sm:$0xff] }
 0x24b   : > { %2461 = vst [vmem:[#allocation2 + $0xf0] sm:$0x33] %v2452_v29  ;;  %2462 = vst [vmem:[#allocation2 + $0xf8] sm:$0x33] %v2454_v24  ;;  %v2601_v11 = vrot.slane %v2595_v44, 4  ;;  %v5104_v16 = vcombine.low %v4318_v0, %v4322_v40  ;;  %v5105_v3 = vcombine.high %v4318_v0, %v4322_v40  ;;  %v5106_v7 = vcombine.low %v4319_v59, %v4323_v53 }
 0x24c   : > { %v5107_v12 = vcombine.high %v4319_v59, %v4323_v53 }
 0x24d   : > { %v2608_v2 = vsel %vm258_vm0, %v7882_v61, %v2601_v11  ;;  %v2610_v27 = vsel %vm258_vm0, %v2601_v11, %v2602_v28  ;;  %v2749_v13 = vpop.permute.xlu1 %2748  ;;  %4749 = vmatprep.subr.bf16.mxu0 %v5105_v3 }
 0x24e   : > { %v2609_v45 = vsel %vm1955_vm11, %v7280_v9, %v2608_v2  ;;  %v2611_v1 = vsel %vm1955_vm11, %v2595_v44, %v2610_v27  ;;  %4790 = vmatprep.subr.bf16.mxu1 %v5107_v12  ;;  %4750 = vmatpush1.bf16.msra.mxu0 %v5104_v16  ;;  %v2747_v58 = vpop.permute.xlu0 %2746  ;;  %v2754_v6 = vrot.slane %v2749_v13, 4  ;;  %v4326_v49 = vld [vmem:[#allocation2 + $0xd0] sm:$0xff]  ;;  %v4327_v37 = vld [vmem:[#allocation2 + $0xd8] sm:$0xff] }
 0x24f   : > { %2618 = vst [vmem:[#allocation2 + $0xf0] sm:$0xcc] %v2609_v45  ;;  %2619 = vst [vmem:[#allocation2 + $0xf8] sm:$0xcc] %v2611_v1  ;;  %4791 = vmatpush1.bf16.msra.mxu1 %v5106_v7  ;;  %v2753_v34 = vrot.slane %v2747_v58, 4 }
 0x251   : > { %v2760_v32 = vsel %vm258_vm0, %v7883_v23, %v2753_v34  ;;  %v2762_v42 = vsel %vm258_vm0, %v2753_v34, %v2754_v6  ;;  %v2906_v36 = vpop.permute.xlu1 %2905 }
 0x252   : > { %v2761_v9 = vsel %vm1803_vm12, %v7299_v38, %v2760_v32  ;;  %v2763_v17 = vsel %vm1803_vm12, %v2747_v58, %v2762_v42  ;;  %v2904_v56 = vpop.permute.xlu0 %2903  ;;  %v2911_v46 = vrot.slane %v2906_v36, 4 }
 0x253   : > { %2770 = vst [vmem:[#allocation2 + $0x110] sm:$0x33] %v2761_v9  ;;  %2771 = vst [vmem:[#allocation2 + $0x118] sm:$0x33] %v2763_v17  ;;  %v2910_v54 = vrot.slane %v2904_v56, 4 }
 0x255   : > { %v2917_v33 = vsel %vm258_vm0, %v2909_v21, %v2910_v54  ;;  %v2919_v52 = vsel %vm258_vm0, %v2910_v54, %v2911_v46  ;;  %v3057_v15 = vpop.permute.xlu1 %3056 }
 0x256   : > { %v2918_v30 = vsel %vm1646_vm10, %v7340_v4, %v2917_v33  ;;  %v2920_v38 = vsel %vm1646_vm10, %v2904_v56, %v2919_v52  ;;  %v3062_v35 = vrot.slane %v3057_v15, 4  ;;  %v3055_v47 = vpop.permute.xlu0 %3054  ;;  %v4330_v63 = vld [vmem:[#allocation2 + $0xf0] sm:$0xff]  ;;  %v4331_v50 = vld [vmem:[#allocation2 + $0xf8] sm:$0xff] }
 0x257   : > { %2927 = vst [vmem:[#allocation2 + $0x110] sm:$0xcc] %v2918_v30  ;;  %2928 = vst [vmem:[#allocation2 + $0x118] sm:$0xcc] %v2920_v38  ;;  %v3061_v31 = vrot.slane %v3055_v47, 4  ;;  %v5112_v0 = vcombine.low %v4326_v49, %v4330_v63  ;;  %v5113_v29 = vcombine.high %v4326_v49, %v4330_v63  ;;  %v5114_v21 = vcombine.low %v4327_v37, %v4331_v50 }
 0x258   : > { %v5115_v24 = vcombine.high %v4327_v37, %v4331_v50 }
 0x259   : > { %v3067_v28 = vsel %vm258_vm0, %v3060_v8, %v3061_v31  ;;  %v3069_v4 = vsel %vm258_vm0, %v3061_v31, %v3062_v35  ;;  %v3212_v44 = vpop.permute.xlu1 %3211  ;;  %4751 = vmatprep.subr.bf16.mxu0 %v5113_v29 }
 0x25a   : > { %v3068_v40 = vsel %vm336_vm8, %v7353_v20, %v3067_v28  ;;  %v3070_v59 = vsel %vm336_vm8, %v3055_v47, %v3069_v4  ;;  %4792 = vmatprep.subr.bf16.mxu1 %v5115_v24  ;;  %4752 = vmatpush1.bf16.msra.mxu0 %v5112_v0  ;;  %v3210_v53 = vpop.permute.xlu0 %3209  ;;  %v3217_v11 = vrot.slane %v3212_v44, 4  ;;  %vm7884_vm8 = vcmask 580608  }
 0x25b   : > { %3077 = vst [vmem:[#allocation2 + $0x130] sm:$0x33] %v3068_v40  ;;  %3078 = vst [vmem:[#allocation2 + $0x138] sm:$0x33] %v3070_v59  ;;  %4793 = vmatpush1.bf16.msra.mxu1 %v5114_v21  ;;  %v3216_v16 = vrot.slane %v3210_v53, 4 }
 0x25c   : > { %vm7885_vm10 = vmmov %vm7884_vm8 }
 0x25d   : > { %v3222_v8 = vsel %vm258_vm0, %v3215_v18, %v3216_v16  ;;  %v3224_v3 = vsel %vm258_vm0, %v3216_v16, %v3217_v11  ;;  %v3362_v7 = vpop.permute.xlu1 %3361 }
 0x25e   : > { %v3223_v20 = vsel %vm493_vm6, %v7394_v19, %v3222_v8  ;;  %v3225_v12 = vsel %vm493_vm6, %v3210_v53, %v3224_v3  ;;  %v3360_v61 = vpop.permute.xlu0 %3359  ;;  %v3367_v2 = vrot.slane %v3362_v7, 4  ;;  %v4334_v42 = vld [vmem:[#allocation2 + $0x110] sm:$0xff]  ;;  %v4335_v46 = vld [vmem:[#allocation2 + $0x118] sm:$0xff] }
 0x25f   : > { %3232 = vst [vmem:[#allocation2 + $0x130] sm:$0xcc] %v3223_v20  ;;  %3233 = vst [vmem:[#allocation2 + $0x138] sm:$0xcc] %v3225_v12  ;;  %v3366_v27 = vrot.slane %v3360_v61, 4 }
 0x261   : > { %v3372_v13 = vsel %vm258_vm0, %v3365_v62, %v3366_v27  ;;  %v3374_v45 = vsel %vm258_vm0, %v3366_v27, %v3367_v2  ;;  %v3517_v18 = vpop.permute.xlu1 %3516 }
 0x262   : > { %v3373_v1 = vsel %vm7884_vm8, %v7409_v43, %v3372_v13  ;;  %v3375_v58 = vsel %vm7885_vm10, %v3360_v61, %v3374_v45  ;;  %v3515_v19 = vpop.permute.xlu0 %3514  ;;  %v3522_v6 = vrot.slane %v3517_v18, 4 }
 0x263   : > { %3382 = vst [vmem:[#allocation2 + $0x150] sm:$0x33] %v3373_v1  ;;  %3383 = vst [vmem:[#allocation2 + $0x158] sm:$0x33] %v3375_v58  ;;  %v3521_v34 = vrot.slane %v3515_v19, 4 }
 0x265   : > { %v3527_v23 = vsel %vm258_vm0, %v3520_v55, %v3521_v34  ;;  %v3529_v32 = vsel %vm258_vm0, %v3521_v34, %v3522_v6  ;;  %v3667_v62 = vpop.permute.xlu1 %3666 }
 0x266   : > { %v3528_v36 = vsel %vm802_vm5, %v7429_v60, %v3527_v23  ;;  %v3530_v43 = vsel %vm802_vm5, %v3515_v19, %v3529_v32  ;;  %v3672_v9 = vrot.slane %v3667_v62, 4  ;;  %v3665_v17 = vpop.permute.xlu0 %3664  ;;  %v4338_v56 = vld [vmem:[#allocation2 + $0x130] sm:$0xff]  ;;  %v4339_v54 = vld [vmem:[#allocation2 + $0x138] sm:$0xff] }
 0x267   : > { %3537 = vst [vmem:[#allocation2 + $0x150] sm:$0xcc] %v3528_v36  ;;  %3538 = vst [vmem:[#allocation2 + $0x158] sm:$0xcc] %v3530_v43  ;;  %v3671_v33 = vrot.slane %v3665_v17, 4  ;;  %v5120_v52 = vcombine.low %v4334_v42, %v4338_v56  ;;  %v5121_v15 = vcombine.high %v4334_v42, %v4338_v56  ;;  %v5122_v55 = vcombine.low %v4335_v46, %v4339_v54 }
 0x268   : > { %v5123_v49 = vcombine.high %v4335_v46, %v4339_v54 }
 0x269   : > { %v3677_v30 = vsel %vm258_vm0, %v3670_v26, %v3671_v33  ;;  %v3679_v60 = vsel %vm258_vm0, %v3671_v33, %v3672_v9  ;;  %v3822_v38 = vpop.permute.xlu1 %3821  ;;  %4753 = vmatprep.subr.bf16.mxu0 %v5121_v15 }
 0x26a   : > { %v3678_v35 = vsel %vm876_vm7, %v7437_v22, %v3677_v30  ;;  %v3680_v47 = vsel %vm876_vm7, %v3665_v17, %v3679_v60  ;;  %4794 = vmatprep.subr.bf16.mxu1 %v5123_v49  ;;  %4754 = vmatpush1.bf16.msra.mxu0 %v5120_v52  ;;  %v3820_v63 = vpop.permute.xlu0 %3819  ;;  %v3827_v37 = vrot.slane %v3822_v38, 4 }
 0x26b   : > { %3687 = vst [vmem:[#allocation2 + $0x170] sm:$0x33] %v3678_v35  ;;  %3688 = vst [vmem:[#allocation2 + $0x178] sm:$0x33] %v3680_v47  ;;  %4795 = vmatpush1.bf16.msra.mxu1 %v5122_v55  ;;  %v3826_v50 = vrot.slane %v3820_v63, 4 }
 0x26d   : > { %v3832_v26 = vsel %vm258_vm0, %v3825_v25, %v3826_v50  ;;  %v3834_v31 = vsel %vm258_vm0, %v3826_v50, %v3827_v37  ;;  %v3972_v0 = vpop.permute.xlu1 %3971 }
 0x26e   : > { %v3833_v22 = vsel %vm719_vm4, %v7454_v10, %v3832_v26  ;;  %v3835_v29 = vsel %vm719_vm4, %v3820_v63, %v3834_v31  ;;  %v3970_v21 = vpop.permute.xlu0 %3969  ;;  %v3977_v24 = vrot.slane %v3972_v0, 4  ;;  %v4342_v3 = vld [vmem:[#allocation2 + $0x150] sm:$0xff]  ;;  %v4343_v2 = vld [vmem:[#allocation2 + $0x158] sm:$0xff]  ;;  %vm7890_vm4 = vcmask 883712  }
 0x26f   : > { %3842 = vst [vmem:[#allocation2 + $0x170] sm:$0xcc] %v3833_v22  ;;  %3843 = vst [vmem:[#allocation2 + $0x178] sm:$0xcc] %v3835_v29  ;;  %v3976_v28 = vrot.slane %v3970_v21, 4 }
 0x270   : > { %vm7891_vm5 = vmmov %vm7890_vm4 }
 0x271   : > { %v3982_v4 = vsel %vm258_vm0, %v3975_v14, %v3976_v28  ;;  %v3984_v44 = vsel %vm258_vm0, %v3976_v28, %v3977_v24  ;;  %v4127_v25 = vpop.permute.xlu1 %4126 }
 0x272   : > { %v3983_v40 = vsel %vm567_vm2, %v7460_v5, %v3982_v4  ;;  %v3985_v59 = vsel %vm567_vm2, %v3970_v21, %v3984_v44  ;;  %v4125_v10 = vpop.permute.xlu0 %4124  ;;  %v4132_v53 = vrot.slane %v4127_v25, 4 }
 0x273   : > { %3992 = vst [vmem:[#allocation2 + $0x190] sm:$0x33] %v3983_v40  ;;  %3993 = vst [vmem:[#allocation2 + $0x198] sm:$0x33] %v3985_v59  ;;  %v4131_v11 = vrot.slane %v4125_v10, 4 }
 0x275   : > { %v4137_v16 = vsel %vm258_vm0, %v4130_v51, %v4131_v11  ;;  %v4139_v8 = vsel %vm258_vm0, %v4131_v11, %v4132_v53  ;;  %v4277_v14 = vpop.permute.xlu1 %4276 }
 0x276   : > { %v4138_v7 = vsel %vm410_vm3, %v7472_v57, %v4137_v16  ;;  %v4140_v5 = vsel %vm410_vm3, %v4125_v10, %v4139_v8  ;;  %v4282_v20 = vrot.slane %v4277_v14, 4  ;;  %v4275_v12 = vpop.permute.xlu0 %4274  ;;  %v4346_v61 = vld [vmem:[#allocation2 + $0x170] sm:$0xff]  ;;  %v4347_v27 = vld [vmem:[#allocation2 + $0x178] sm:$0xff] }
 0x277   : > { %4147 = vst [vmem:[#allocation2 + $0x190] sm:$0xcc] %v4138_v7  ;;  %4148 = vst [vmem:[#allocation2 + $0x198] sm:$0xcc] %v4140_v5  ;;  %v4281_v13 = vrot.slane %v4275_v12, 4  ;;  %v5128_v45 = vcombine.low %v4342_v3, %v4346_v61  ;;  %v5129_v18 = vcombine.high %v4342_v3, %v4346_v61  ;;  %v5130_v51 = vcombine.low %v4343_v2, %v4347_v27 }
 0x278   : > { %v5131_v1 = vcombine.high %v4343_v2, %v4347_v27 }
 0x279   : > { %v4287_v58 = vsel %vm258_vm0, %v4280_v39, %v4281_v13  ;;  %v4289_v57 = vsel %vm258_vm0, %v4281_v13, %v4282_v20  ;;  %4755 = vmatprep.subr.bf16.mxu0 %v5129_v18  ;;  %vm7886_vm0 = vcmask 1045504  }
 0x27a   : > { %v4288_v19 = vsel %vm256_vm1, %v7478_v41, %v4287_v58  ;;  %v4290_v6 = vsel %vm256_vm1, %v4275_v12, %v4289_v57  ;;  %4796 = vmatprep.subr.bf16.mxu1 %v5131_v1  ;;  %4756 = vmatpush1.bf16.msra.mxu0 %v5128_v45  ;;  %vm7887_vm2 = vmmov %vm7886_vm0 }
 0x27b   : > { %4297 = vst [vmem:[#allocation2 + $0x1b0] sm:$0x33] %v4288_v19  ;;  %4298 = vst [vmem:[#allocation2 + $0x1b8] sm:$0x33] %v4290_v6  ;;  %4797 = vmatpush1.bf16.msra.mxu1 %v5130_v51 }
 0x27c   : > { %vm7888_vm3 = vmmov %vm7886_vm0 }
 0x27d   : > { %vm7889_vm1 = vmmov %vm7886_vm0 }
 0x27e   : > { %v4350_v34 = vld [vmem:[#allocation2 + $0x190] sm:$0xff]  ;;  %v4351_v32 = vld [vmem:[#allocation2 + $0x198] sm:$0xff] }
 0x282   : > { %v4354_v23 = vld [vmem:[#allocation2 + $0x1b0] sm:$0x33]  ;;  %v4355_v62 = vld [vmem:[#allocation2 + $0x1b8] sm:$0x33] }
 0x283   : > { %v5137_v42 = vcombine.high %v4350_v34, %v4354_v23  ;;  %v5139_v39 = vcombine.high %v4351_v32, %v4355_v62  ;;  %v5136_v36 = vcombine.low %v4350_v34, %v4354_v23  ;;  %v5138_v43 = vcombine.low %v4351_v32, %v4355_v62 }
 0x285   : > { %5144 = vmatprep.subr.msk.bf16.mxu0 %vm7886_vm0, %v5137_v42  ;;  %5146 = vmatprep.subr.msk.bf16.mxu1 %vm7887_vm2, %v5139_v39  ;;  %v4652_v41 = vsel %vm7888_vm3, %v5136_v36, 0  ;;  %v4658_v9 = vsel %vm7889_vm1, %v5138_v43, 0 }
 0x286   : > { %4758 = vmatpush1.bf16.msra.mxu0 %v4652_v41  ;;  %4799 = vmatpush1.bf16.msra.mxu1 %v4658_v9 }
 0x287   : > { %v4360_v17 = vpop.permute.xlu0 %4359 }
 0x289   : > { %5145 = vmatmul.mubr.msk.bf16.vlgmr.msra.gmra.mrb[4].mxu0 %vm7890_vm4, %v7516_v48  ;;  %5147 = vmatmul.mubr.msk.bf16.vlgmr.msra.gmra.mrb[4].mxu1 %vm7891_vm5, %v7516_v48 }
 0x300   : > { %v4697_v56 = vpop.f32.mrb[0].mxu0 }
 0x301   : > { %v4738_v46 = vpop.f32.mrb[0].mxu1  ;;  %v4699_v54 = vpop.f32.mrb[1].mxu0  ;;  %v4698_v33 = vadd.f32 %v4697_v56, %v4360_v17 }
 0x302   : > { %v4740_v52 = vpop.f32.mrb[1].mxu1  ;;  %v4701_v15 = vpop.f32.mrb[2].mxu0  ;;  %v4700_v55 = vadd.f32 %v4699_v54, %v4360_v17  ;;  %v4739_v49 = vadd.f32 %v4738_v46, %v4360_v17 }
 0x303   : > { %v4742_v48 = vpop.f32.mrb[2].mxu1  ;;  %v4702_v30 = vpop.f32.mrb[3].mxu0  ;;  %v4741_v60 = vadd.f32 %v4740_v52, %v4360_v17  ;;  %4827 = vst [vmem:[%s7676_s19] sm:$0xff] %v4698_v33 }
 0x304   : > { %v4743_v38 = vpop.f32.mrb[3].mxu1  ;;  %4828 = vst [vmem:[%s7676_s19 + $0x8] sm:$0xff] %v4700_v55  ;;  %4829 = vst [vmem:[%s7676_s19 + $0x10] sm:$0xff] %v4739_v49 }
 0x305   : > { %4830 = vst [vmem:[%s7676_s19 + $0x18] sm:$0xff] %v4741_v60 }
 0x35c   : > { %v4779_v35 = vpop.f32.mrb[4].mxu0  ;;  %v4820_v47 = vpop.f32.mrb[4].mxu1 }
 0x35d   : > { %v4780_v63 = vadd.f32 %v4779_v35, %v4360_v17  ;;  %v4821_v37 = vadd.f32 %v4820_v47, %v4360_v17  ;;  %v4781_v50 = vpop.f32.mrb[5].mxu0  ;;  %v4822_v26 = vpop.f32.mrb[5].mxu1 }
 0x35e   : > { %v4782_v31 = vadd.f32 %v4781_v50, %v4360_v17  ;;  %v4823_v0 = vadd.f32 %v4822_v26, %v4360_v17  ;;  %v4783_v22 = vpop.f32.mrb[6].mxu0  ;;  %v4824_v29 = vpop.f32.mrb[6].mxu1 }
 0x35f   : > { %4831 = vst [vmem:[%s7676_s19 + $0x20] sm:$0xff] %v4780_v63  ;;  %4833 = vst [vmem:[%s7676_s19 + $0x30] sm:$0xff] %v4821_v37  ;;  %v4784_v21 = vpop.f32.mrb[7].mxu0  ;;  %v4825_v24 = vpop.f32.mrb[7].mxu1 }
 0x360   : > { %4832 = vst [vmem:[%s7676_s19 + $0x28] sm:$0xff] %v4782_v31  ;;  %4834 = vst [vmem:[%s7676_s19 + $0x38] sm:$0xff] %v4823_v0 }
 0x361 PF: > { %s14_s15 = sadd.s32 1, %s5322_s15  }
 0x362   : > { %p11_p4 = scmp.ge.s32.totalorder %s14_s15, 4  }
 0x364   :  { %13 = sbr.rel (!%p11_p4) target bundleno = 1 (0x1), region = 92 }

</bundles_post_ra>
